<compile_context>
chip_gen: v7x
topology: tpu7x:2x2x1
jax: 0.10.0
libtpu: 0.0.40
codegen_flags: <defaults>
</compile_context>

<pallas_src>
import jax
import jax.numpy as jnp
from jax.experimental import pallas as pl
from jax.experimental.pallas import tpu as pltpu

HIDDEN = 768        # BERT hidden size
FC1 = 512           # fc1 output width
NUM_CLASSES = 3     # fc2 output width (true)
PAD_CLASSES = 128   # fc2 output width padded to one full lane tile
VOCAB = 64          # synthetic stand-in vocab
VOCAB_PAD = 128     # vocab padded to one full lane tile
NEG_BIG = -1e30     # padded-class mask value (baked into b2)


def fused_bert_arch_kernel(ids_ref, mask_ref, emb_ref, pw_ref, pb_ref,
                           w1_ref, b1_ref, w2_ref, b2_ref, o_ref):
    """emb-lookup+masked-mean -> pooler dense+tanh -> fc1+ReLU -> fc2 -> LogSoftmax."""
    ids = ids_ref[...]                                  # (TB, S) int32
    m = mask_ref[...].astype(jnp.float32)               # (TB, S)
    tb, seq = ids.shape

    # ---- backbone stand-in: masked one-hot token counts, then counts @ emb ----
    # counts[b, v] = sum_s mask[b, s] * (ids[b, s] == v)   (exact gather+sum)
    viota = jax.lax.broadcasted_iota(jnp.int32, (tb, VOCAB_PAD), 1)  # hoisted
    counts = jnp.zeros((tb, VOCAB_PAD), jnp.float32)
    for s in range(seq):                                 # static, small S
        counts = counts + ((viota == ids[:, s:s + 1]).astype(jnp.float32)
                           * m[:, s:s + 1])
    denom = jnp.maximum(jnp.sum(m, axis=-1, keepdims=True), 1.0)     # (TB, 1)
    pooled = jnp.dot(counts.astype(jnp.bfloat16), emb_ref[...],
                     preferred_element_type=jnp.float32) / denom     # (TB, 768)
    pooled = pooled.astype(jnp.bfloat16)

    # ---- pooler: tanh(pooled @ pool_w + pool_b) ----
    h = jnp.dot(pooled, pw_ref[...],
                preferred_element_type=jnp.float32) + pb_ref[...]
    cls_hs = jnp.tanh(h).astype(jnp.bfloat16)            # (TB, 768)

    # ---- fc1 + ReLU ----
    h1 = jnp.dot(cls_hs, w1_ref[...],
                 preferred_element_type=jnp.float32) + b1_ref[...]
    h1 = jnp.maximum(h1, 0.0).astype(jnp.bfloat16)       # (TB, 512)

    # Dropout(p=0.3): identity in eval mode.

    # ---- fc2 (padded to 128 lanes; padded bias columns carry NEG_BIG mask) ----
    logits = jnp.dot(h1, w2_ref[...],
                     preferred_element_type=jnp.float32) + b2_ref[...]  # (TB, 128)

    # ---- LogSoftmax over the class axis (numerically stable) ----
    mx = jnp.max(logits, axis=-1, keepdims=True)
    z = logits - mx
    lse = jnp.log(jnp.sum(jnp.exp(z), axis=-1, keepdims=True))
    o_ref[...] = z - lse                                  # (TB, 128) f32


def _pick_batch_tile(batch):
    """Per-generation batch tile (perf review): 128 on v5e, 256 on v6e/v7x;
    >=2 grid steps on v7x when possible; multiples of 16 for bf16 packing."""
    kind = ""
    try:
        kind = jax.devices()[0].device_kind.lower()
    except Exception:
        pass
    is_v5 = "v5" in kind
    is_v7 = "v7" in kind
    base = 128 if is_v5 else 256
    if batch <= 16:
        return 16
    tb = min(base, ((batch + 15) // 16) * 16)
    if is_v7 and batch >= 2 * 128:
        # keep >=2 batch tiles so ("parallel",) can use both v7x TensorCores
        while tb > 128 and (batch + tb - 1) // tb < 2:
            tb //= 2
    return tb


def bert_arch_forward(sent_id, mask, params):
    """Fully fused forward. Returns (B, NUM_CLASSES) f32 log-probabilities."""
    B, S = sent_id.shape
    tb = _pick_batch_tile(B)
    Bp = ((B + tb - 1) // tb) * tb
    if Bp != B:
        pad = ((0, Bp - B), (0, 0))
        sent_id = jnp.pad(sent_id, pad)
        mask = jnp.pad(mask, pad)

    out = pl.pallas_call(
        fused_bert_arch_kernel,
        out_shape=jax.ShapeDtypeStruct((Bp, PAD_CLASSES), jnp.float32),
        grid=(Bp // tb,),
        in_specs=[
            pl.BlockSpec((tb, S), lambda i: (i, 0)),             # sent_id (tiled)
            pl.BlockSpec((tb, S), lambda i: (i, 0)),             # mask (tiled)
            pl.BlockSpec((VOCAB_PAD, HIDDEN), lambda i: (0, 0)), # emb (resident)
            pl.BlockSpec((HIDDEN, HIDDEN), lambda i: (0, 0)),    # pool_w (resident)
            pl.BlockSpec((1, HIDDEN), lambda i: (0, 0)),         # pool_b
            pl.BlockSpec((HIDDEN, FC1), lambda i: (0, 0)),       # w1 (resident)
            pl.BlockSpec((1, FC1), lambda i: (0, 0)),            # b1
            pl.BlockSpec((FC1, PAD_CLASSES), lambda i: (0, 0)),  # w2 padded (resident)
            pl.BlockSpec((1, PAD_CLASSES), lambda i: (0, 0)),    # b2 padded (+mask)
        ],
        out_specs=pl.BlockSpec((tb, PAD_CLASSES), lambda i: (i, 0)),
        compiler_params=pltpu.CompilerParams(
            dimension_semantics=("parallel",)),
    )(sent_id.astype(jnp.int32), mask.astype(jnp.int32),
      params["emb"], params["pool_w"], params["pool_b"],
      params["w1"], params["b1"], params["w2"], params["b2"])

    return out[:B, :NUM_CLASSES]


def bert_arch_reference(sent_id, mask, params):
    """Plain-JAX f32 reference of the same forward (for correctness checking)."""
    emb = params["emb"].astype(jnp.float32)[sent_id]          # (B, S, 768)
    m = mask.astype(jnp.float32)[..., None]
    pooled = (emb * m).sum(axis=1) / jnp.maximum(m.sum(axis=1), 1.0)
    cls_hs = jnp.tanh(pooled @ params["pool_w"].astype(jnp.float32)
                      + params["pool_b"])
    h1 = jnp.maximum(cls_hs @ params["w1"].astype(jnp.float32)
                     + params["b1"], 0.0)
    logits = (h1 @ params["w2"].astype(jnp.float32)[:, :NUM_CLASSES]
              + params["b2"][:, :NUM_CLASSES])
    return jax.nn.log_softmax(logits, axis=-1)


def init_params(key):
    ks = jax.random.split(key, 7)
    emb = jax.random.normal(ks[0], (VOCAB, HIDDEN), jnp.float32)
    emb_p = jnp.zeros((VOCAB_PAD, HIDDEN), jnp.float32).at[:VOCAB].set(emb)

    w2 = jax.random.normal(ks[3], (FC1, NUM_CLASSES), jnp.float32) * 0.05
    w2_p = jnp.zeros((FC1, PAD_CLASSES), jnp.float32).at[:, :NUM_CLASSES].set(w2)
    b2 = jax.random.normal(ks[4], (1, NUM_CLASSES), jnp.float32) * 0.05
    # class mask baked into the padded bias columns (no in-kernel iota/where)
    b2_p = (jnp.full((1, PAD_CLASSES), NEG_BIG, jnp.float32)
            .at[:, :NUM_CLASSES].set(b2[0]))

    return {
        "emb": emb_p.astype(jnp.bfloat16),
        "pool_w": (jax.random.normal(ks[1], (HIDDEN, HIDDEN), jnp.float32)
                   * 0.02).astype(jnp.bfloat16),
        "pool_b": jax.random.normal(ks[5], (1, HIDDEN), jnp.float32) * 0.02,
        "w1": (jax.random.normal(ks[2], (HIDDEN, FC1), jnp.float32)
               * 0.02).astype(jnp.bfloat16),
        "b1": jax.random.normal(ks[6], (1, FC1), jnp.float32) * 0.02,
        "w2": w2_p.astype(jnp.bfloat16),
        "b2": b2_p,
    }


if __name__ == "__main__":
    params = init_params(jax.random.PRNGKey(0))

    B, S = 8, 16  # small batch / sequence length
    kid, _ = jax.random.split(jax.random.PRNGKey(0))
    sent_id = jax.random.randint(kid, (B, S), 0, VOCAB, dtype=jnp.int32)
    # variable-length attention masks to exercise the masked mean
    lengths = (S // 2) + (jnp.arange(B) % (S // 2))
    mask = (jnp.arange(S)[None, :] < lengths[:, None]).astype(jnp.int32)

    out = jax.block_until_ready(bert_arch_forward(sent_id, mask, params))
    ref = bert_arch_reference(sent_id, mask, params)

    assert out.shape == (B, NUM_CLASSES)
    assert bool(jnp.all(jnp.isfinite(out)))
    # log-softmax rows should exponentiate-sum to ~1
    row_sums = jnp.exp(out).sum(axis=1)
    assert bool(jnp.all(jnp.abs(row_sums - 1.0) < 1e-4))
    # bf16 intermediates vs f32 reference: loose-but-meaningful tolerance
    max_err = float(jnp.max(jnp.abs(out - ref)))
    assert max_err < 5e-2, max_err

    print("KERNEL_OK")
</pallas_src>

<mosaic_0001>
module attributes {stable_mosaic.version = 11 : i64} {
  func.func @fused_bert_arch_kernel(%arg0: i32, %arg1: memref<16x16xi32, #tpu.memory_space<vmem>>, %arg2: memref<16x16xi32, #tpu.memory_space<vmem>>, %arg3: memref<128x768xbf16, #tpu.memory_space<vmem>>, %arg4: memref<768x768xbf16, #tpu.memory_space<vmem>>, %arg5: memref<1x768xf32, #tpu.memory_space<vmem>>, %arg6: memref<768x512xbf16, #tpu.memory_space<vmem>>, %arg7: memref<1x512xf32, #tpu.memory_space<vmem>>, %arg8: memref<512x128xbf16, #tpu.memory_space<vmem>>, %arg9: memref<1x128xf32, #tpu.memory_space<vmem>>, %arg10: memref<16x128xf32, #tpu.memory_space<vmem>>) attributes {dimension_semantics = [#tpu.dimension_semantics<parallel>], iteration_bounds = array<i64: 1>, scalar_prefetch = 0 : i64, scratch_operands = 0 : i64, tpu.core_type = #tpu.core_type<tc>, window_params = [{transform_indices = @transform_0, window_bounds = array<i64: 16, 16>}, {transform_indices = @transform_1, window_bounds = array<i64: 16, 16>}, {pipeline_mode = #tpu.pipeline_mode<synchronous>, transform_indices = @transform_2, window_bounds = array<i64: 128, 768>}, {pipeline_mode = #tpu.pipeline_mode<synchronous>, transform_indices = @transform_3, window_bounds = array<i64: 768, 768>}, {pipeline_mode = #tpu.pipeline_mode<synchronous>, transform_indices = @transform_4, window_bounds = array<i64: 1, 768>}, {pipeline_mode = #tpu.pipeline_mode<synchronous>, transform_indices = @transform_5, window_bounds = array<i64: 768, 512>}, {pipeline_mode = #tpu.pipeline_mode<synchronous>, transform_indices = @transform_6, window_bounds = array<i64: 1, 512>}, {pipeline_mode = #tpu.pipeline_mode<synchronous>, transform_indices = @transform_7, window_bounds = array<i64: 512, 128>}, {pipeline_mode = #tpu.pipeline_mode<synchronous>, transform_indices = @transform_8, window_bounds = array<i64: 1, 128>}, {transform_indices = @transform_9, window_bounds = array<i64: 16, 128>}]} {
    %c0 = arith.constant 0 : index
    %c0_0 = arith.constant 0 : index
    %0 = vector.load %arg1[%c0, %c0_0] : memref<16x16xi32, #tpu.memory_space<vmem>>, vector<16x16xi32>
    %c0_1 = arith.constant 0 : index
    %c0_2 = arith.constant 0 : index
    %1 = vector.load %arg2[%c0_1, %c0_2] : memref<16x16xi32, #tpu.memory_space<vmem>>, vector<16x16xi32>
    %2 = arith.sitofp %1 : vector<16x16xi32> to vector<16x16xf32>
    %3 = tpu.iota {dimensions = array<i32: 1>} : vector<16x128xi32>
    %cst = arith.constant 0.000000e+00 : f32
    %4 = vector.broadcast %cst : f32 to vector<16x128xf32>
    %5 = vector.extract_strided_slice %0 {offsets = [0, 0], sizes = [16, 1], strides = [1, 1]} : vector<16x16xi32> to vector<16x1xi32>
    %6 = vector.broadcast %5 : vector<16x1xi32> to vector<16x128xi32>
    %7 = arith.cmpi eq, %3, %6 : vector<16x128xi32>
    %8 = arith.extui %7 : vector<16x128xi1> to vector<16x128xi32>
    %9 = arith.sitofp %8 : vector<16x128xi32> to vector<16x128xf32>
    %10 = vector.extract_strided_slice %2 {offsets = [0, 0], sizes = [16, 1], strides = [1, 1]} : vector<16x16xf32> to vector<16x1xf32>
    %11 = vector.broadcast %10 : vector<16x1xf32> to vector<16x128xf32>
    %12 = arith.mulf %9, %11 : vector<16x128xf32>
    %13 = arith.addf %4, %12 : vector<16x128xf32>
    %14 = vector.extract_strided_slice %0 {offsets = [0, 1], sizes = [16, 1], strides = [1, 1]} : vector<16x16xi32> to vector<16x1xi32>
    %15 = vector.broadcast %14 : vector<16x1xi32> to vector<16x128xi32>
    %16 = arith.cmpi eq, %3, %15 : vector<16x128xi32>
    %17 = arith.extui %16 : vector<16x128xi1> to vector<16x128xi32>
    %18 = arith.sitofp %17 : vector<16x128xi32> to vector<16x128xf32>
    %19 = vector.extract_strided_slice %2 {offsets = [0, 1], sizes = [16, 1], strides = [1, 1]} : vector<16x16xf32> to vector<16x1xf32>
    %20 = vector.broadcast %19 : vector<16x1xf32> to vector<16x128xf32>
    %21 = arith.mulf %18, %20 : vector<16x128xf32>
    %22 = arith.addf %13, %21 : vector<16x128xf32>
    %23 = vector.extract_strided_slice %0 {offsets = [0, 2], sizes = [16, 1], strides = [1, 1]} : vector<16x16xi32> to vector<16x1xi32>
    %24 = vector.broadcast %23 : vector<16x1xi32> to vector<16x128xi32>
    %25 = arith.cmpi eq, %3, %24 : vector<16x128xi32>
    %26 = arith.extui %25 : vector<16x128xi1> to vector<16x128xi32>
    %27 = arith.sitofp %26 : vector<16x128xi32> to vector<16x128xf32>
    %28 = vector.extract_strided_slice %2 {offsets = [0, 2], sizes = [16, 1], strides = [1, 1]} : vector<16x16xf32> to vector<16x1xf32>
    %29 = vector.broadcast %28 : vector<16x1xf32> to vector<16x128xf32>
    %30 = arith.mulf %27, %29 : vector<16x128xf32>
    %31 = arith.addf %22, %30 : vector<16x128xf32>
    %32 = vector.extract_strided_slice %0 {offsets = [0, 3], sizes = [16, 1], strides = [1, 1]} : vector<16x16xi32> to vector<16x1xi32>
    %33 = vector.broadcast %32 : vector<16x1xi32> to vector<16x128xi32>
    %34 = arith.cmpi eq, %3, %33 : vector<16x128xi32>
    %35 = arith.extui %34 : vector<16x128xi1> to vector<16x128xi32>
    %36 = arith.sitofp %35 : vector<16x128xi32> to vector<16x128xf32>
    %37 = vector.extract_strided_slice %2 {offsets = [0, 3], sizes = [16, 1], strides = [1, 1]} : vector<16x16xf32> to vector<16x1xf32>
    %38 = vector.broadcast %37 : vector<16x1xf32> to vector<16x128xf32>
    %39 = arith.mulf %36, %38 : vector<16x128xf32>
    %40 = arith.addf %31, %39 : vector<16x128xf32>
    %41 = vector.extract_strided_slice %0 {offsets = [0, 4], sizes = [16, 1], strides = [1, 1]} : vector<16x16xi32> to vector<16x1xi32>
    %42 = vector.broadcast %41 : vector<16x1xi32> to vector<16x128xi32>
    %43 = arith.cmpi eq, %3, %42 : vector<16x128xi32>
    %44 = arith.extui %43 : vector<16x128xi1> to vector<16x128xi32>
    %45 = arith.sitofp %44 : vector<16x128xi32> to vector<16x128xf32>
    %46 = vector.extract_strided_slice %2 {offsets = [0, 4], sizes = [16, 1], strides = [1, 1]} : vector<16x16xf32> to vector<16x1xf32>
    %47 = vector.broadcast %46 : vector<16x1xf32> to vector<16x128xf32>
    %48 = arith.mulf %45, %47 : vector<16x128xf32>
    %49 = arith.addf %40, %48 : vector<16x128xf32>
    %50 = vector.extract_strided_slice %0 {offsets = [0, 5], sizes = [16, 1], strides = [1, 1]} : vector<16x16xi32> to vector<16x1xi32>
    %51 = vector.broadcast %50 : vector<16x1xi32> to vector<16x128xi32>
    %52 = arith.cmpi eq, %3, %51 : vector<16x128xi32>
    %53 = arith.extui %52 : vector<16x128xi1> to vector<16x128xi32>
    %54 = arith.sitofp %53 : vector<16x128xi32> to vector<16x128xf32>
    %55 = vector.extract_strided_slice %2 {offsets = [0, 5], sizes = [16, 1], strides = [1, 1]} : vector<16x16xf32> to vector<16x1xf32>
    %56 = vector.broadcast %55 : vector<16x1xf32> to vector<16x128xf32>
    %57 = arith.mulf %54, %56 : vector<16x128xf32>
    %58 = arith.addf %49, %57 : vector<16x128xf32>
    %59 = vector.extract_strided_slice %0 {offsets = [0, 6], sizes = [16, 1], strides = [1, 1]} : vector<16x16xi32> to vector<16x1xi32>
    %60 = vector.broadcast %59 : vector<16x1xi32> to vector<16x128xi32>
    %61 = arith.cmpi eq, %3, %60 : vector<16x128xi32>
    %62 = arith.extui %61 : vector<16x128xi1> to vector<16x128xi32>
    %63 = arith.sitofp %62 : vector<16x128xi32> to vector<16x128xf32>
    %64 = vector.extract_strided_slice %2 {offsets = [0, 6], sizes = [16, 1], strides = [1, 1]} : vector<16x16xf32> to vector<16x1xf32>
    %65 = vector.broadcast %64 : vector<16x1xf32> to vector<16x128xf32>
    %66 = arith.mulf %63, %65 : vector<16x128xf32>
    %67 = arith.addf %58, %66 : vector<16x128xf32>
    %68 = vector.extract_strided_slice %0 {offsets = [0, 7], sizes = [16, 1], strides = [1, 1]} : vector<16x16xi32> to vector<16x1xi32>
    %69 = vector.broadcast %68 : vector<16x1xi32> to vector<16x128xi32>
    %70 = arith.cmpi eq, %3, %69 : vector<16x128xi32>
    %71 = arith.extui %70 : vector<16x128xi1> to vector<16x128xi32>
    %72 = arith.sitofp %71 : vector<16x128xi32> to vector<16x128xf32>
    %73 = vector.extract_strided_slice %2 {offsets = [0, 7], sizes = [16, 1], strides = [1, 1]} : vector<16x16xf32> to vector<16x1xf32>
    %74 = vector.broadcast %73 : vector<16x1xf32> to vector<16x128xf32>
    %75 = arith.mulf %72, %74 : vector<16x128xf32>
    %76 = arith.addf %67, %75 : vector<16x128xf32>
    %77 = vector.extract_strided_slice %0 {offsets = [0, 8], sizes = [16, 1], strides = [1, 1]} : vector<16x16xi32> to vector<16x1xi32>
    %78 = vector.broadcast %77 : vector<16x1xi32> to vector<16x128xi32>
    %79 = arith.cmpi eq, %3, %78 : vector<16x128xi32>
    %80 = arith.extui %79 : vector<16x128xi1> to vector<16x128xi32>
    %81 = arith.sitofp %80 : vector<16x128xi32> to vector<16x128xf32>
    %82 = vector.extract_strided_slice %2 {offsets = [0, 8], sizes = [16, 1], strides = [1, 1]} : vector<16x16xf32> to vector<16x1xf32>
    %83 = vector.broadcast %82 : vector<16x1xf32> to vector<16x128xf32>
    %84 = arith.mulf %81, %83 : vector<16x128xf32>
    %85 = arith.addf %76, %84 : vector<16x128xf32>
    %86 = vector.extract_strided_slice %0 {offsets = [0, 9], sizes = [16, 1], strides = [1, 1]} : vector<16x16xi32> to vector<16x1xi32>
    %87 = vector.broadcast %86 : vector<16x1xi32> to vector<16x128xi32>
    %88 = arith.cmpi eq, %3, %87 : vector<16x128xi32>
    %89 = arith.extui %88 : vector<16x128xi1> to vector<16x128xi32>
    %90 = arith.sitofp %89 : vector<16x128xi32> to vector<16x128xf32>
    %91 = vector.extract_strided_slice %2 {offsets = [0, 9], sizes = [16, 1], strides = [1, 1]} : vector<16x16xf32> to vector<16x1xf32>
    %92 = vector.broadcast %91 : vector<16x1xf32> to vector<16x128xf32>
    %93 = arith.mulf %90, %92 : vector<16x128xf32>
    %94 = arith.addf %85, %93 : vector<16x128xf32>
    %95 = vector.extract_strided_slice %0 {offsets = [0, 10], sizes = [16, 1], strides = [1, 1]} : vector<16x16xi32> to vector<16x1xi32>
    %96 = vector.broadcast %95 : vector<16x1xi32> to vector<16x128xi32>
    %97 = arith.cmpi eq, %3, %96 : vector<16x128xi32>
    %98 = arith.extui %97 : vector<16x128xi1> to vector<16x128xi32>
    %99 = arith.sitofp %98 : vector<16x128xi32> to vector<16x128xf32>
    %100 = vector.extract_strided_slice %2 {offsets = [0, 10], sizes = [16, 1], strides = [1, 1]} : vector<16x16xf32> to vector<16x1xf32>
    %101 = vector.broadcast %100 : vector<16x1xf32> to vector<16x128xf32>
    %102 = arith.mulf %99, %101 : vector<16x128xf32>
    %103 = arith.addf %94, %102 : vector<16x128xf32>
    %104 = vector.extract_strided_slice %0 {offsets = [0, 11], sizes = [16, 1], strides = [1, 1]} : vector<16x16xi32> to vector<16x1xi32>
    %105 = vector.broadcast %104 : vector<16x1xi32> to vector<16x128xi32>
    %106 = arith.cmpi eq, %3, %105 : vector<16x128xi32>
    %107 = arith.extui %106 : vector<16x128xi1> to vector<16x128xi32>
    %108 = arith.sitofp %107 : vector<16x128xi32> to vector<16x128xf32>
    %109 = vector.extract_strided_slice %2 {offsets = [0, 11], sizes = [16, 1], strides = [1, 1]} : vector<16x16xf32> to vector<16x1xf32>
    %110 = vector.broadcast %109 : vector<16x1xf32> to vector<16x128xf32>
    %111 = arith.mulf %108, %110 : vector<16x128xf32>
    %112 = arith.addf %103, %111 : vector<16x128xf32>
    %113 = vector.extract_strided_slice %0 {offsets = [0, 12], sizes = [16, 1], strides = [1, 1]} : vector<16x16xi32> to vector<16x1xi32>
    %114 = vector.broadcast %113 : vector<16x1xi32> to vector<16x128xi32>
    %115 = arith.cmpi eq, %3, %114 : vector<16x128xi32>
    %116 = arith.extui %115 : vector<16x128xi1> to vector<16x128xi32>
    %117 = arith.sitofp %116 : vector<16x128xi32> to vector<16x128xf32>
    %118 = vector.extract_strided_slice %2 {offsets = [0, 12], sizes = [16, 1], strides = [1, 1]} : vector<16x16xf32> to vector<16x1xf32>
    %119 = vector.broadcast %118 : vector<16x1xf32> to vector<16x128xf32>
    %120 = arith.mulf %117, %119 : vector<16x128xf32>
    %121 = arith.addf %112, %120 : vector<16x128xf32>
    %122 = vector.extract_strided_slice %0 {offsets = [0, 13], sizes = [16, 1], strides = [1, 1]} : vector<16x16xi32> to vector<16x1xi32>
    %123 = vector.broadcast %122 : vector<16x1xi32> to vector<16x128xi32>
    %124 = arith.cmpi eq, %3, %123 : vector<16x128xi32>
    %125 = arith.extui %124 : vector<16x128xi1> to vector<16x128xi32>
    %126 = arith.sitofp %125 : vector<16x128xi32> to vector<16x128xf32>
    %127 = vector.extract_strided_slice %2 {offsets = [0, 13], sizes = [16, 1], strides = [1, 1]} : vector<16x16xf32> to vector<16x1xf32>
    %128 = vector.broadcast %127 : vector<16x1xf32> to vector<16x128xf32>
    %129 = arith.mulf %126, %128 : vector<16x128xf32>
    %130 = arith.addf %121, %129 : vector<16x128xf32>
    %131 = vector.extract_strided_slice %0 {offsets = [0, 14], sizes = [16, 1], strides = [1, 1]} : vector<16x16xi32> to vector<16x1xi32>
    %132 = vector.broadcast %131 : vector<16x1xi32> to vector<16x128xi32>
    %133 = arith.cmpi eq, %3, %132 : vector<16x128xi32>
    %134 = arith.extui %133 : vector<16x128xi1> to vector<16x128xi32>
    %135 = arith.sitofp %134 : vector<16x128xi32> to vector<16x128xf32>
    %136 = vector.extract_strided_slice %2 {offsets = [0, 14], sizes = [16, 1], strides = [1, 1]} : vector<16x16xf32> to vector<16x1xf32>
    %137 = vector.broadcast %136 : vector<16x1xf32> to vector<16x128xf32>
    %138 = arith.mulf %135, %137 : vector<16x128xf32>
    %139 = arith.addf %130, %138 : vector<16x128xf32>
    %140 = vector.extract_strided_slice %0 {offsets = [0, 15], sizes = [16, 1], strides = [1, 1]} : vector<16x16xi32> to vector<16x1xi32>
    %141 = vector.broadcast %140 : vector<16x1xi32> to vector<16x128xi32>
    %142 = arith.cmpi eq, %3, %141 : vector<16x128xi32>
    %143 = arith.extui %142 : vector<16x128xi1> to vector<16x128xi32>
    %144 = arith.sitofp %143 : vector<16x128xi32> to vector<16x128xf32>
    %145 = vector.extract_strided_slice %2 {offsets = [0, 15], sizes = [16, 1], strides = [1, 1]} : vector<16x16xf32> to vector<16x1xf32>
    %146 = vector.broadcast %145 : vector<16x1xf32> to vector<16x128xf32>
    %147 = arith.mulf %144, %146 : vector<16x128xf32>
    %148 = arith.addf %139, %147 : vector<16x128xf32>
    %cst_3 = arith.constant dense<0.000000e+00> : vector<16xf32>
    %149 = vector.multi_reduction <add>, %2, %cst_3 [1] : vector<16x16xf32> to vector<16xf32>
    %150 = vector.shape_cast %149 : vector<16xf32> to vector<16x1xf32>
    %cst_4 = arith.constant 1.000000e+00 : f32
    %151 = vector.broadcast %cst_4 : f32 to vector<16x1xf32>
    %152 = arith.maximumf %150, %151 : vector<16x1xf32>
    %153 = arith.truncf %148 : vector<16x128xf32> to vector<16x128xbf16>
    %c0_5 = arith.constant 0 : index
    %c0_6 = arith.constant 0 : index
    %154 = vector.load %arg3[%c0_5, %c0_6] : memref<128x768xbf16, #tpu.memory_space<vmem>>, vector<128x768xbf16>
    %cst_7 = arith.constant dense<0.000000e+00> : vector<16x768xf32>
    %155 = tpu.matmul %153, %154, %cst_7 {dimension_numbers = #tpu.dot_dimension_numbers<[1], [0], [0], [1], [0, 0, 1, 1], [], []>} : vector<16x128xbf16>, vector<128x768xbf16>, vector<16x768xf32> -> vector<16x768xf32>
    %156 = vector.broadcast %152 : vector<16x1xf32> to vector<16x768xf32>
    %157 = arith.divf %155, %156 : vector<16x768xf32>
    %158 = arith.truncf %157 : vector<16x768xf32> to vector<16x768xbf16>
    %c0_8 = arith.constant 0 : index
    %c0_9 = arith.constant 0 : index
    %159 = vector.load %arg4[%c0_8, %c0_9] : memref<768x768xbf16, #tpu.memory_space<vmem>>, vector<768x768xbf16>
    %cst_10 = arith.constant dense<0.000000e+00> : vector<16x768xf32>
    %160 = tpu.matmul %158, %159, %cst_10 {dimension_numbers = #tpu.dot_dimension_numbers<[1], [0], [0], [1], [0, 0, 1, 1], [], []>} : vector<16x768xbf16>, vector<768x768xbf16>, vector<16x768xf32> -> vector<16x768xf32>
    %c0_11 = arith.constant 0 : index
    %c0_12 = arith.constant 0 : index
    %161 = vector.load %arg5[%c0_11, %c0_12] : memref<1x768xf32, #tpu.memory_space<vmem>>, vector<1x768xf32>
    %162 = vector.broadcast %161 : vector<1x768xf32> to vector<16x768xf32>
    %163 = arith.addf %160, %162 : vector<16x768xf32>
    %164 = math.tanh %163 : vector<16x768xf32>
    %165 = arith.truncf %164 : vector<16x768xf32> to vector<16x768xbf16>
    %c0_13 = arith.constant 0 : index
    %c0_14 = arith.constant 0 : index
    %166 = vector.load %arg6[%c0_13, %c0_14] : memref<768x512xbf16, #tpu.memory_space<vmem>>, vector<768x512xbf16>
    %cst_15 = arith.constant dense<0.000000e+00> : vector<16x512xf32>
    %167 = tpu.matmul %165, %166, %cst_15 {dimension_numbers = #tpu.dot_dimension_numbers<[1], [0], [0], [1], [0, 0, 1, 1], [], []>} : vector<16x768xbf16>, vector<768x512xbf16>, vector<16x512xf32> -> vector<16x512xf32>
    %c0_16 = arith.constant 0 : index
    %c0_17 = arith.constant 0 : index
    %168 = vector.load %arg7[%c0_16, %c0_17] : memref<1x512xf32, #tpu.memory_space<vmem>>, vector<1x512xf32>
    %169 = vector.broadcast %168 : vector<1x512xf32> to vector<16x512xf32>
    %170 = arith.addf %167, %169 : vector<16x512xf32>
    %cst_18 = arith.constant 0.000000e+00 : f32
    %171 = vector.broadcast %cst_18 : f32 to vector<16x512xf32>
    %172 = arith.maximumf %170, %171 : vector<16x512xf32>
    %173 = arith.truncf %172 : vector<16x512xf32> to vector<16x512xbf16>
    %c0_19 = arith.constant 0 : index
    %c0_20 = arith.constant 0 : index
    %174 = vector.load %arg8[%c0_19, %c0_20] : memref<512x128xbf16, #tpu.memory_space<vmem>>, vector<512x128xbf16>
    %cst_21 = arith.constant dense<0.000000e+00> : vector<16x128xf32>
    %175 = tpu.matmul %173, %174, %cst_21 {dimension_numbers = #tpu.dot_dimension_numbers<[1], [0], [0], [1], [0, 0, 1, 1], [], []>} : vector<16x512xbf16>, vector<512x128xbf16>, vector<16x128xf32> -> vector<16x128xf32>
    %c0_22 = arith.constant 0 : index
    %c0_23 = arith.constant 0 : index
    %176 = vector.load %arg9[%c0_22, %c0_23] : memref<1x128xf32, #tpu.memory_space<vmem>>, vector<1x128xf32>
    %177 = vector.broadcast %176 : vector<1x128xf32> to vector<16x128xf32>
    %178 = arith.addf %175, %177 : vector<16x128xf32>
    %cst_24 = arith.constant dense<0xFF800000> : vector<16xf32>
    %179 = vector.multi_reduction <maximumf>, %178, %cst_24 [1] : vector<16x128xf32> to vector<16xf32>
    %180 = vector.shape_cast %179 : vector<16xf32> to vector<16x1xf32>
    %181 = vector.broadcast %180 : vector<16x1xf32> to vector<16x128xf32>
    %182 = arith.subf %178, %181 : vector<16x128xf32>
    %183 = math.exp %182 : vector<16x128xf32>
    %cst_25 = arith.constant dense<0.000000e+00> : vector<16xf32>
    %184 = vector.multi_reduction <add>, %183, %cst_25 [1] : vector<16x128xf32> to vector<16xf32>
    %185 = vector.shape_cast %184 : vector<16xf32> to vector<16x1xf32>
    %186 = math.log %185 : vector<16x1xf32>
    %187 = vector.broadcast %186 : vector<16x1xf32> to vector<16x128xf32>
    %188 = arith.subf %182, %187 : vector<16x128xf32>
    %c0_26 = arith.constant 0 : index
    %c0_27 = arith.constant 0 : index
    %189 = vector.load %arg10[%c0_26, %c0_27] : memref<16x128xf32, #tpu.memory_space<vmem>>, vector<16x128xf32>
    tpu.vector_store %arg10[%c0_26, %c0_27], %188 {strides = array<i32>} : memref<16x128xf32, #tpu.memory_space<vmem>>, vector<16x128xf32>,
    return
  }
  func.func @transform_0(%arg0: i32) -> (i32, i32) {
    %c0_i32 = arith.constant 0 : i32
    %c0_i32_0 = arith.constant 0 : i32
    return %arg0, %c0_i32 : i32, i32
  }
  func.func @transform_1(%arg0: i32) -> (i32, i32) {
    %c0_i32 = arith.constant 0 : i32
    %c0_i32_0 = arith.constant 0 : i32
    return %arg0, %c0_i32 : i32, i32
  }
  func.func @transform_2(%arg0: i32) -> (i32, i32) {
    %c0_i32 = arith.constant 0 : i32
    %c0_i32_0 = arith.constant 0 : i32
    %c0_i32_1 = arith.constant 0 : i32
    return %c0_i32, %c0_i32_0 : i32, i32
  }
  func.func @transform_3(%arg0: i32) -> (i32, i32) {
    %c0_i32 = arith.constant 0 : i32
    %c0_i32_0 = arith.constant 0 : i32
    %c0_i32_1 = arith.constant 0 : i32
    return %c0_i32, %c0_i32_0 : i32, i32
  }
  func.func @transform_4(%arg0: i32) -> (i32, i32) {
    %c0_i32 = arith.constant 0 : i32
    %c0_i32_0 = arith.constant 0 : i32
    %c0_i32_1 = arith.constant 0 : i32
    return %c0_i32, %c0_i32_0 : i32, i32
  }
  func.func @transform_5(%arg0: i32) -> (i32, i32) {
    %c0_i32 = arith.constant 0 : i32
    %c0_i32_0 = arith.constant 0 : i32
    %c0_i32_1 = arith.constant 0 : i32
    return %c0_i32, %c0_i32_0 : i32, i32
  }
  func.func @transform_6(%arg0: i32) -> (i32, i32) {
    %c0_i32 = arith.constant 0 : i32
    %c0_i32_0 = arith.constant 0 : i32
    %c0_i32_1 = arith.constant 0 : i32
    return %c0_i32, %c0_i32_0 : i32, i32
  }
  func.func @transform_7(%arg0: i32) -> (i32, i32) {
    %c0_i32 = arith.constant 0 : i32
    %c0_i32_0 = arith.constant 0 : i32
    %c0_i32_1 = arith.constant 0 : i32
    return %c0_i32, %c0_i32_0 : i32, i32
  }
  func.func @transform_8(%arg0: i32) -> (i32, i32) {
    %c0_i32 = arith.constant 0 : i32
    %c0_i32_0 = arith.constant 0 : i32
    %c0_i32_1 = arith.constant 0 : i32
    return %c0_i32, %c0_i32_0 : i32, i32
  }
  func.func @transform_9(%arg0: i32) -> (i32, i32) {
    %c0_i32 = arith.constant 0 : i32
    %c0_i32_0 = arith.constant 0 : i32
    return %arg0, %c0_i32 : i32, i32
  }
}

</mosaic_0001>

<bundles_post_ra>
// kernel: tpu_custom_call.1
= control target key start
LH: loop header
LB: loop body
LE: loop exit
PB: predicated region body
PF: predicated region fallthrough
CT: control target
= control target key end

     0   :  { %14 = vsyncpa [#allocation3], 0  ;;  %s7372_s0 = inlined_call_operand.hbm [shape: s32[16,16], index: 0, kind: input, shape index: {}]   ;;  %s7373_s1 = inlined_call_operand.hbm [shape: s32[16,16], index: 1, kind: input, shape index: {}]   ;;  %s7374_s2 = inlined_call_operand.hbm [shape: bf16[128,768], index: 2, kind: input, shape index: {}]   ;;  %s7375_s3 = inlined_call_operand.hbm [shape: bf16[768,768], index: 3, kind: input, shape index: {}]   ;;  %s7376_s4 = inlined_call_operand.hbm [shape: f32[1,768], index: 4, kind: input, shape index: {}]   ;;  %s7377_s5 = inlined_call_operand.hbm [shape: bf16[768,512], index: 5, kind: input, shape index: {}]   ;;  %s7378_s6 = inlined_call_operand.hbm [shape: f32[1,512], index: 6, kind: input, shape index: {}]   ;;  %s7379_s7 = inlined_call_operand.hbm [shape: bf16[512,128], index: 7, kind: input, shape index: {}]   ;;  %s7380_s8 = inlined_call_operand.hbm [shape: f32[1,128], index: 8, kind: input, shape index: {}]   ;;  %s7381_s9 = inlined_call_operand.hbm [shape: f32[16,128], index: 9, kind: output, shape index: {}]  }
   0x1   :  { %15 = vsyncpa [#allocation6], 0 }
   0x2   :  { %16 = vsyncpa [#allocation9], 0 }
   0x3   :  { %17 = vsyncpa [#allocation12], 0 }
   0x4   :  { %18 = vsyncpa [#allocation15], 0 }
   0x5   :  { %19 = vsyncpa [#allocation4], 0  ;;  %s6847_s30 = smov [#allocation5]   ;;  %s6615_s13 = scalar_lea.hbm %s7373_s1, 256 }
   0x6   :  { %s37_s10 = sshll.u32 %s6847_s30, 4  ;;  %p6616_p0 = scmp.ne.s32.totalorder %s7373_s1, %s6615_s13  ;;  %s38_s10 = int_to_ptr.vmem [resolvable:$true] %s37_s10 }
   0x7   :  { %p6619_p1 = scmp.lt.u32.totalorder %s6615_s13, %s7373_s1 }
   0x9   :  { %p6621_p2 = pnand %p6619_p1, %p6616_p0 }
   0xb   :  { %6624 = shalt.err (!%p6621_p2)
}
   0xc   :  { %s6625_s18 = scalar_lea.vmem %s38_s10, 256  ;;  %p6630_p4 = scmp.lt.s32.totalorder %s38_s10, %s38_s10 }
   0xd   :  { %p6626_p3 = scmp.ne.s32.totalorder %s38_s10, %s6625_s18  ;;  %p6631_p5 = scmp.lt.s32.totalorder %s6625_s18, %s6625_s18 }
   0xf   :  { %p6632_p6 = por %p6631_p5, %p6630_p4 }
  0x11   :  { %p6633_p7 = pnand %p6632_p6, %p6626_p3 }
  0x13   :  { %6636 = shalt.err (!%p6633_p7)
}
  0x14   :  { %s6848_s19 = smov 128   ;;  %s6849_s20 = smov 8  }
  0x15   :  { %43 = dma.hbm_to_vmem [thread:$0]  %s7373_s1, 256, %s38_s10, [#allocation6], %s6848_s19, %s6848_s19, %s6849_s20  }
  0x16   :  { %s6850_s23 = smov [#allocation8]   ;;  %s6851_s25 = smov [#allocation11]  }
  0x17   :  { %s61_s24 = sshll.u32 %s6850_s23, 4  ;;  %s83_s26 = sshll.u32 %s6851_s25, 4  ;;  %s62_s24 = int_to_ptr.vmem [resolvable:$true] %s61_s24  ;;  %s84_s26 = int_to_ptr.vmem [resolvable:$true] %s83_s26 }
  0x18   :  { %s6637_s29 = scalar_lea.hbm %s7375_s3, 36864 }
  0x19   :  { %p6638_p8 = scmp.ne.s32.totalorder %s7375_s3, %s6637_s29  ;;  %p6641_p9 = scmp.lt.u32.totalorder %s6637_s29, %s7375_s3 }
  0x1b   :  { %p6643_p10 = pnand %p6641_p9, %p6638_p8 }
  0x1d   :  { %6646 = shalt.err (!%p6643_p10)
}
  0x1e   :  { %s6647_s1 = scalar_lea.vmem %s62_s24, 36864  ;;  %p6652_p12 = scmp.lt.s32.totalorder %s62_s24, %s62_s24 }
  0x1f   :  { %p6648_p11 = scmp.ne.s32.totalorder %s62_s24, %s6647_s1  ;;  %p6653_p13 = scmp.lt.s32.totalorder %s6647_s1, %s6647_s1 }
  0x21   :  { %p6654_p0 = por %p6653_p13, %p6652_p12 }
  0x23   :  { %p6655_p1 = pnand %p6654_p0, %p6648_p11 }
  0x25   :  { %6658 = shalt.err (!%p6655_p1)
}
  0x26   :  { %s6852_s10 = smov 384   ;;  %s6853_s14 = smov 24  }
  0x27   :  { %67 = dma.hbm_to_vmem [thread:$0]  %s7375_s3, 36864, %s62_s24, [#allocation9], %s6852_s10, %s6852_s10, %s6853_s14  }
  0x28   :  { %s6659_s21 = scalar_lea.hbm %s7377_s5, 24576 }
  0x29   :  { %p6660_p2 = scmp.ne.s32.totalorder %s7377_s5, %s6659_s21  ;;  %p6663_p3 = scmp.lt.u32.totalorder %s6659_s21, %s7377_s5 }
  0x2b   :  { %p6665_p4 = pnand %p6663_p3, %p6660_p2 }
  0x2d   :  { %6668 = shalt.err (!%p6665_p4)
}
  0x2e   :  { %s6669_s28 = scalar_lea.vmem %s84_s26, 24576  ;;  %p6674_p6 = scmp.lt.s32.totalorder %s84_s26, %s84_s26 }
  0x2f   :  { %p6670_p5 = scmp.ne.s32.totalorder %s84_s26, %s6669_s28  ;;  %p6675_p7 = scmp.lt.s32.totalorder %s6669_s28, %s6669_s28 }
  0x31   :  { %p6676_p8 = por %p6675_p7, %p6674_p6 }
  0x33   :  { %p6677_p9 = pnand %p6676_p8, %p6670_p5 }
  0x35   :  { %6680 = shalt.err (!%p6677_p9)
}
  0x36   :  { %s6854_s3 = smov 256   ;;  %s6855_s24 = smov 16  }
  0x37   :  { %89 = dma.hbm_to_vmem [thread:$0]  %s7377_s5, 24576, %s84_s26, [#allocation12], %s6854_s3, %s6854_s3, %s6855_s24  }
  0x38   :  { %s6856_s11 = smov [#allocation14]   ;;  %s6681_s15 = scalar_lea.hbm %s7379_s7, 4096 }
  0x39   :  { %s105_s12 = sshll.u32 %s6856_s11, 4  ;;  %p6682_p10 = scmp.ne.s32.totalorder %s7379_s7, %s6681_s15  ;;  %s106_s12 = int_to_ptr.vmem [resolvable:$true] %s105_s12 }
  0x3a   :  { %p6685_p11 = scmp.lt.u32.totalorder %s6681_s15, %s7379_s7 }
  0x3c   :  { %p6687_p12 = pnand %p6685_p11, %p6682_p10 }
  0x3e   :  { %6690 = shalt.err (!%p6687_p12)
}
  0x3f   :  { %s6691_s22 = scalar_lea.vmem %s106_s12, 4096  ;;  %p6696_p0 = scmp.lt.s32.totalorder %s106_s12, %s106_s12 }
  0x40   :  { %p6692_p13 = scmp.ne.s32.totalorder %s106_s12, %s6691_s22  ;;  %p6697_p1 = scmp.lt.s32.totalorder %s6691_s22, %s6691_s22 }
  0x42   :  { %p6698_p2 = por %p6697_p1, %p6696_p0 }
  0x44   :  { %p6699_p3 = pnand %p6698_p2, %p6692_p13 }
  0x46   :  { %6702 = shalt.err (!%p6699_p3)
}
  0x47   :  { %s6857_s5 = smov 64   ;;  %s6858_s26 = smov 4  }
  0x48   :  { %111 = dma.hbm_to_vmem [thread:$0]  %s7379_s7, 4096, %s106_s12, [#allocation15], %s6857_s5, %s6857_s5, %s6858_s26  }
  0x49   :  { %s6859_s27 = smov [#allocation2]   ;;  %s6860_s3 = smov [#allocation7]  }
  0x4a   :  { %s25_s28 = sshll.u32 %s6859_s27, 4  ;;  %s49_s24 = sshll.u32 %s6860_s3, 4  ;;  %s26_s28 = int_to_ptr.vmem [resolvable:$true] %s25_s28  ;;  %s6986_s24 = int_to_ptr.vmem [resolvable:$true] %s49_s24 }
  0x4b   :  { %s6703_s11 = scalar_lea.hbm %s7372_s0, 256 }
  0x4c   :  { %p6704_p4 = scmp.ne.s32.totalorder %s7372_s0, %s6703_s11  ;;  %p6707_p5 = scmp.lt.u32.totalorder %s6703_s11, %s7372_s0 }
  0x4e   :  { %p6709_p6 = pnand %p6707_p5, %p6704_p4 }
  0x50   :  { %6712 = shalt.err (!%p6709_p6)
}
  0x51   :  { %s6713_s7 = scalar_lea.vmem %s26_s28, 256  ;;  %p6718_p8 = scmp.lt.s32.totalorder %s26_s28, %s26_s28 }
  0x52   :  { %p6714_p7 = scmp.ne.s32.totalorder %s26_s28, %s6713_s7  ;;  %p6719_p9 = scmp.lt.s32.totalorder %s6713_s7, %s6713_s7 }
  0x54   :  { %p6720_p10 = por %p6719_p9, %p6718_p8 }
  0x56   :  { %p6721_p11 = pnand %p6720_p10, %p6714_p7 }
  0x58   :  { %6724 = shalt.err (!%p6721_p11)
}
  0x59   :  { %31 = dma.hbm_to_vmem [thread:$0]  %s7372_s0, 256, %s26_s28, [#allocation3], %s6848_s19, %s6848_s19, %s6849_s20  }
  0x5a   :  { %s6725_s22 = scalar_lea.hbm %s7374_s2, 6144 }
  0x5b   :  { %p6726_p12 = scmp.ne.s32.totalorder %s7374_s2, %s6725_s22  ;;  %p6729_p13 = scmp.lt.u32.totalorder %s6725_s22, %s7374_s2 }
  0x5d   :  { %p6731_p0 = pnand %p6729_p13, %p6726_p12 }
  0x5f   :  { %6734 = shalt.err (!%p6731_p0)
}
  0x60   :  { %s6735_s27 = scalar_lea.vmem %s6986_s24, 6144  ;;  %p6740_p2 = scmp.lt.s32.totalorder %s6986_s24, %s6986_s24 }
  0x61   :  { %p6736_p1 = scmp.ne.s32.totalorder %s6986_s24, %s6735_s27  ;;  %p6741_p3 = scmp.lt.s32.totalorder %s6735_s27, %s6735_s27 }
  0x63   :  { %p6742_p4 = por %p6741_p3, %p6740_p2 }
  0x65   :  { %p6743_p5 = pnand %p6742_p4, %p6736_p1 }
  0x67   :  { %6746 = shalt.err (!%p6743_p5)
}
  0x68   :  { %55 = dma.hbm_to_vmem [thread:$0]  %s7374_s2, 6144, %s6986_s24, [#allocation6], %s6852_s10, %s6852_s10, %s6853_s14  }
  0x69   :  { %s6861_s3 = smov [#allocation10]   ;;  %s6862_s30 = smov [#allocation13]  }
  0x6a   :  { %s74_s29 = sshll.u32 %s6861_s3, 4  ;;  %s96_s11 = sshll.u32 %s6862_s30, 4  ;;  %s75_s29 = int_to_ptr.vmem [resolvable:$true] %s74_s29  ;;  %s97_s11 = int_to_ptr.vmem [resolvable:$true] %s96_s11 }
  0x6b   :  { %s6747_s15 = scalar_lea.hbm %s7376_s4, 96 }
  0x6c   :  { %p6748_p6 = scmp.ne.s32.totalorder %s7376_s4, %s6747_s15  ;;  %p6751_p7 = scmp.lt.u32.totalorder %s6747_s15, %s7376_s4 }
  0x6e   :  { %p6753_p8 = pnand %p6751_p7, %p6748_p6 }
  0x70   :  { %6756 = shalt.err (!%p6753_p8)
}
  0x71   :  { %s6757_s2 = scalar_lea.vmem %s75_s29, 96  ;;  %p6762_p10 = scmp.lt.s32.totalorder %s75_s29, %s75_s29 }
  0x72   :  { %p6758_p9 = scmp.ne.s32.totalorder %s75_s29, %s6757_s2  ;;  %p6763_p11 = scmp.lt.s32.totalorder %s6757_s2, %s6757_s2 }
  0x74   :  { %p6764_p12 = por %p6763_p11, %p6762_p10 }
  0x76   :  { %p6765_p13 = pnand %p6764_p12, %p6758_p9 }
  0x78   :  { %6768 = shalt.err (!%p6765_p13)
}
  0x79   :  { %77 = dma.hbm_to_vmem [thread:$0]  %s7376_s4, 96, %s75_s29, [#allocation9]  }
  0x7a   :  { %s6769_s21 = scalar_lea.hbm %s7378_s6, 64 }
  0x7b   :  { %p6770_p0 = scmp.ne.s32.totalorder %s7378_s6, %s6769_s21  ;;  %p6773_p1 = scmp.lt.u32.totalorder %s6769_s21, %s7378_s6 }
  0x7d   :  { %p6775_p2 = pnand %p6773_p1, %p6770_p0 }
  0x7f   :  { %6778 = shalt.err (!%p6775_p2)
}
  0x80   :  { %s6779_s25 = scalar_lea.vmem %s97_s11, 64  ;;  %p6784_p4 = scmp.lt.s32.totalorder %s97_s11, %s97_s11 }
  0x81   :  { %p6780_p3 = scmp.ne.s32.totalorder %s97_s11, %s6779_s25  ;;  %p6785_p5 = scmp.lt.s32.totalorder %s6779_s25, %s6779_s25 }
  0x83   :  { %p6786_p6 = por %p6785_p5, %p6784_p4 }
  0x85   :  { %p6787_p7 = pnand %p6786_p6, %p6780_p3 }
  0x87   :  { %6790 = shalt.err (!%p6787_p7)
}
  0x88   :  { %99 = dma.hbm_to_vmem [thread:$0]  %s7378_s6, 64, %s97_s11, [#allocation12]  }
  0x89   :  { %s6863_s0 = smov [#allocation16]   ;;  %s6791_s30 = scalar_lea.hbm %s7380_s8, 16 }
  0x8a   :  { %s118_s28 = sshll.u32 %s6863_s0, 4  ;;  %p6792_p8 = scmp.ne.s32.totalorder %s7380_s8, %s6791_s30  ;;  %s119_s28 = int_to_ptr.vmem [resolvable:$true] %s118_s28 }
  0x8b   :  { %p6795_p9 = scmp.lt.u32.totalorder %s6791_s30, %s7380_s8 }
  0x8d   :  { %p6797_p10 = pnand %p6795_p9, %p6792_p8 }
  0x8f   :  { %6800 = shalt.err (!%p6797_p10)
}
  0x90   :  { %s6801_s7 = scalar_lea.vmem %s119_s28, 16  ;;  %s6805_s6 = scalar_lea.vmem %s119_s28, 32 }
  0x91   :  { %p6802_p11 = scmp.ne.s32.totalorder %s119_s28, %s6801_s7  ;;  %p6806_p12 = scmp.lt.s32.totalorder %s119_s28, %s119_s28 }
  0x92   :  { %p6807_p13 = scmp.lt.s32.totalorder %s6805_s6, %s6801_s7 }
  0x94   :  { %p6808_p0 = por %p6807_p13, %p6806_p12 }
  0x96   :  { %p6809_p1 = pnand %p6808_p0, %p6802_p11 }
  0x98   :  { %6812 = shalt.err (!%p6809_p1)
}
  0x99   :  { %121 = dma.hbm_to_vmem [thread:$0]  %s7380_s8, 16, %s119_s28, [#allocation15]  }
  0x9a   :  { %6835 = dma.done.wait [#allocation3], 256  }
  0x9b   :  { %6836 = vsyncadd [#allocation3], 4294967040 }
  0x9c   :  { %6837 = dma.done.wait [#allocation6], 6400  }
  0x9d   :  { %6838 = vsyncadd [#allocation6], 4294960896 }
  0x9e   :  { %6839 = dma.done.wait [#allocation9], 36960  }
  0x9f   :  { %6840 = vsyncadd [#allocation9], 4294930336 }
  0xa0   :  { %6841 = dma.done.wait [#allocation12], 24640  }
  0xa1   :  { %6842 = vsyncadd [#allocation12], 4294942656 }
  0xa2   :  { %6843 = dma.done.wait [#allocation15], 4112  }
  0xa3   :  { %6844 = vsyncadd [#allocation15], 4294963184  ;;  %v6864_v0 = vmov 1   ;;  %v6865_v1 = vmov 0   ;;  %v7061_v2 = vld [vmem:[#allocation2] sm:$0xff]  ;;  %v7063_v3 = vld [vmem:[#allocation2 + $0x8] sm:$0xff]  ;;  %v156_v22 = vlaneseq }
  0xa4   :  { %5721 = vset.pattern.permute.xlu1 %v6864_v0  ;;  %5720 = vset.pattern.permute.xlu0 %v6865_v1  ;;  %v152_v4 = vld [vmem:[#allocation5] sm:$0xff]  ;;  %v153_v5 = vld [vmem:[#allocation5 + $0x8] sm:$0xff]  ;;  %v6866_v8 = vmov 2   ;;  %v6867_v9 = vmov 3   ;;  %v6868_v10 = vmov 4   ;;  %v6869_v11 = vmov 5  }
  0xa5   :  { %874 = vmatprep.mubr.bf16.mxu0 %v6865_v1  ;;  %185 = vperm.xlu1 %5721, %v7061_v2   ;;  %v7069_v6 = vcvt.s32.f32 %v152_v4  ;;  %v7071_v7 = vcvt.s32.f32 %v153_v5  ;;  %v6870_v12 = vmov 6   ;;  %v6871_v13 = vmov 7   ;;  %v5753_v34 = vld [vmem:[#allocation7 + $0x4] ss:$24 sps:$4 sm:$0xff]   ;;  %v5755_v37 = vld [vmem:[#allocation7] ss:$24 sps:$4 sm:$0xff]  }
  0xa6   :  { %159 = vperm.xlu0 %5720, %v7061_v2   ;;  %v6872_v14 = vmov 8   ;;  %v6873_v15 = vmov 9   ;;  %v6874_v16 = vmov 10   ;;  %v6875_v17 = vmov 11   ;;  %842 = vmatprep.subr.bf16.mxu0 %v5753_v34  ;;  %v6613_v43 = vld [vmem:[#allocation2 + $0x8] sm:$0xff]  ;;  %v6614_v55 = vld [vmem:[#allocation2] sm:$0xff] }
  0xa7   :  { %v6876_v18 = vmov 12   ;;  %v6877_v19 = vmov 13   ;;  %v6878_v20 = vmov 14   ;;  %v6879_v21 = vmov 15   ;;  %843 = vmatpush1.bf16.msra.mxu0 %v5755_v37  ;;  %v5756_v45 = vld [vmem:[#allocation7 + $0x34] ss:$24 sps:$4 sm:$0xff]  }
  0xa8   :  { %v7127_v25 = vand.u32 127, %v156_v22  ;;  %v6880_v30 = vmov 0.0   ;;  %v5758_v47 = vld [vmem:[#allocation7 + $0x30] ss:$24 sps:$4 sm:$0xff]   ;;  %844 = vmatprep.subr.bf16.mxu0 %v5756_v45  ;;  %v5759_v50 = vld [vmem:[#allocation7 + $0x64] ss:$24 sps:$4 sm:$0xff]  }
  0xa9   :  { %188 = vperm.xlu1 %5721, %v7063_v3   ;;  %v5761_v51 = vld [vmem:[#allocation7 + $0x60] ss:$24 sps:$4 sm:$0xff]   ;;  %v5762_v56 = vld [vmem:[#allocation7 + $0x94] ss:$24 sps:$4 sm:$0xff]   ;;  %v5764_v57 = vld [vmem:[#allocation7 + $0x90] ss:$24 sps:$4 sm:$0xff]  }
  0xaa   :  { %162 = vperm.xlu0 %5720, %v7063_v3   ;;  %v5765_v63 = vld [vmem:[#allocation7 + $0xc4] ss:$24 sps:$4 sm:$0xff]   ;;  %v5768_v5 = vld [vmem:[#allocation7 + $0xf4] ss:$24 sps:$4 sm:$0xff]   ;;  %s6881_s8 = smov [#allocation17]  }
  0xab   :  { %845 = vmatpush1.bf16.msra.mxu0 %v5758_v47  ;;  %s4972_s17 = sshll.u32 %s6881_s8, 4  ;;  %s4973_s17 = int_to_ptr.vmem [resolvable:$true] %s4972_s17 }
  0xac   :  { %846 = vmatprep.subr.bf16.mxu0 %v5759_v50  ;;  %s6813_s2 = scalar_lea.vmem %s4973_s17, 256  ;;  %p6818_p3 = scmp.lt.s32.totalorder %s4973_s17, %s4973_s17 }
  0xad   :  { %5722 = vset.pattern.permute.xlu1 %v6865_v1  ;;  %p6814_p2 = scmp.ne.s32.totalorder %s4973_s17, %s6813_s2  ;;  %p6819_p4 = scmp.lt.s32.totalorder %s6813_s2, %s6813_s2 }
  0xae   :  { %172 = vperm.xlu0 %5720, %v7069_v6   ;;  %177 = vperm.xlu1 %5722, %v7071_v7  }
  0xaf   :  { %847 = vmatpush1.bf16.msra.mxu0 %v5761_v51  ;;  %p6820_p5 = por %p6819_p4, %p6818_p3 }
  0xb0   :  { %848 = vmatprep.subr.bf16.mxu0 %v5762_v56 }
  0xb1   :  { %p6821_p6 = pnand %p6820_p5, %p6814_p2 }
  0xb2   :  { %5723 = vset.pattern.permute.xlu0 %v6864_v0  ;;  %5724 = vset.pattern.permute.xlu1 %v6864_v0  ;;  %v5767_v0 = vld [vmem:[#allocation7 + $0xc0] ss:$24 sps:$4 sm:$0xff]  }
  0xb3   :  { %197 = vperm.xlu0 %5723, %v7069_v6   ;;  %201 = vperm.xlu1 %5724, %v7071_v7  }
  0xb4   :  { %849 = vmatpush1.bf16.msra.mxu0 %v5764_v57 }
  0xb5   :  { %850 = vmatprep.subr.bf16.mxu0 %v5765_v63 }
  0xb7   :  { %5726 = vset.pattern.permute.xlu0 %v6866_v8  ;;  %5725 = vset.pattern.permute.xlu1 %v6866_v8  ;;  %v5770_v8 = vld [vmem:[#allocation7 + $0xf0] ss:$24 sps:$4 sm:$0xff]  }
  0xb8   :  { %212 = vperm.xlu0 %5726, %v7063_v3   ;;  %209 = vperm.xlu1 %5725, %v7061_v2  }
  0xb9   :  { %851 = vmatpush1.bf16.msra.mxu0 %v5767_v0 }
  0xba   :  { %852 = vmatprep.subr.bf16.mxu0 %v5768_v5 }
  0xbc   :  { %5727 = vset.pattern.permute.xlu0 %v6867_v9  ;;  %221 = vperm.xlu1 %5725, %v7069_v6  }
  0xbd   :  { %233 = vperm.xlu0 %5727, %v7061_v2   ;;  %853 = vmatpush1.bf16.msra.mxu0 %v5770_v8 }
  0xc0   :  { %225 = vperm.xlu1 %5725, %v7071_v7  }
  0xc1   :  { %249 = vperm.xlu0 %5727, %v7071_v7  }
  0xc4   :  { %5728 = vset.pattern.permute.xlu1 %v6867_v9 }
  0xc5   :  { %5730 = vset.pattern.permute.xlu0 %v6868_v10  ;;  %236 = vperm.xlu1 %5728, %v7063_v3  }
  0xc6   :  { %260 = vperm.xlu0 %5730, %v7063_v3  }
  0xc9   :  { %245 = vperm.xlu1 %5728, %v7069_v6  }
  0xca   :  { %5731 = vset.pattern.permute.xlu0 %v6869_v11 }
  0xcb   :  { %281 = vperm.xlu0 %5731, %v7061_v2  }
  0xcd   :  { %5729 = vset.pattern.permute.xlu1 %v6868_v10 }
  0xce   :  { %257 = vperm.xlu1 %5729, %v7061_v2  }
  0xcf   :  { %297 = vperm.xlu0 %5731, %v7071_v7  }
  0xd2   :  { %269 = vperm.xlu1 %5729, %v7069_v6  }
  0xd3   :  { %5734 = vset.pattern.permute.xlu0 %v6870_v12 }
  0xd4   :  { %308 = vperm.xlu0 %5734, %v7063_v3  }
  0xd6   :  { %273 = vperm.xlu1 %5729, %v7071_v7  }
  0xd8   :  { %5735 = vset.pattern.permute.xlu0 %v6871_v13 }
  0xd9   :  { %329 = vperm.xlu0 %5735, %v7061_v2  }
  0xda   :  { %5732 = vset.pattern.permute.xlu1 %v6869_v11 }
  0xdb   :  { %284 = vperm.xlu1 %5732, %v7063_v3  }
  0xdd   :  { %345 = vperm.xlu0 %5735, %v7071_v7  }
  0xdf   :  { %293 = vperm.xlu1 %5732, %v7069_v6  }
  0xe1   :  { %5738 = vset.pattern.permute.xlu0 %v6872_v14 }
  0xe2   :  { %356 = vperm.xlu0 %5738, %v7063_v3  }
  0xe3   :  { %5733 = vset.pattern.permute.xlu1 %v6870_v12 }
  0xe4   :  { %305 = vperm.xlu1 %5733, %v7061_v2  }
  0xe6   :  { %5739 = vset.pattern.permute.xlu0 %v6873_v15 }
  0xe7   :  { %377 = vperm.xlu0 %5739, %v7061_v2  }
  0xe8   :  { %317 = vperm.xlu1 %5733, %v7069_v6  }
  0xeb   :  { %393 = vperm.xlu0 %5739, %v7071_v7  }
  0xec   :  { %321 = vperm.xlu1 %5733, %v7071_v7  }
  0xef   :  { %5742 = vset.pattern.permute.xlu0 %v6874_v16 }
  0xf0   :  { %404 = vperm.xlu0 %5742, %v7063_v3   ;;  %5736 = vset.pattern.permute.xlu1 %v6871_v13  ;;  %v5771_v13 = vld [vmem:[#allocation7 + $0x124] ss:$24 sps:$4 sm:$0xff]  }
  0xf1   :  { %332 = vperm.xlu1 %5736, %v7063_v3   ;;  %854 = vmatprep.subr.bf16.mxu0 %v5771_v13  ;;  %v5825_v13 = vld [vmem:[#allocation8 + $0x4] ss:$24 sps:$4 sm:$0xff]  }
  0xf2   :  { %2751 = vmatprep.subr.bf16.mxu1 %v5825_v13  ;;  %v5897_v13 = vld [vmem:[#allocation8 + $0x244] ss:$24 sps:$4 sm:$0xff]  }
  0xf4   :  { %5743 = vset.pattern.permute.xlu0 %v6875_v17 }
  0xf5   :  { %425 = vperm.xlu0 %5743, %v7061_v2   ;;  %341 = vperm.xlu1 %5736, %v7069_v6  }
  0xf9   :  { %441 = vperm.xlu0 %5743, %v7071_v7   ;;  %5737 = vset.pattern.permute.xlu1 %v6872_v14 }
  0xfa   :  { %353 = vperm.xlu1 %5737, %v7061_v2  }
  0xfd   :  { %5746 = vset.pattern.permute.xlu0 %v6876_v18 }
  0xfe   :  { %452 = vperm.xlu0 %5746, %v7063_v3   ;;  %365 = vperm.xlu1 %5737, %v7069_v6  }
 0x102   :  { %5747 = vset.pattern.permute.xlu0 %v6877_v19  ;;  %369 = vperm.xlu1 %5737, %v7071_v7  }
 0x103   :  { %473 = vperm.xlu0 %5747, %v7061_v2  }
 0x106   :  { %5740 = vset.pattern.permute.xlu1 %v6873_v15 }
 0x107   :  { %489 = vperm.xlu0 %5747, %v7071_v7   ;;  %380 = vperm.xlu1 %5740, %v7063_v3  }
 0x10b   :  { %5750 = vset.pattern.permute.xlu0 %v6878_v20  ;;  %389 = vperm.xlu1 %5740, %v7069_v6  }
 0x10c   :  { %500 = vperm.xlu0 %5750, %v7063_v3  }
 0x10f   :  { %5741 = vset.pattern.permute.xlu1 %v6874_v16  ;;  %v5773_v16 = vld [vmem:[#allocation7 + $0x120] ss:$24 sps:$4 sm:$0xff]  }
 0x110   :  { %5751 = vset.pattern.permute.xlu0 %v6879_v21  ;;  %401 = vperm.xlu1 %5741, %v7061_v2  }
 0x111   :  { %521 = vperm.xlu0 %5751, %v7061_v2   ;;  %855 = vmatpush1.bf16.msra.mxu0 %v5773_v16  ;;  %v5831_v16 = vld [vmem:[#allocation8 + $0x34] ss:$24 sps:$4 sm:$0xff]  }
 0x114   :  { %413 = vperm.xlu1 %5741, %v7069_v6  }
 0x115   :  { %537 = vperm.xlu0 %5751, %v7071_v7  }
 0x118   :  { %417 = vperm.xlu1 %5741, %v7071_v7  }
 0x11c   :  { %5744 = vset.pattern.permute.xlu1 %v6875_v17 }
 0x11d   :  { %428 = vperm.xlu1 %5744, %v7063_v3  }
 0x121   :  { %437 = vperm.xlu1 %5744, %v7069_v6  }
 0x124   :  { %v186_v23 = vpop.permute.xlu1 %185 }
 0x125   :  { %v160_v24 = vpop.permute.xlu0 %159  ;;  %5745 = vset.pattern.permute.xlu1 %v6876_v18  ;;  %vm190_vm2 = vcmp.eq.s32.totalorder %v7127_v25, %v186_v23  ;;  %v5774_v18 = vld [vmem:[#allocation7 + $0x154] ss:$24 sps:$4 sm:$0xff]   ;;  %v5776_v23 = vld [vmem:[#allocation7 + $0x150] ss:$24 sps:$4 sm:$0xff]  }
 0x126   :  { %449 = vperm.xlu1 %5745, %v7061_v2   ;;  %vm164_vm0 = vcmp.eq.s32.totalorder %v7127_v25, %v160_v24  ;;  %v4990_v35 = vsel %vm190_vm2, 1.0, %v6880_v30  ;;  %856 = vmatprep.subr.bf16.mxu0 %v5774_v18 }
 0x127   :  { %v4988_v31 = vsel %vm164_vm0, 1.0, %v6880_v30  ;;  %857 = vmatpush1.bf16.msra.mxu0 %v5776_v23  ;;  %vm544_vm0 = vcmask 130048   ;;  %v5843_v23 = vld [vmem:[#allocation8 + $0x94] ss:$24 sps:$4 sm:$0xff]  }
 0x128   :  { %v189_v26 = vpop.permute.xlu1 %188  ;;  %v545_v8 = vsel %vm544_vm0, %v7069_v6, 0.0 }
 0x129   :  { %v163_v27 = vpop.permute.xlu0 %162  ;;  %vm191_vm3 = vcmp.eq.s32.totalorder %v7127_v25, %v189_v26 }
 0x12a   :  { %461 = vperm.xlu1 %5745, %v7069_v6   ;;  %vm165_vm1 = vcmp.eq.s32.totalorder %v7127_v25, %v163_v27  ;;  %v4991_v39 = vsel %vm191_vm3, 1.0, %v6880_v30 }
 0x12b   :  { %v4989_v32 = vsel %vm165_vm1, 1.0, %v6880_v30 }
 0x12d   :  { %v173_v28 = vpop.permute.xlu0 %172  ;;  %v178_v29 = vpop.permute.xlu1 %177 }
 0x12e   :  { %465 = vperm.xlu1 %5745, %v7071_v7   ;;  %v180_v33 = vmul.f32 %v4988_v31, %v173_v28  ;;  %v181_v41 = vmul.f32 %v4989_v32, %v178_v29 }
 0x132   :  { %v198_v36 = vpop.permute.xlu0 %197  ;;  %5748 = vset.pattern.permute.xlu1 %v6877_v19  ;;  %v202_v40 = vpop.permute.xlu1 %201 }
 0x133   :  { %v204_v38 = vmul.f32 %v4990_v35, %v198_v36  ;;  %v205_v42 = vmul.f32 %v4991_v39, %v202_v40  ;;  %476 = vperm.xlu1 %5748, %v6613_v43  }
 0x135   :  { %v206_v44 = vadd.f32 %v204_v38, %v180_v33  ;;  %v207_v46 = vadd.f32 %v205_v42, %v181_v41 }
 0x137   :  { %485 = vperm.xlu1 %5748, %v7069_v6   ;;  %v210_v48 = vpop.permute.xlu1 %209  ;;  %v213_v49 = vpop.permute.xlu0 %212 }
 0x138   :  { %vm214_vm4 = vcmp.eq.s32.totalorder %v7127_v25, %v210_v48  ;;  %vm215_vm5 = vcmp.eq.s32.totalorder %v7127_v25, %v213_v49 }
 0x139   :  { %v4992_v52 = vsel %vm214_vm4, 1.0, %v6880_v30  ;;  %v4993_v58 = vsel %vm215_vm5, 1.0, %v6880_v30 }
 0x13b   :  { %5749 = vset.pattern.permute.xlu1 %v6878_v20  ;;  %v222_v53 = vpop.permute.xlu1 %221 }
 0x13c   :  { %v228_v54 = vmul.f32 %v4992_v52, %v222_v53  ;;  %497 = vperm.xlu1 %5749, %v6614_v55   ;;  %v234_v60 = vpop.permute.xlu0 %233 }
 0x13d   :  { %vm238_vm6 = vcmp.eq.s32.totalorder %v7127_v25, %v234_v60 }
 0x13e   :  { %v230_v59 = vadd.f32 %v228_v54, %v206_v44  ;;  %v4994_v10 = vsel %vm238_vm6, 1.0, %v6880_v30 }
 0x13f   :  { %v226_v61 = vpop.permute.xlu1 %225 }
 0x140   :  { %v229_v62 = vmul.f32 %v4993_v58, %v226_v61  ;;  %509 = vperm.xlu1 %5749, %v7069_v6   ;;  %v250_v4 = vpop.permute.xlu0 %249 }
 0x142   :  { %v231_v2 = vadd.f32 %v229_v62, %v207_v46 }
 0x144   :  { %513 = vperm.xlu1 %5749, %v7071_v7   ;;  %v237_v3 = vpop.permute.xlu1 %236 }
 0x145   :  { %vm239_vm7 = vcmp.eq.s32.totalorder %v7127_v25, %v237_v3  ;;  %v261_v20 = vpop.permute.xlu0 %260 }
 0x146   :  { %v4995_v9 = vsel %vm239_vm7, 1.0, %v6880_v30  ;;  %vm263_vm9 = vcmp.eq.s32.totalorder %v7127_v25, %v261_v20 }
 0x147   :  { %v253_v11 = vmul.f32 %v4995_v9, %v250_v4  ;;  %v4997_v28 = vsel %vm263_vm9, 1.0, %v6880_v30  ;;  %v548_v9 = vsel %vm544_vm0, %v7071_v7, 0.0 }
 0x148   :  { %5752 = vset.pattern.permute.xlu1 %v6879_v21  ;;  %v246_v12 = vpop.permute.xlu1 %245  ;;  %v5779_v21 = vld [vmem:[#allocation7 + $0xc] ss:$24 sps:$4 sm:$0xff]   ;;  %549 = vadd.xlane.f32.xlu0 %v548_v9 }
 0x149   :  { %v255_v14 = vadd.f32 %v253_v11, %v231_v2  ;;  %v252_v15 = vmul.f32 %v4994_v10, %v246_v12  ;;  %524 = vperm.xlu1 %5752, %v6613_v43   ;;  %885 = vmatprep.subr.bf16.mxu0 %v5779_v21 }
 0x14a   :  { %v282_v31 = vpop.permute.xlu0 %281 }
 0x14b   :  { %v254_v17 = vadd.f32 %v252_v15, %v230_v59  ;;  %vm286_vm10 = vcmp.eq.s32.totalorder %v7127_v25, %v282_v31  ;;  %v5830_v15 = vld [vmem:[#allocation8] ss:$24 sps:$4 sm:$0xff]   ;;  %v5855_v31 = vld [vmem:[#allocation8 + $0xf4] ss:$24 sps:$4 sm:$0xff]  }
 0x14c   :  { %v4998_v38 = vsel %vm286_vm10, 1.0, %v6880_v30  ;;  %2752 = vmatpush1.bf16.msra.mxu1 %v5830_v15 }
 0x14d   :  { %533 = vperm.xlu1 %5752, %v7069_v6   ;;  %v258_v19 = vpop.permute.xlu1 %257  ;;  %2753 = vmatprep.subr.bf16.mxu1 %v5831_v16  ;;  %v5837_v6 = vld [vmem:[#allocation8 + $0x64] ss:$24 sps:$4 sm:$0xff]  }
 0x14e   :  { %vm262_vm8 = vcmp.eq.s32.totalorder %v7127_v25, %v258_v19  ;;  %v298_v36 = vpop.permute.xlu0 %297  ;;  %v5842_v19 = vld [vmem:[#allocation8 + $0x60] ss:$24 sps:$4 sm:$0xff]  }
 0x14f   :  { %v4996_v24 = vsel %vm262_vm8, 1.0, %v6880_v30 }
 0x151   :  { %v270_v26 = vpop.permute.xlu1 %269 }
 0x152   :  { %v276_v27 = vmul.f32 %v4996_v24, %v270_v26  ;;  %v5848_v24 = vld [vmem:[#allocation8 + $0x90] ss:$24 sps:$4 sm:$0xff]  }
 0x153   :  { %v309_v44 = vpop.permute.xlu0 %308 }
 0x154   :  { %v278_v29 = vadd.f32 %v276_v27, %v254_v17  ;;  %vm311_vm13 = vcmp.eq.s32.totalorder %v7127_v25, %v309_v44  ;;  %v5836_v17 = vld [vmem:[#allocation8 + $0x30] ss:$24 sps:$4 sm:$0xff]   ;;  %v5849_v27 = vld [vmem:[#allocation8 + $0xc4] ss:$24 sps:$4 sm:$0xff]   ;;  %v5878_v44 = vld [vmem:[#allocation8 + $0x180] ss:$24 sps:$4 sm:$0xff]  }
 0x155   :  { %v274_v32 = vpop.permute.xlu1 %273  ;;  %v5001_v49 = vsel %vm311_vm13, 1.0, %v6880_v30  ;;  %2754 = vmatpush1.bf16.msra.mxu1 %v5836_v17  ;;  %v5902_v17 = vld [vmem:[#allocation8 + $0x240] ss:$24 sps:$4 sm:$0xff]  }
 0x156   :  { %v277_v33 = vmul.f32 %v4997_v28, %v274_v32  ;;  %2755 = vmatprep.subr.bf16.mxu1 %v5837_v6  ;;  %v5854_v28 = vld [vmem:[#allocation8 + $0xc0] ss:$24 sps:$4 sm:$0xff]  }
 0x158   :  { %v279_v34 = vadd.f32 %v277_v33, %v255_v14  ;;  %v330_v51 = vpop.permute.xlu0 %329  ;;  %v5860_v33 = vld [vmem:[#allocation8 + $0xf0] ss:$24 sps:$4 sm:$0xff]  }
 0x159   :  { %vm334_vm14 = vcmp.eq.s32.totalorder %v7127_v25, %v330_v51  ;;  %2756 = vmatpush1.bf16.msra.mxu1 %v5842_v19 }
 0x15a   :  { %v285_v35 = vpop.permute.xlu1 %284  ;;  %v5002_v58 = vsel %vm334_vm14, 1.0, %v6880_v30  ;;  %2757 = vmatprep.subr.bf16.mxu1 %v5843_v23 }
 0x15b   :  { %vm287_vm11 = vcmp.eq.s32.totalorder %v7127_v25, %v285_v35 }
 0x15c   :  { %v4999_v37 = vsel %vm287_vm11, 1.0, %v6880_v30  ;;  %v346_v56 = vpop.permute.xlu0 %345 }
 0x15d   :  { %v301_v39 = vmul.f32 %v4999_v37, %v298_v36  ;;  %2758 = vmatpush1.bf16.msra.mxu1 %v5848_v24  ;;  %v5866_v37 = vld [vmem:[#allocation8 + $0x120] ss:$24 sps:$4 sm:$0xff]  }
 0x15e   :  { %v294_v40 = vpop.permute.xlu1 %293  ;;  %2759 = vmatprep.subr.bf16.mxu1 %v5849_v27 }
 0x15f   :  { %v303_v41 = vadd.f32 %v301_v39, %v279_v34  ;;  %v300_v42 = vmul.f32 %v4998_v38, %v294_v40  ;;  %v5861_v34 = vld [vmem:[#allocation8 + $0x124] ss:$24 sps:$4 sm:$0xff]   ;;  %v5867_v38 = vld [vmem:[#allocation8 + $0x154] ss:$24 sps:$4 sm:$0xff]  }
 0x161   :  { %v302_v43 = vadd.f32 %v300_v42, %v278_v29  ;;  %v7184_v10 = vpop.permute.xlu0 %356  ;;  %2760 = vmatpush1.bf16.msra.mxu1 %v5854_v28  ;;  %v5873_v42 = vld [vmem:[#allocation8 + $0x184] ss:$24 sps:$4 sm:$0xff]  }
 0x162   :  { %2761 = vmatprep.subr.bf16.mxu1 %v5855_v31  ;;  %vm359_vm1 = vcmp.eq.s32.totalorder %v7127_v25, %v7184_v10 }
 0x163   :  { %v306_v45 = vpop.permute.xlu1 %305 }
 0x164   :  { %vm310_vm12 = vcmp.eq.s32.totalorder %v7127_v25, %v306_v45 }
 0x165   :  { %v5000_v46 = vsel %vm310_vm12, 1.0, %v6880_v30  ;;  %2762 = vmatpush1.bf16.msra.mxu1 %v5860_v33 }
 0x166   :  { %v7190_v14 = vpop.permute.xlu0 %377  ;;  %2763 = vmatprep.subr.bf16.mxu1 %v5861_v34 }
 0x167   :  { %v318_v47 = vpop.permute.xlu1 %317  ;;  %vm382_vm3 = vcmp.eq.s32.totalorder %v7127_v25, %v7190_v14 }
 0x168   :  { %v324_v48 = vmul.f32 %v5000_v46, %v318_v47  ;;  %v5879_v46 = vld [vmem:[#allocation8 + $0x1b4] ss:$24 sps:$4 sm:$0xff]  }
 0x169   :  { %2764 = vmatpush1.bf16.msra.mxu1 %v5866_v37 }
 0x16a   :  { %v326_v50 = vadd.f32 %v324_v48, %v302_v43  ;;  %v7194_v7 = vpop.permute.xlu0 %393  ;;  %2765 = vmatprep.subr.bf16.mxu1 %v5867_v38  ;;  %v5884_v48 = vld [vmem:[#allocation8 + $0x1b0] ss:$24 sps:$4 sm:$0xff]  }
 0x16b   :  { %v322_v52 = vpop.permute.xlu1 %321 }
 0x16c   :  { %v325_v53 = vmul.f32 %v5001_v49, %v322_v52  ;;  %v5885_v49 = vld [vmem:[#allocation8 + $0x1e4] ss:$24 sps:$4 sm:$0xff]   ;;  %v5890_v52 = vld [vmem:[#allocation8 + $0x1e0] ss:$24 sps:$4 sm:$0xff]  }
 0x16e   :  { %v327_v54 = vadd.f32 %v325_v53, %v303_v41  ;;  %v5872_v41 = vld [vmem:[#allocation8 + $0x150] ss:$24 sps:$4 sm:$0xff]  }
 0x16f   :  { %v405_v21 = vpop.permute.xlu0 %404  ;;  %2766 = vmatpush1.bf16.msra.mxu1 %v5872_v41 }
 0x170   :  { %v333_v55 = vpop.permute.xlu1 %332  ;;  %2767 = vmatprep.subr.bf16.mxu1 %v5873_v42  ;;  %vm407_vm5 = vcmp.eq.s32.totalorder %v7127_v25, %v405_v21 }
 0x171   :  { %vm335_vm15 = vcmp.eq.s32.totalorder %v7127_v25, %v333_v55  ;;  %546 = vadd.xlane.f32.xlu1 %v545_v8 }
 0x172   :  { %v5003_v57 = vsel %vm335_vm15, 1.0, %v6880_v30 }
 0x173   :  { %v349_v59 = vmul.f32 %v5003_v57, %v346_v56  ;;  %2768 = vmatpush1.bf16.msra.mxu1 %v5878_v44 }
 0x174   :  { %v342_v60 = vpop.permute.xlu1 %341  ;;  %v426_v29 = vpop.permute.xlu0 %425  ;;  %2769 = vmatprep.subr.bf16.mxu1 %v5879_v46 }
 0x175   :  { %v7168_v61 = vadd.f32 %v349_v59, %v327_v54  ;;  %v348_v62 = vmul.f32 %v5002_v58, %v342_v60  ;;  %v5006_v54 = vsel %vm382_vm3, 1.0, %v6880_v30  ;;  %vm430_vm7 = vcmp.eq.s32.totalorder %v7127_v25, %v426_v29  ;;  %v5891_v58 = vld [vmem:[#allocation8 + $0x214] ss:$24 sps:$4 sm:$0xff]  }
 0x176   :  { %v5010_v9 = vsel %vm430_vm7, 1.0, %v6880_v30 }
 0x177   :  { %v7170_v63 = vadd.f32 %v348_v62, %v326_v50  ;;  %v5005_v50 = vsel %vm359_vm1, 1.0, %v6880_v30  ;;  %2770 = vmatpush1.bf16.msra.mxu1 %v5884_v48  ;;  %v5009_v62 = vsel %vm407_vm5, 1.0, %v6880_v30 }
 0x178   :  { %v7204_v36 = vpop.permute.xlu0 %441  ;;  %2771 = vmatprep.subr.bf16.mxu1 %v5885_v49 }
 0x179   :  { %v7172_v0 = vpop.permute.xlu1 %353 }
 0x17a   :  { %vm358_vm2 = vcmp.eq.s32.totalorder %v7127_v25, %v7172_v0 }
 0x17b   :  { %v5004_v53 = vsel %vm358_vm2, 1.0, %v6880_v30  ;;  %2772 = vmatpush1.bf16.msra.mxu1 %v5890_v52 }
 0x17c   :  { %2773 = vmatprep.subr.bf16.mxu1 %v5891_v58  ;;  %v5783_v58 = vld [vmem:[#allocation7 + $0x68] ss:$24 sps:$4 sm:$0xff]  }
 0x17d   :  { %v7174_v2 = vpop.permute.xlu1 %365  ;;  %v453_v40 = vpop.permute.xlu0 %452 }
 0x17e   :  { %v372_v56 = vmul.f32 %v5004_v53, %v7174_v2  ;;  %v5896_v2 = vld [vmem:[#allocation8 + $0x210] ss:$24 sps:$4 sm:$0xff]   ;;  %vm455_vm9 = vcmp.eq.s32.totalorder %v7127_v25, %v453_v40 }
 0x17f   :  { %2774 = vmatpush1.bf16.msra.mxu1 %v5896_v2  ;;  %v5792_v2 = vld [vmem:[#allocation7 + $0xf8] ss:$24 sps:$4 sm:$0xff]  }
 0x180   :  { %2775 = vmatprep.subr.bf16.mxu1 %v5897_v13  ;;  %v5804_v13 = vld [vmem:[#allocation7 + $0x40] ss:$24 sps:$4 sm:$0xff]  }
 0x181   :  { %v7176_v3 = vpop.permute.xlu1 %369 }
 0x182   :  { %v474_v45 = vpop.permute.xlu0 %473  ;;  %v373_v59 = vmul.f32 %v5005_v50, %v7176_v3  ;;  %v374_v3 = vadd.f32 %v372_v56, %v7170_v63  ;;  %v5782_v56 = vld [vmem:[#allocation7 + $0x3c] ss:$24 sps:$4 sm:$0xff]  }
 0x183   :  { %vm478_vm11 = vcmp.eq.s32.totalorder %v7127_v25, %v474_v45  ;;  %2776 = vmatpush1.bf16.msra.mxu1 %v5902_v17  ;;  %v5813_v17 = vld [vmem:[#allocation7 + $0xd0] ss:$24 sps:$4 sm:$0xff]  }
 0x184   :  { %v375_v14 = vadd.f32 %v373_v59, %v7168_v61  ;;  %v5014_v21 = vsel %vm478_vm11, 1.0, %v6880_v30  ;;  %v5786_v59 = vld [vmem:[#allocation7 + $0x98] ss:$24 sps:$4 sm:$0xff]  }
 0x186   :  { %v7178_v4 = vpop.permute.xlu1 %380  ;;  %v490_v51 = vpop.permute.xlu0 %489 }
 0x187   :  { %vm383_vm4 = vcmp.eq.s32.totalorder %v7127_v25, %v7178_v4 }
 0x188   :  { %v5007_v57 = vsel %vm383_vm4, 1.0, %v6880_v30 }
 0x189   :  { %v397_v4 = vmul.f32 %v5007_v57, %v7194_v7  ;;  %v5785_v57 = vld [vmem:[#allocation7 + $0x6c] ss:$24 sps:$4 sm:$0xff]  }
 0x18a   :  { %v7180_v5 = vpop.permute.xlu1 %389 }
 0x18b   :  { %v396_v60 = vmul.f32 %v5006_v54, %v7180_v5  ;;  %v501_v0 = vpop.permute.xlu0 %500  ;;  %v399_v6 = vadd.f32 %v397_v4, %v375_v14  ;;  %v5777_v54 = vld [vmem:[#allocation7 + $0x8] ss:$24 sps:$4 sm:$0xff]   ;;  %v5797_v4 = vld [vmem:[#allocation7 + $0x12c] ss:$24 sps:$4 sm:$0xff]  }
 0x18c   :  { %vm503_vm13 = vcmp.eq.s32.totalorder %v7127_v25, %v501_v0  ;;  %v5794_v0 = vld [vmem:[#allocation7 + $0xfc] ss:$24 sps:$4 sm:$0xff]  }
 0x18d   :  { %v398_v16 = vadd.f32 %v396_v60, %v374_v3  ;;  %v5017_v31 = vsel %vm503_vm13, 1.0, %v6880_v30  ;;  %v5791_v60 = vld [vmem:[#allocation7 + $0xcc] ss:$24 sps:$4 sm:$0xff]  }
 0x18e   :  { %v5803_v3 = vld [vmem:[#allocation7 + $0x14] ss:$24 sps:$4 sm:$0xff]  }
 0x18f   :  { %v7186_v11 = vpop.permute.xlu1 %401  ;;  %v5809_v14 = vld [vmem:[#allocation7 + $0x74] ss:$24 sps:$4 sm:$0xff]  }
 0x190   :  { %vm406_vm6 = vcmp.eq.s32.totalorder %v7127_v25, %v7186_v11  ;;  %v522_v24 = vpop.permute.xlu0 %521 }
 0x191   :  { %v5008_v8 = vsel %vm406_vm6, 1.0, %v6880_v30  ;;  %vm526_vm15 = vcmp.eq.s32.totalorder %v7127_v25, %v522_v24  ;;  %v5833_v24 = vld [vmem:[#allocation8 + $0x38] ss:$24 sps:$4 sm:$0xff]  }
 0x192   :  { %v5018_v48 = vsel %vm526_vm15, 1.0, %v6880_v30 }
 0x193   :  { %v7188_v12 = vpop.permute.xlu1 %413 }
 0x194   :  { %v420_v11 = vmul.f32 %v5008_v8, %v7188_v12  ;;  %v5013_v12 = vsel %vm455_vm9, 1.0, %v6880_v30  ;;  %v5795_v8 = vld [vmem:[#allocation7 + $0x128] ss:$24 sps:$4 sm:$0xff]  }
 0x197   :  { %v7192_v18 = vpop.permute.xlu1 %417 }
 0x198   :  { %v421_v15 = vmul.f32 %v5009_v62, %v7192_v18  ;;  %v422_v18 = vadd.f32 %v420_v11, %v398_v16  ;;  %v5789_v62 = vld [vmem:[#allocation7 + $0xc8] ss:$24 sps:$4 sm:$0xff]   ;;  %v5812_v16 = vld [vmem:[#allocation7 + $0xa4] ss:$24 sps:$4 sm:$0xff]  }
 0x199   :  { %v5801_v11 = vld [vmem:[#allocation7 + $0x10] ss:$24 sps:$4 sm:$0xff]  }
 0x19a   :  { %v423_v27 = vadd.f32 %v421_v15, %v399_v6  ;;  %v5807_v15 = vld [vmem:[#allocation7 + $0x70] ss:$24 sps:$4 sm:$0xff]   ;;  %v5818_v6 = vld [vmem:[#allocation7 + $0x104] ss:$24 sps:$4 sm:$0xff]  }
 0x19c   :  { %v7196_v20 = vpop.permute.xlu1 %428 }
 0x19d   :  { %vm431_vm8 = vcmp.eq.s32.totalorder %v7127_v25, %v7196_v20 }
 0x19e   :  { %v5011_v5 = vsel %vm431_vm8, 1.0, %v6880_v30 }
 0x19f   :  { %v445_v7 = vmul.f32 %v5011_v5, %v7204_v36  ;;  %v5806_v5 = vld [vmem:[#allocation7 + $0x44] ss:$24 sps:$4 sm:$0xff]  }
 0x1a0   :  { %v7198_v26 = vpop.permute.xlu1 %437 }
 0x1a1   :  { %v444_v63 = vmul.f32 %v5010_v9, %v7198_v26  ;;  %v5903_v26 = vld [vmem:[#allocation8 + $0x274] ss:$24 sps:$4 sm:$0xff]   ;;  %v447_v33 = vadd.f32 %v445_v7, %v423_v27  ;;  %v5816_v7 = vld [vmem:[#allocation7 + $0x100] ss:$24 sps:$4 sm:$0xff]  }
 0x1a2   :  { %2777 = vmatprep.subr.bf16.mxu1 %v5903_v26  ;;  %v5800_v9 = vld [vmem:[#allocation7 + $0x15c] ss:$24 sps:$4 sm:$0xff]   ;;  %v5841_v26 = vld [vmem:[#allocation8 + $0x6c] ss:$24 sps:$4 sm:$0xff]   ;;  %v5839_v27 = vld [vmem:[#allocation8 + $0x68] ss:$24 sps:$4 sm:$0xff]  }
 0x1a3   :  { %v446_v29 = vadd.f32 %v444_v63, %v422_v18  ;;  %v5810_v63 = vld [vmem:[#allocation7 + $0xa0] ss:$24 sps:$4 sm:$0xff]  }
 0x1a4   :  { %v5822_v18 = vld [vmem:[#allocation7 + $0x160] ss:$24 sps:$4 sm:$0xff]  }
 0x1a5   :  { %v7200_v32 = vpop.permute.xlu1 %449 }
 0x1a6   :  { %vm454_vm10 = vcmp.eq.s32.totalorder %v7127_v25, %v7200_v32  ;;  %v5908_v32 = vld [vmem:[#allocation8 + $0x270] ss:$24 sps:$4 sm:$0xff]  }
 0x1a7   :  { %v5012_v19 = vsel %vm454_vm10, 1.0, %v6880_v30  ;;  %2778 = vmatpush1.bf16.msra.mxu1 %v5908_v32  ;;  %v5851_v32 = vld [vmem:[#allocation8 + $0xc8] ss:$24 sps:$4 sm:$0xff]  }
 0x1a9   :  { %v7202_v35 = vpop.permute.xlu1 %461 }
 0x1aa   :  { %v468_v20 = vmul.f32 %v5012_v19, %v7202_v35  ;;  %v5821_v19 = vld [vmem:[#allocation7 + $0x134] ss:$24 sps:$4 sm:$0xff]  }
 0x1ac   :  { %v470_v36 = vadd.f32 %v468_v20, %v446_v29  ;;  %v5829_v20 = vld [vmem:[#allocation8 + $0xc] ss:$24 sps:$4 sm:$0xff]   ;;  %v5845_v29 = vld [vmem:[#allocation8 + $0x98] ss:$24 sps:$4 sm:$0xff]  }
 0x1ad   :  { %v7206_v39 = vpop.permute.xlu1 %465 }
 0x1ae   :  { %v469_v28 = vmul.f32 %v5013_v12, %v7206_v39  ;;  %v5815_v12 = vld [vmem:[#allocation7 + $0xd4] ss:$24 sps:$4 sm:$0xff]  }
 0x1b0   :  { %v471_v40 = vadd.f32 %v469_v28, %v447_v33  ;;  %v5847_v28 = vld [vmem:[#allocation8 + $0x9c] ss:$24 sps:$4 sm:$0xff]  }
 0x1b1   :  { %v5859_v33 = vld [vmem:[#allocation8 + $0xfc] ss:$24 sps:$4 sm:$0xff]  }
 0x1b2   :  { %v7208_v43 = vpop.permute.xlu1 %476 }
 0x1b3   :  { %vm479_vm12 = vcmp.eq.s32.totalorder %v7127_v25, %v7208_v43  ;;  %v538_v43 = vpop.permute.xlu0 %537 }
 0x1b4   :  { %v5015_v23 = vsel %vm479_vm12, 1.0, %v6880_v30 }
 0x1b5   :  { %v493_v34 = vmul.f32 %v5015_v23, %v490_v51  ;;  %v5827_v23 = vld [vmem:[#allocation8 + $0x8] ss:$24 sps:$4 sm:$0xff]  }
 0x1b6   :  { %v7210_v47 = vpop.permute.xlu1 %485 }
 0x1b7   :  { %v492_v35 = vmul.f32 %v5014_v21, %v7210_v47  ;;  %v495_v44 = vadd.f32 %v493_v34, %v471_v40  ;;  %v5835_v21 = vld [vmem:[#allocation8 + $0x3c] ss:$24 sps:$4 sm:$0xff]   ;;  %v5857_v34 = vld [vmem:[#allocation8 + $0xf8] ss:$24 sps:$4 sm:$0xff]  }
 0x1b8   :  { %v5871_v40 = vld [vmem:[#allocation8 + $0x15c] ss:$24 sps:$4 sm:$0xff]  }
 0x1b9   :  { %v494_v45 = vadd.f32 %v492_v35, %v470_v36  ;;  %v5865_v35 = vld [vmem:[#allocation8 + $0x12c] ss:$24 sps:$4 sm:$0xff]  }
 0x1ba   :  { %v5909_v36 = vld [vmem:[#allocation8 + $0x2a4] ss:$24 sps:$4 sm:$0xff]  }
 0x1bb   :  { %v498_v55 = vpop.permute.xlu1 %497  ;;  %2779 = vmatprep.subr.bf16.mxu1 %v5909_v36  ;;  %v5959_v36 = vld [vmem:[#allocation8 + $0x424] ss:$24 sps:$4 sm:$0xff]  }
 0x1bc   :  { %vm502_vm14 = vcmp.eq.s32.totalorder %v7127_v25, %v498_v55 }
 0x1bd   :  { %v5016_v37 = vsel %vm502_vm14, 1.0, %v6880_v30 }
 0x1bf   :  { %v510_v10 = vpop.permute.xlu1 %509 }
 0x1c0   :  { %v516_v39 = vmul.f32 %v5016_v37, %v510_v10  ;;  %v5798_v10 = vld [vmem:[#allocation7 + $0x158] ss:$24 sps:$4 sm:$0xff]  }
 0x1c1   :  { %v5914_v37 = vld [vmem:[#allocation8 + $0x2a0] ss:$24 sps:$4 sm:$0xff]  }
 0x1c2   :  { %v518_v49 = vadd.f32 %v516_v39, %v494_v45  ;;  %2780 = vmatpush1.bf16.msra.mxu1 %v5914_v37  ;;  %v5915_v39 = vld [vmem:[#allocation8 + $0x2d4] ss:$24 sps:$4 sm:$0xff]   ;;  %v5875_v45 = vld [vmem:[#allocation8 + $0x188] ss:$24 sps:$4 sm:$0xff]  }
 0x1c3   :  { %v514_v61 = vpop.permute.xlu1 %513  ;;  %2781 = vmatprep.subr.bf16.mxu1 %v5915_v39  ;;  %v5962_v37 = vld [vmem:[#allocation8 + $0x42c] ss:$24 sps:$4 sm:$0xff]  }
 0x1c4   :  { %v517_v41 = vmul.f32 %v5017_v31, %v514_v61  ;;  %v5824_v61 = vld [vmem:[#allocation7 + $0x164] ss:$24 sps:$4 sm:$0xff]   ;;  %v5965_v39 = vld [vmem:[#allocation8 + $0x454] ss:$24 sps:$4 sm:$0xff]  }
 0x1c5   :  { %v5853_v31 = vld [vmem:[#allocation8 + $0xcc] ss:$24 sps:$4 sm:$0xff]  }
 0x1c6   :  { %v519_v50 = vadd.f32 %v517_v41, %v495_v44  ;;  %v5920_v41 = vld [vmem:[#allocation8 + $0x2d0] ss:$24 sps:$4 sm:$0xff]   ;;  %v5923_v44 = vld [vmem:[#allocation8 + $0x304] ss:$24 sps:$4 sm:$0xff]  }
 0x1c7   :  { %2782 = vmatpush1.bf16.msra.mxu1 %v5920_v41  ;;  %v5968_v41 = vld [vmem:[#allocation8 + $0x45c] ss:$24 sps:$4 sm:$0xff]  }
 0x1c8   :  { %v525_v38 = vpop.permute.xlu1 %524  ;;  %2794 = vmatprep.subr.bf16.mxu1 %v5923_v44 }
 0x1c9   :  { %vm527_vm0 = vcmp.eq.s32.totalorder %v7127_v25, %v525_v38  ;;  %v5780_v25 = vld [vmem:[#allocation7 + $0x38] ss:$24 sps:$4 sm:$0xff]   ;;  %v5863_v38 = vld [vmem:[#allocation8 + $0x128] ss:$24 sps:$4 sm:$0xff]  }
 0x1ca   :  { %v5019_v42 = vsel %vm527_vm0, 1.0, %v6880_v30  ;;  %v5788_v30 = vld [vmem:[#allocation7 + $0x9c] ss:$24 sps:$4 sm:$0xff]  }
 0x1cb   :  { %v541_v46 = vmul.f32 %v5019_v42, %v538_v43  ;;  %v5869_v42 = vld [vmem:[#allocation8 + $0x158] ss:$24 sps:$4 sm:$0xff]   ;;  %v5877_v43 = vld [vmem:[#allocation8 + $0x18c] ss:$24 sps:$4 sm:$0xff]  }
 0x1cc   :  { %v534_v47 = vpop.permute.xlu1 %533 }
 0x1cd   :  { %v540_v51 = vmul.f32 %v5018_v48, %v534_v47  ;;  %v543_v52 = vadd.f32 %v541_v46, %v519_v50  ;;  %v5883_v46 = vld [vmem:[#allocation8 + $0x1bc] ss:$24 sps:$4 sm:$0xff]   ;;  %v5881_v47 = vld [vmem:[#allocation8 + $0x1b8] ss:$24 sps:$4 sm:$0xff]   ;;  %v5889_v48 = vld [vmem:[#allocation8 + $0x1ec] ss:$24 sps:$4 sm:$0xff]  }
 0x1ce   :  { %v5895_v50 = vld [vmem:[#allocation8 + $0x21c] ss:$24 sps:$4 sm:$0xff]  }
 0x1cf   :  { %v542_v53 = vadd.f32 %v540_v51, %v518_v49  ;;  %v5887_v49 = vld [vmem:[#allocation8 + $0x1e8] ss:$24 sps:$4 sm:$0xff]   ;;  %v5893_v51 = vld [vmem:[#allocation8 + $0x218] ss:$24 sps:$4 sm:$0xff]  }
 0x1d1   :  { %v7267_v55 = vpack.c.bf16 %v543_v52, %v542_v53  ;;  %v5901_v52 = vld [vmem:[#allocation8 + $0x24c] ss:$24 sps:$4 sm:$0xff]   ;;  %v5899_v53 = vld [vmem:[#allocation8 + $0x248] ss:$24 sps:$4 sm:$0xff]  }
 0x1d3   :  { %875 = vmatmul.mubr.bf16.vlgmr.msra.gmra.mrb[0].mxu0 %v7267_v55 }
 0x1d4   :  { %886 = vmatpush1.bf16.msra.mxu0 %v5777_v54  ;;  %917 = vmatprep.mubr.bf16.mxu0 %v6865_v1  ;;  %v5907_v54 = vld [vmem:[#allocation8 + $0x27c] ss:$24 sps:$4 sm:$0xff]  }
 0x1d5   :  { %887 = vmatprep.subr.bf16.mxu0 %v5782_v56  ;;  %v5913_v56 = vld [vmem:[#allocation8 + $0x2ac] ss:$24 sps:$4 sm:$0xff]  }
 0x1d8   :  { %888 = vmatpush1.bf16.msra.mxu0 %v5780_v25  ;;  %v5911_v25 = vld [vmem:[#allocation8 + $0x2a8] ss:$24 sps:$4 sm:$0xff]  }
 0x1d9   :  { %889 = vmatprep.subr.bf16.mxu0 %v5785_v57  ;;  %v5919_v57 = vld [vmem:[#allocation8 + $0x2dc] ss:$24 sps:$4 sm:$0xff]  }
 0x1dc   :  { %890 = vmatpush1.bf16.msra.mxu0 %v5783_v58  ;;  %v5917_v58 = vld [vmem:[#allocation8 + $0x2d8] ss:$24 sps:$4 sm:$0xff]  }
 0x1dd   :  { %891 = vmatprep.subr.bf16.mxu0 %v5788_v30  ;;  %v5926_v30 = vld [vmem:[#allocation8 + $0x30c] ss:$24 sps:$4 sm:$0xff]  }
 0x1e0   :  { %892 = vmatpush1.bf16.msra.mxu0 %v5786_v59 }
 0x1e1   :  { %893 = vmatprep.subr.bf16.mxu0 %v5791_v60  ;;  %v550_v60 = vpop.xlane.xlu0 %549 }
 0x1e4   :  { %894 = vmatpush1.bf16.msra.mxu0 %v5789_v62 }
 0x1e5   :  { %895 = vmatprep.subr.bf16.mxu0 %v5794_v0  ;;  %v552_v0 = vmax.f32 %v550_v60, 1.0  ;;  %v5983_v60 = vld [vmem:[#allocation8 + $0x4e4] ss:$24 sps:$4 sm:$0xff]  }
 0x1e8   :  { %896 = vmatpush1.bf16.msra.mxu0 %v5792_v2 }
 0x1e9   :  { %897 = vmatprep.subr.bf16.mxu0 %v5797_v4 }
 0x1ec   :  { %898 = vmatpush1.bf16.msra.mxu0 %v5795_v8 }
 0x1ed   :  { %899 = vmatprep.subr.bf16.mxu0 %v5800_v9 }
 0x1f0   :  { %900 = vmatpush1.bf16.msra.mxu0 %v5798_v10 }
 0x1f1   :  { %928 = vmatprep.subr.bf16.mxu0 %v5803_v3 }
 0x1f3   :  { %918 = vmatmul.mubr.bf16.vlgmr.msra.gmra.mrb[4].mxu0 %v7267_v55 }
 0x1f4   :  { %929 = vmatpush1.bf16.msra.mxu0 %v5801_v11  ;;  %960 = vmatprep.mubr.bf16.mxu0 %v6865_v1  ;;  %v5819_v1 = vld [vmem:[#allocation7 + $0x130] ss:$24 sps:$4 sm:$0xff]  }
 0x1f5   :  { %930 = vmatprep.subr.bf16.mxu0 %v5806_v5 }
 0x1f8   :  { %931 = vmatpush1.bf16.msra.mxu0 %v5804_v13 }
 0x1f9   :  { %932 = vmatprep.subr.bf16.mxu0 %v5809_v14 }
 0x1fc   :  { %933 = vmatpush1.bf16.msra.mxu0 %v5807_v15 }
 0x1fd   :  { %934 = vmatprep.subr.bf16.mxu0 %v5812_v16 }
 0x1fe   :  { %v547_v59 = vpop.xlane.xlu1 %546 }
 0x1ff   :  { %v551_v62 = vmax.f32 %v547_v59, 1.0  ;;  %v5978_v59 = vld [vmem:[#allocation8 + $0x4b8] ss:$24 sps:$4 sm:$0xff]  }
 0x200   :  { %935 = vmatpush1.bf16.msra.mxu0 %v5810_v63  ;;  %v5921_v63 = vld [vmem:[#allocation8 + $0x300] ss:$24 sps:$4 sm:$0xff]  }
 0x201   :  { %936 = vmatprep.subr.bf16.mxu0 %v5815_v12  ;;  %6577 = vrcp.f32 %v551_v62  ;;  %v5924_v12 = vld [vmem:[#allocation8 + $0x308] ss:$24 sps:$4 sm:$0xff]   ;;  %v5986_v62 = vld [vmem:[#allocation8 + $0x4ec] ss:$24 sps:$4 sm:$0xff]  }
 0x202   :  { %6579 = vrcp.f32 %v552_v0  ;;  %v5981_v0 = vld [vmem:[#allocation8 + $0x4e0] ss:$24 sps:$4 sm:$0xff]  }
 0x204   :  { %937 = vmatpush1.bf16.msra.mxu0 %v5813_v17  ;;  %v5929_v17 = vld [vmem:[#allocation8 + $0x334] ss:$24 sps:$4 sm:$0xff]  }
 0x205   :  { %938 = vmatprep.subr.bf16.mxu0 %v5818_v6  ;;  %v5932_v6 = vld [vmem:[#allocation8 + $0x33c] ss:$24 sps:$4 sm:$0xff]  }
 0x208   :  { %939 = vmatpush1.bf16.msra.mxu0 %v5816_v7  ;;  %v5927_v7 = vld [vmem:[#allocation8 + $0x330] ss:$24 sps:$4 sm:$0xff]  }
 0x209   :  { %940 = vmatprep.subr.bf16.mxu0 %v5821_v19  ;;  %v5930_v19 = vld [vmem:[#allocation8 + $0x338] ss:$24 sps:$4 sm:$0xff]  }
 0x20b   :  { %v7274_v2 = vpop.eup %6577 }
 0x20c   :  { %941 = vmatpush1.bf16.msra.mxu0 %v5819_v1  ;;  %v7276_v4 = vpop.eup %6579  ;;  %v5935_v1 = vld [vmem:[#allocation8 + $0x364] ss:$24 sps:$4 sm:$0xff]  }
 0x20d   :  { %942 = vmatprep.subr.bf16.mxu0 %v5824_v61  ;;  %v5938_v61 = vld [vmem:[#allocation8 + $0x36c] ss:$24 sps:$4 sm:$0xff]  }
 0x210   :  { %943 = vmatpush1.bf16.msra.mxu0 %v5822_v18  ;;  %v5933_v18 = vld [vmem:[#allocation8 + $0x360] ss:$24 sps:$4 sm:$0xff]  }
 0x211   :  { %2880 = vmatprep.subr.bf16.mxu0 %v5829_v20  ;;  %v5936_v20 = vld [vmem:[#allocation8 + $0x368] ss:$24 sps:$4 sm:$0xff]  }
 0x213   :  { %961 = vmatmul.mubr.bf16.vlgmr.msra.gmra.mrb[8].mxu0 %v7267_v55  ;;  %v5905_v55 = vld [vmem:[#allocation8 + $0x278] ss:$24 sps:$4 sm:$0xff]  }
 0x214   :  { %2881 = vmatpush1.bf16.msra.mxu0 %v5827_v23  ;;  %v5941_v23 = vld [vmem:[#allocation8 + $0x394] ss:$24 sps:$4 sm:$0xff]  }
 0x215   :  { %2882 = vmatprep.subr.bf16.mxu0 %v5835_v21  ;;  %v5944_v21 = vld [vmem:[#allocation8 + $0x39c] ss:$24 sps:$4 sm:$0xff]  }
 0x218   :  { %2883 = vmatpush1.bf16.msra.mxu0 %v5833_v24  ;;  %v5939_v24 = vld [vmem:[#allocation8 + $0x390] ss:$24 sps:$4 sm:$0xff]  }
 0x219   :  { %2884 = vmatprep.subr.bf16.mxu0 %v5841_v26  ;;  %v5942_v26 = vld [vmem:[#allocation8 + $0x398] ss:$24 sps:$4 sm:$0xff]  }
 0x21c   :  { %2885 = vmatpush1.bf16.msra.mxu0 %v5839_v27  ;;  %v5947_v27 = vld [vmem:[#allocation8 + $0x3c4] ss:$24 sps:$4 sm:$0xff]  }
 0x21d   :  { %2886 = vmatprep.subr.bf16.mxu0 %v5847_v28  ;;  %v5950_v28 = vld [vmem:[#allocation8 + $0x3cc] ss:$24 sps:$4 sm:$0xff]  }
 0x220   :  { %2887 = vmatpush1.bf16.msra.mxu0 %v5845_v29  ;;  %v5945_v29 = vld [vmem:[#allocation8 + $0x3c0] ss:$24 sps:$4 sm:$0xff]  }
 0x221   :  { %2888 = vmatprep.subr.bf16.mxu0 %v5853_v31  ;;  %v5948_v31 = vld [vmem:[#allocation8 + $0x3c8] ss:$24 sps:$4 sm:$0xff]  }
 0x224   :  { %2889 = vmatpush1.bf16.msra.mxu0 %v5851_v32  ;;  %v5953_v32 = vld [vmem:[#allocation8 + $0x3f4] ss:$24 sps:$4 sm:$0xff]  }
 0x225   :  { %2890 = vmatprep.subr.bf16.mxu0 %v5859_v33  ;;  %v5956_v33 = vld [vmem:[#allocation8 + $0x3fc] ss:$24 sps:$4 sm:$0xff]  }
 0x228   :  { %2891 = vmatpush1.bf16.msra.mxu0 %v5857_v34  ;;  %v5951_v34 = vld [vmem:[#allocation8 + $0x3f0] ss:$24 sps:$4 sm:$0xff]  }
 0x229   :  { %2892 = vmatprep.subr.bf16.mxu0 %v5865_v35  ;;  %v5954_v35 = vld [vmem:[#allocation8 + $0x3f8] ss:$24 sps:$4 sm:$0xff]  }
 0x22c   :  { %2893 = vmatpush1.bf16.msra.mxu0 %v5863_v38  ;;  %v5957_v38 = vld [vmem:[#allocation8 + $0x420] ss:$24 sps:$4 sm:$0xff]  }
 0x22d   :  { %2894 = vmatprep.subr.bf16.mxu0 %v5871_v40  ;;  %v5960_v40 = vld [vmem:[#allocation8 + $0x428] ss:$24 sps:$4 sm:$0xff]  }
 0x230   :  { %2895 = vmatpush1.bf16.msra.mxu0 %v5869_v42 }
 0x231   :  { %2896 = vmatprep.subr.bf16.mxu0 %v5877_v43 }
 0x234   :  { %2897 = vmatpush1.bf16.msra.mxu0 %v5875_v45  ;;  %v5963_v45 = vld [vmem:[#allocation8 + $0x450] ss:$24 sps:$4 sm:$0xff]  }
 0x235   :  { %2898 = vmatprep.subr.bf16.mxu0 %v5883_v46  ;;  %v5966_v46 = vld [vmem:[#allocation8 + $0x458] ss:$24 sps:$4 sm:$0xff]  }
 0x238   :  { %2899 = vmatpush1.bf16.msra.mxu0 %v5881_v47 }
 0x239   :  { %2900 = vmatprep.subr.bf16.mxu0 %v5889_v48 }
 0x23c   :  { %2901 = vmatpush1.bf16.msra.mxu0 %v5887_v49 }
 0x23d   :  { %2902 = vmatprep.subr.bf16.mxu0 %v5895_v50  ;;  %v5971_v50 = vld [vmem:[#allocation8 + $0x484] ss:$24 sps:$4 sm:$0xff]  }
 0x240   :  { %2903 = vmatpush1.bf16.msra.mxu0 %v5893_v51  ;;  %v5974_v51 = vld [vmem:[#allocation8 + $0x48c] ss:$24 sps:$4 sm:$0xff]  }
 0x241   :  { %2904 = vmatprep.subr.bf16.mxu0 %v5901_v52 }
 0x244   :  { %2905 = vmatpush1.bf16.msra.mxu0 %v5899_v53 }
 0x245   :  { %2906 = vmatprep.subr.bf16.mxu0 %v5907_v54 }
 0x248   :  { %2907 = vmatpush1.bf16.msra.mxu0 %v5905_v55 }
 0x249   :  { %2908 = vmatprep.subr.bf16.mxu0 %v5913_v56  ;;  %v5969_v56 = vld [vmem:[#allocation8 + $0x480] ss:$24 sps:$4 sm:$0xff]  }
 0x24c   :  { %2909 = vmatpush1.bf16.msra.mxu0 %v5911_v25  ;;  %v5972_v25 = vld [vmem:[#allocation8 + $0x488] ss:$24 sps:$4 sm:$0xff]  }
 0x24d   :  { %2910 = vmatprep.subr.bf16.mxu0 %v5919_v57  ;;  %v5977_v57 = vld [vmem:[#allocation8 + $0x4b4] ss:$24 sps:$4 sm:$0xff]  }
 0x250   :  { %2911 = vmatpush1.bf16.msra.mxu0 %v5917_v58  ;;  %v5980_v58 = vld [vmem:[#allocation8 + $0x4bc] ss:$24 sps:$4 sm:$0xff]  }
 0x251   :  { %2923 = vmatprep.subr.bf16.mxu0 %v5926_v30  ;;  %v5975_v30 = vld [vmem:[#allocation8 + $0x4b0] ss:$24 sps:$4 sm:$0xff]  }
 0x2a6   :  { %v876_v8 = vpop.f32.mrb[0].mxu0 }
 0x2a7   :  { %v878_v9 = vpop.f32.mrb[1].mxu0  ;;  %v972_v3 = vmul.f32 %v7274_v2, %v876_v8  ;;  %v5984_v8 = vld [vmem:[#allocation8 + $0x4e8] ss:$24 sps:$4 sm:$0xff]  }
 0x2a8   :  { %v880_v10 = vpop.f32.mrb[2].mxu0  ;;  %v973_v13 = vmul.f32 %v7274_v2, %v878_v9  ;;  %v5989_v9 = vld [vmem:[#allocation8 + $0x514] ss:$24 sps:$4 sm:$0xff]  }
 0x2a9   :  { %v979_v11 = vmul.f32 %v7276_v4, %v880_v10  ;;  %v882_v5 = vpop.f32.mrb[3].mxu0  ;;  %v5992_v10 = vld [vmem:[#allocation8 + $0x51c] ss:$24 sps:$4 sm:$0xff]  }
 0x2aa   :  { %v980_v14 = vmul.f32 %v7276_v4, %v882_v5  ;;  %v5995_v5 = vld [vmem:[#allocation8 + $0x544] ss:$24 sps:$4 sm:$0xff]  }
 0x2ab   :  { %v7282_v15 = vpack.c.bf16 %v979_v11, %v972_v3  ;;  %v5987_v3 = vld [vmem:[#allocation8 + $0x510] ss:$24 sps:$4 sm:$0xff]  }
 0x2ac   :  { %v7284_v16 = vpack.c.bf16 %v980_v14, %v973_v13  ;;  %v5990_v11 = vld [vmem:[#allocation8 + $0x518] ss:$24 sps:$4 sm:$0xff]   ;;  %v5998_v13 = vld [vmem:[#allocation8 + $0x54c] ss:$24 sps:$4 sm:$0xff]  }
 0x2ad   :  { %v5993_v14 = vld [vmem:[#allocation8 + $0x540] ss:$24 sps:$4 sm:$0xff]  }
 0x2ae   :  { %2783 = vmatprep.mubr.bf16.mxu1 %v7284_v16  ;;  %2912 = vmatprep.mubr.bf16.mxu0 %v7284_v16 }
 0x2af   :  { %2784 = vmatmul.mubr.bf16.vlgmr.msra.gmra.mrb[0].mxu1 %v7282_v15  ;;  %2913 = vmatmul.mubr.bf16.vlgmr.msra.gmra.mrb[12].mxu0 %v7282_v15 }
 0x2b0   :  { %2795 = vmatpush1.bf16.msra.mxu1 %v5921_v63  ;;  %2924 = vmatpush1.bf16.msra.mxu0 %v5924_v12  ;;  %v5996_v63 = vld [vmem:[#allocation8 + $0x548] ss:$24 sps:$4 sm:$0xff]   ;;  %v6001_v12 = vld [vmem:[#allocation8 + $0x574] ss:$24 sps:$4 sm:$0xff]  }
 0x2b1   :  { %2796 = vmatprep.subr.bf16.mxu1 %v5929_v17  ;;  %2925 = vmatprep.subr.bf16.mxu0 %v5932_v6  ;;  %v6004_v17 = vld [vmem:[#allocation8 + $0x57c] ss:$24 sps:$4 sm:$0xff]   ;;  %v5999_v6 = vld [vmem:[#allocation8 + $0x570] ss:$24 sps:$4 sm:$0xff]  }
 0x2b4   :  { %2797 = vmatpush1.bf16.msra.mxu1 %v5927_v7  ;;  %2926 = vmatpush1.bf16.msra.mxu0 %v5930_v19  ;;  %v6002_v7 = vld [vmem:[#allocation8 + $0x578] ss:$24 sps:$4 sm:$0xff]   ;;  %v6007_v19 = vld [vmem:[#allocation8 + $0x5a4] ss:$24 sps:$4 sm:$0xff]  }
 0x2b5   :  { %2798 = vmatprep.subr.bf16.mxu1 %v5935_v1  ;;  %2927 = vmatprep.subr.bf16.mxu0 %v5938_v61  ;;  %v6010_v1 = vld [vmem:[#allocation8 + $0x5ac] ss:$24 sps:$4 sm:$0xff]   ;;  %v6005_v61 = vld [vmem:[#allocation8 + $0x5a0] ss:$24 sps:$4 sm:$0xff]  }
 0x2b8   :  { %2799 = vmatpush1.bf16.msra.mxu1 %v5933_v18  ;;  %2928 = vmatpush1.bf16.msra.mxu0 %v5936_v20  ;;  %v6008_v18 = vld [vmem:[#allocation8 + $0x5a8] ss:$24 sps:$4 sm:$0xff]   ;;  %v6013_v20 = vld [vmem:[#allocation8 + $0x5d4] ss:$24 sps:$4 sm:$0xff]  }
 0x2b9   :  { %2800 = vmatprep.subr.bf16.mxu1 %v5941_v23  ;;  %2929 = vmatprep.subr.bf16.mxu0 %v5944_v21  ;;  %v6016_v23 = vld [vmem:[#allocation8 + $0x5dc] ss:$24 sps:$4 sm:$0xff]  }
 0x2bc   :  { %2801 = vmatpush1.bf16.msra.mxu1 %v5939_v24  ;;  %2930 = vmatpush1.bf16.msra.mxu0 %v5942_v26 }
 0x2bd   :  { %2802 = vmatprep.subr.bf16.mxu1 %v5947_v27  ;;  %2931 = vmatprep.subr.bf16.mxu0 %v5950_v28  ;;  %v6011_v27 = vld [vmem:[#allocation8 + $0x5d0] ss:$24 sps:$4 sm:$0xff]  }
 0x2be   :  { %v6014_v28 = vld [vmem:[#allocation8 + $0x5d8] ss:$24 sps:$4 sm:$0xff]  }
 0x2c0   :  { %2803 = vmatpush1.bf16.msra.mxu1 %v5945_v29  ;;  %2932 = vmatpush1.bf16.msra.mxu0 %v5948_v31 }
 0x2c1   :  { %2804 = vmatprep.subr.bf16.mxu1 %v5953_v32  ;;  %2933 = vmatprep.subr.bf16.mxu0 %v5956_v33  ;;  %v6019_v33 = vld [vmem:[#allocation8 + $0x604] ss:$24 sps:$4 sm:$0xff]  }
 0x2c4   :  { %2805 = vmatpush1.bf16.msra.mxu1 %v5951_v34  ;;  %2934 = vmatpush1.bf16.msra.mxu0 %v5954_v35  ;;  %v6022_v34 = vld [vmem:[#allocation8 + $0x60c] ss:$24 sps:$4 sm:$0xff]  }
 0x2c5   :  { %2806 = vmatprep.subr.bf16.mxu1 %v5959_v36  ;;  %2935 = vmatprep.subr.bf16.mxu0 %v5962_v37 }
 0x2c6   :  { %v919_v42 = vpop.f32.mrb[4].mxu0 }
 0x2c7   :  { %v921_v43 = vpop.f32.mrb[5].mxu0  ;;  %v974_v47 = vmul.f32 %v7274_v2, %v919_v42  ;;  %v6028_v42 = vld [vmem:[#allocation8 + $0x63c] ss:$24 sps:$4 sm:$0xff]  }
 0x2c8   :  { %v923_v44 = vpop.f32.mrb[6].mxu0  ;;  %2807 = vmatpush1.bf16.msra.mxu1 %v5957_v38  ;;  %2936 = vmatpush1.bf16.msra.mxu0 %v5960_v40  ;;  %v975_v52 = vmul.f32 %v7274_v2, %v921_v43  ;;  %v6017_v40 = vld [vmem:[#allocation8 + $0x600] ss:$24 sps:$4 sm:$0xff]   ;;  %v6031_v43 = vld [vmem:[#allocation8 + $0x664] ss:$24 sps:$4 sm:$0xff]  }
 0x2c9   :  { %v981_v48 = vmul.f32 %v7276_v4, %v923_v44  ;;  %v925_v49 = vpop.f32.mrb[7].mxu0  ;;  %2808 = vmatprep.subr.bf16.mxu1 %v5965_v39  ;;  %2937 = vmatprep.subr.bf16.mxu0 %v5968_v41  ;;  %v6020_v39 = vld [vmem:[#allocation8 + $0x608] ss:$24 sps:$4 sm:$0xff]   ;;  %v6025_v41 = vld [vmem:[#allocation8 + $0x634] ss:$24 sps:$4 sm:$0xff]  }
 0x2ca   :  { %v982_v53 = vmul.f32 %v7276_v4, %v925_v49  ;;  %v6034_v44 = vld [vmem:[#allocation8 + $0x66c] ss:$24 sps:$4 sm:$0xff]   ;;  %v6035_v49 = vld [vmem:[#allocation8 + $0x690] ss:$24 sps:$4 sm:$0xff]  }
 0x2cb   :  { %v7294_v54 = vpack.c.bf16 %v981_v48, %v974_v47  ;;  %v6037_v47 = vld [vmem:[#allocation8 + $0x694] ss:$24 sps:$4 sm:$0xff]  }
 0x2cc   :  { %v7296_v55 = vpack.c.bf16 %v982_v53, %v975_v52  ;;  %2809 = vmatpush1.bf16.msra.mxu1 %v5963_v45  ;;  %2938 = vmatpush1.bf16.msra.mxu0 %v5966_v46  ;;  %v6029_v45 = vld [vmem:[#allocation8 + $0x660] ss:$24 sps:$4 sm:$0xff]   ;;  %v6040_v48 = vld [vmem:[#allocation8 + $0x69c] ss:$24 sps:$4 sm:$0xff]   ;;  %v6046_v52 = vld [vmem:[#allocation8 + $0x6cc] ss:$24 sps:$4 sm:$0xff]  }
 0x2cd   :  { %2810 = vmatprep.subr.bf16.mxu1 %v5971_v50  ;;  %2939 = vmatprep.subr.bf16.mxu0 %v5974_v51  ;;  %v6032_v46 = vld [vmem:[#allocation8 + $0x668] ss:$24 sps:$4 sm:$0xff]   ;;  %v6038_v50 = vld [vmem:[#allocation8 + $0x698] ss:$24 sps:$4 sm:$0xff]   ;;  %v6043_v51 = vld [vmem:[#allocation8 + $0x6c4] ss:$24 sps:$4 sm:$0xff]  }
 0x2ce   :  { %2826 = vmatprep.mubr.bf16.mxu1 %v7296_v55  ;;  %2955 = vmatprep.mubr.bf16.mxu0 %v7296_v55  ;;  %v6041_v53 = vld [vmem:[#allocation8 + $0x6c0] ss:$24 sps:$4 sm:$0xff]  }
 0x2d0   :  { %2811 = vmatpush1.bf16.msra.mxu1 %v5969_v56  ;;  %2940 = vmatpush1.bf16.msra.mxu0 %v5972_v25  ;;  %v6044_v56 = vld [vmem:[#allocation8 + $0x6c8] ss:$24 sps:$4 sm:$0xff]   ;;  %v6049_v25 = vld [vmem:[#allocation8 + $0x6f4] ss:$24 sps:$4 sm:$0xff]  }
 0x2d1   :  { %2812 = vmatprep.subr.bf16.mxu1 %v5977_v57  ;;  %2941 = vmatprep.subr.bf16.mxu0 %v5980_v58  ;;  %v6052_v57 = vld [vmem:[#allocation8 + $0x6fc] ss:$24 sps:$4 sm:$0xff]   ;;  %v6047_v58 = vld [vmem:[#allocation8 + $0x6f0] ss:$24 sps:$4 sm:$0xff]  }
 0x2d4   :  { %2813 = vmatpush1.bf16.msra.mxu1 %v5975_v30  ;;  %2942 = vmatpush1.bf16.msra.mxu0 %v5978_v59  ;;  %v6050_v30 = vld [vmem:[#allocation8 + $0x6f8] ss:$24 sps:$4 sm:$0xff]   ;;  %v6055_v59 = vld [vmem:[#allocation8 + $0x724] ss:$24 sps:$4 sm:$0xff]  }
 0x2d5   :  { %2814 = vmatprep.subr.bf16.mxu1 %v5983_v60  ;;  %2943 = vmatprep.subr.bf16.mxu0 %v5986_v62  ;;  %v6058_v60 = vld [vmem:[#allocation8 + $0x72c] ss:$24 sps:$4 sm:$0xff]   ;;  %v6053_v62 = vld [vmem:[#allocation8 + $0x720] ss:$24 sps:$4 sm:$0xff]  }
 0x2d8   :  { %2815 = vmatpush1.bf16.msra.mxu1 %v5981_v0  ;;  %2944 = vmatpush1.bf16.msra.mxu0 %v5984_v8  ;;  %v6056_v0 = vld [vmem:[#allocation8 + $0x728] ss:$24 sps:$4 sm:$0xff]   ;;  %v6061_v8 = vld [vmem:[#allocation8 + $0x754] ss:$24 sps:$4 sm:$0xff]  }
 0x2d9   :  { %2816 = vmatprep.subr.bf16.mxu1 %v5989_v9  ;;  %2945 = vmatprep.subr.bf16.mxu0 %v5992_v10  ;;  %v6064_v9 = vld [vmem:[#allocation8 + $0x75c] ss:$24 sps:$4 sm:$0xff]   ;;  %v6059_v10 = vld [vmem:[#allocation8 + $0x750] ss:$24 sps:$4 sm:$0xff]  }
 0x2dc   :  { %2817 = vmatpush1.bf16.msra.mxu1 %v5987_v3  ;;  %2946 = vmatpush1.bf16.msra.mxu0 %v5990_v11  ;;  %v6062_v3 = vld [vmem:[#allocation8 + $0x758] ss:$24 sps:$4 sm:$0xff]   ;;  %v6067_v11 = vld [vmem:[#allocation8 + $0x784] ss:$24 sps:$4 sm:$0xff]  }
 0x2dd   :  { %2818 = vmatprep.subr.bf16.mxu1 %v5995_v5  ;;  %2947 = vmatprep.subr.bf16.mxu0 %v5998_v13  ;;  %v6070_v5 = vld [vmem:[#allocation8 + $0x78c] ss:$24 sps:$4 sm:$0xff]   ;;  %v6065_v13 = vld [vmem:[#allocation8 + $0x780] ss:$24 sps:$4 sm:$0xff]  }
 0x2e0   :  { %2819 = vmatpush1.bf16.msra.mxu1 %v5993_v14  ;;  %2948 = vmatpush1.bf16.msra.mxu0 %v5996_v63  ;;  %v6068_v14 = vld [vmem:[#allocation8 + $0x788] ss:$24 sps:$4 sm:$0xff]   ;;  %v6073_v63 = vld [vmem:[#allocation8 + $0x7b4] ss:$24 sps:$4 sm:$0xff]  }
 0x2e1   :  { %2820 = vmatprep.subr.bf16.mxu1 %v6001_v12  ;;  %2949 = vmatprep.subr.bf16.mxu0 %v6004_v17  ;;  %v6076_v12 = vld [vmem:[#allocation8 + $0x7bc] ss:$24 sps:$4 sm:$0xff]   ;;  %v6071_v17 = vld [vmem:[#allocation8 + $0x7b0] ss:$24 sps:$4 sm:$0xff]  }
 0x2e4   :  { %2821 = vmatpush1.bf16.msra.mxu1 %v5999_v6  ;;  %2950 = vmatpush1.bf16.msra.mxu0 %v6002_v7  ;;  %v6074_v6 = vld [vmem:[#allocation8 + $0x7b8] ss:$24 sps:$4 sm:$0xff]   ;;  %v6079_v7 = vld [vmem:[#allocation8 + $0x7e4] ss:$24 sps:$4 sm:$0xff]  }
 0x2e5   :  { %2822 = vmatprep.subr.bf16.mxu1 %v6007_v19  ;;  %2951 = vmatprep.subr.bf16.mxu0 %v6010_v1  ;;  %v6082_v19 = vld [vmem:[#allocation8 + $0x7ec] ss:$24 sps:$4 sm:$0xff]   ;;  %v6077_v1 = vld [vmem:[#allocation8 + $0x7e0] ss:$24 sps:$4 sm:$0xff]  }
 0x2e6   :  { %v962_v21 = vpop.f32.mrb[8].mxu0 }
 0x2e7   :  { %v964_v24 = vpop.f32.mrb[9].mxu0  ;;  %v976_v29 = vmul.f32 %v7274_v2, %v962_v21  ;;  %v6086_v21 = vld [vmem:[#allocation8 + $0x818] ss:$24 sps:$4 sm:$0xff]  }
 0x2e8   :  { %v966_v26 = vpop.f32.mrb[10].mxu0  ;;  %2823 = vmatpush1.bf16.msra.mxu1 %v6005_v61  ;;  %2952 = vmatpush1.bf16.msra.mxu0 %v6008_v18  ;;  %v977_v35 = vmul.f32 %v7274_v2, %v964_v24  ;;  %v6023_v2 = vld [vmem:[#allocation8 + $0x630] ss:$24 sps:$4 sm:$0xff]   ;;  %v6085_v18 = vld [vmem:[#allocation8 + $0x814] ss:$24 sps:$4 sm:$0xff]  }
 0x2e9   :  { %v983_v31 = vmul.f32 %v7276_v4, %v966_v26  ;;  %v968_v32 = vpop.f32.mrb[11].mxu0  ;;  %2824 = vmatprep.subr.bf16.mxu1 %v6013_v20  ;;  %2953 = vmatprep.subr.bf16.mxu0 %v6016_v23  ;;  %v6080_v61 = vld [vmem:[#allocation8 + $0x7e8] ss:$24 sps:$4 sm:$0xff]   ;;  %v6088_v20 = vld [vmem:[#allocation8 + $0x81c] ss:$24 sps:$4 sm:$0xff]  }
 0x2ea   :  { %v984_v36 = vmul.f32 %v7276_v4, %v968_v32  ;;  %v6026_v4 = vld [vmem:[#allocation8 + $0x638] ss:$24 sps:$4 sm:$0xff]   ;;  %v6091_v24 = vld [vmem:[#allocation8 + $0x844] ss:$24 sps:$4 sm:$0xff]  }
 0x2eb   :  { %v7304_v37 = vpack.c.bf16 %v983_v31, %v976_v29  ;;  %v6083_v23 = vld [vmem:[#allocation8 + $0x810] ss:$24 sps:$4 sm:$0xff]   ;;  %v6094_v26 = vld [vmem:[#allocation8 + $0x84c] ss:$24 sps:$4 sm:$0xff]   ;;  %v6100_v31 = vld [vmem:[#allocation8 + $0x87c] ss:$24 sps:$4 sm:$0xff]  }
 0x2ec   :  { %v7306_v38 = vpack.c.bf16 %v984_v36, %v977_v35  ;;  %2825 = vmatpush1.bf16.msra.mxu1 %v6011_v27  ;;  %2954 = vmatpush1.bf16.msra.mxu0 %v6014_v28  ;;  %v6089_v27 = vld [vmem:[#allocation8 + $0x840] ss:$24 sps:$4 sm:$0xff]   ;;  %v6097_v29 = vld [vmem:[#allocation8 + $0x874] ss:$24 sps:$4 sm:$0xff]   ;;  %v6095_v32 = vld [vmem:[#allocation8 + $0x870] ss:$24 sps:$4 sm:$0xff]  }
 0x2ed   :  { %2837 = vmatprep.subr.bf16.mxu1 %v6019_v33  ;;  %2966 = vmatprep.subr.bf16.mxu0 %v6022_v34  ;;  %v6092_v28 = vld [vmem:[#allocation8 + $0x848] ss:$24 sps:$4 sm:$0xff]   ;;  %v6098_v33 = vld [vmem:[#allocation8 + $0x878] ss:$24 sps:$4 sm:$0xff]   ;;  %v6103_v34 = vld [vmem:[#allocation8 + $0x8a4] ss:$24 sps:$4 sm:$0xff]  }
 0x2ee   :  { %v6106_v35 = vld [vmem:[#allocation8 + $0x8ac] ss:$24 sps:$4 sm:$0xff]   ;;  %v6101_v36 = vld [vmem:[#allocation8 + $0x8a0] ss:$24 sps:$4 sm:$0xff]  }
 0x2ef   :  { %2827 = vmatmul.mubr.bf16.vlgmr.msra.gmra.mrb[0].mxu1 %v7294_v54  ;;  %2956 = vmatmul.mubr.bf16.vlgmr.msra.gmra.mrb[12].mxu0 %v7294_v54 }
 0x2f0   :  { %2838 = vmatpush1.bf16.msra.mxu1 %v6017_v40  ;;  %2869 = vmatprep.mubr.bf16.mxu1 %v7306_v38  ;;  %v6104_v40 = vld [vmem:[#allocation8 + $0x8a8] ss:$24 sps:$4 sm:$0xff]  }
 0x2f1   :  { %2967 = vmatpush1.bf16.msra.mxu0 %v6020_v39  ;;  %2998 = vmatprep.mubr.bf16.mxu0 %v7306_v38  ;;  %v6109_v39 = vld [vmem:[#allocation8 + $0x8d4] ss:$24 sps:$4 sm:$0xff]  }
 0x2f2   :  { %2839 = vmatprep.subr.bf16.mxu1 %v6025_v41  ;;  %2968 = vmatprep.subr.bf16.mxu0 %v6028_v42  ;;  %v6112_v41 = vld [vmem:[#allocation8 + $0x8dc] ss:$24 sps:$4 sm:$0xff]   ;;  %v6107_v42 = vld [vmem:[#allocation8 + $0x8d0] ss:$24 sps:$4 sm:$0xff]  }
 0x2f4   :  { %2840 = vmatpush1.bf16.msra.mxu1 %v6023_v2  ;;  %v6110_v2 = vld [vmem:[#allocation8 + $0x8d8] ss:$24 sps:$4 sm:$0xff]  }
 0x2f5   :  { %2969 = vmatpush1.bf16.msra.mxu0 %v6026_v4  ;;  %2841 = vmatprep.subr.bf16.mxu1 %v6031_v43  ;;  %v6115_v4 = vld [vmem:[#allocation8 + $0x14] ss:$24 sps:$4 sm:$0xff]   ;;  %v6113_v43 = vld [vmem:[#allocation8 + $0x10] ss:$24 sps:$4 sm:$0xff]  }
 0x2f6   :  { %2970 = vmatprep.subr.bf16.mxu0 %v6034_v44  ;;  %v6118_v44 = vld [vmem:[#allocation8 + $0x44] ss:$24 sps:$4 sm:$0xff]  }
 0x2f8   :  { %2842 = vmatpush1.bf16.msra.mxu1 %v6029_v45  ;;  %v6116_v45 = vld [vmem:[#allocation8 + $0x40] ss:$24 sps:$4 sm:$0xff]  }
 0x2f9   :  { %2971 = vmatpush1.bf16.msra.mxu0 %v6032_v46  ;;  %2843 = vmatprep.subr.bf16.mxu1 %v6037_v47  ;;  %v6121_v46 = vld [vmem:[#allocation8 + $0x74] ss:$24 sps:$4 sm:$0xff]   ;;  %v6119_v47 = vld [vmem:[#allocation8 + $0x70] ss:$24 sps:$4 sm:$0xff]  }
 0x2fa   :  { %2972 = vmatprep.subr.bf16.mxu0 %v6040_v48  ;;  %v6124_v48 = vld [vmem:[#allocation8 + $0xa4] ss:$24 sps:$4 sm:$0xff]  }
 0x2fc   :  { %2844 = vmatpush1.bf16.msra.mxu1 %v6035_v49  ;;  %v6122_v49 = vld [vmem:[#allocation8 + $0xa0] ss:$24 sps:$4 sm:$0xff]  }
 0x2fd   :  { %2973 = vmatpush1.bf16.msra.mxu0 %v6038_v50  ;;  %2845 = vmatprep.subr.bf16.mxu1 %v6043_v51  ;;  %v6127_v50 = vld [vmem:[#allocation8 + $0xd4] ss:$24 sps:$4 sm:$0xff]   ;;  %v6125_v51 = vld [vmem:[#allocation8 + $0xd0] ss:$24 sps:$4 sm:$0xff]  }
 0x2fe   :  { %2974 = vmatprep.subr.bf16.mxu0 %v6046_v52  ;;  %v6130_v52 = vld [vmem:[#allocation8 + $0x104] ss:$24 sps:$4 sm:$0xff]  }
 0x300   :  { %2846 = vmatpush1.bf16.msra.mxu1 %v6041_v53  ;;  %v6128_v53 = vld [vmem:[#allocation8 + $0x100] ss:$24 sps:$4 sm:$0xff]  }
 0x301   :  { %2975 = vmatpush1.bf16.msra.mxu0 %v6044_v56  ;;  %2847 = vmatprep.subr.bf16.mxu1 %v6049_v25  ;;  %v6133_v56 = vld [vmem:[#allocation8 + $0x134] ss:$24 sps:$4 sm:$0xff]   ;;  %v6136_v25 = vld [vmem:[#allocation8 + $0x164] ss:$24 sps:$4 sm:$0xff]  }
 0x302   :  { %2976 = vmatprep.subr.bf16.mxu0 %v6052_v57  ;;  %v6134_v57 = vld [vmem:[#allocation8 + $0x160] ss:$24 sps:$4 sm:$0xff]  }
 0x304   :  { %2848 = vmatpush1.bf16.msra.mxu1 %v6047_v58  ;;  %v6139_v58 = vld [vmem:[#allocation8 + $0x194] ss:$24 sps:$4 sm:$0xff]  }
 0x305   :  { %2977 = vmatpush1.bf16.msra.mxu0 %v6050_v30  ;;  %2849 = vmatprep.subr.bf16.mxu1 %v6055_v59  ;;  %v6137_v30 = vld [vmem:[#allocation8 + $0x190] ss:$24 sps:$4 sm:$0xff]   ;;  %v6142_v59 = vld [vmem:[#allocation8 + $0x1c4] ss:$24 sps:$4 sm:$0xff]  }
 0x306   :  { %2978 = vmatprep.subr.bf16.mxu0 %v6058_v60  ;;  %v6140_v60 = vld [vmem:[#allocation8 + $0x1c0] ss:$24 sps:$4 sm:$0xff]  }
 0x308   :  { %2850 = vmatpush1.bf16.msra.mxu1 %v6053_v62  ;;  %v6145_v62 = vld [vmem:[#allocation8 + $0x1f4] ss:$24 sps:$4 sm:$0xff]  }
 0x309   :  { %2979 = vmatpush1.bf16.msra.mxu0 %v6056_v0  ;;  %2851 = vmatprep.subr.bf16.mxu1 %v6061_v8  ;;  %v6143_v0 = vld [vmem:[#allocation8 + $0x1f0] ss:$24 sps:$4 sm:$0xff]  }
 0x30a   :  { %2980 = vmatprep.subr.bf16.mxu0 %v6064_v9  ;;  %v6239_v8 = vld [vmem:[#allocation11] ss:$16 sps:$4 sm:$0xff]   ;;  %v6241_v9 = vld [vmem:[#allocation11 + $0x4] ss:$16 sps:$4 sm:$0xff]  }
 0x30c   :  { %2852 = vmatpush1.bf16.msra.mxu1 %v6059_v10  ;;  %v6148_v10 = vld [vmem:[#allocation8 + $0x224] ss:$24 sps:$4 sm:$0xff]  }
 0x30d   :  { %2981 = vmatpush1.bf16.msra.mxu0 %v6062_v3  ;;  %2853 = vmatprep.subr.bf16.mxu1 %v6067_v11  ;;  %v6146_v3 = vld [vmem:[#allocation8 + $0x220] ss:$24 sps:$4 sm:$0xff]  }
 0x30e   :  { %2982 = vmatprep.subr.bf16.mxu0 %v6070_v5  ;;  %v6245_v11 = vld [vmem:[#allocation11 + $0x20] ss:$16 sps:$4 sm:$0xff]   ;;  %v6247_v5 = vld [vmem:[#allocation11 + $0x24] ss:$16 sps:$4 sm:$0xff]  }
 0x310   :  { %2854 = vmatpush1.bf16.msra.mxu1 %v6065_v13  ;;  %v6151_v13 = vld [vmem:[#allocation8 + $0x254] ss:$24 sps:$4 sm:$0xff]  }
 0x311   :  { %2983 = vmatpush1.bf16.msra.mxu0 %v6068_v14  ;;  %2855 = vmatprep.subr.bf16.mxu1 %v6073_v63  ;;  %v6149_v14 = vld [vmem:[#allocation8 + $0x250] ss:$24 sps:$4 sm:$0xff]  }
 0x312   :  { %2984 = vmatprep.subr.bf16.mxu0 %v6076_v12  ;;  %v6251_v63 = vld [vmem:[#allocation11 + $0x40] ss:$16 sps:$4 sm:$0xff]   ;;  %v6253_v12 = vld [vmem:[#allocation11 + $0x44] ss:$16 sps:$4 sm:$0xff]  }
 0x314   :  { %2856 = vmatpush1.bf16.msra.mxu1 %v6071_v17  ;;  %v6154_v17 = vld [vmem:[#allocation8 + $0x284] ss:$24 sps:$4 sm:$0xff]  }
 0x315   :  { %2985 = vmatpush1.bf16.msra.mxu0 %v6074_v6  ;;  %2857 = vmatprep.subr.bf16.mxu1 %v6079_v7  ;;  %v6152_v6 = vld [vmem:[#allocation8 + $0x280] ss:$24 sps:$4 sm:$0xff]  }
 0x316   :  { %2986 = vmatprep.subr.bf16.mxu0 %v6082_v19  ;;  %v6257_v7 = vld [vmem:[#allocation11 + $0x60] ss:$16 sps:$4 sm:$0xff]   ;;  %v6259_v19 = vld [vmem:[#allocation11 + $0x64] ss:$16 sps:$4 sm:$0xff]  }
 0x318   :  { %2858 = vmatpush1.bf16.msra.mxu1 %v6077_v1  ;;  %v6157_v1 = vld [vmem:[#allocation8 + $0x2b4] ss:$24 sps:$4 sm:$0xff]  }
 0x319   :  { %2987 = vmatpush1.bf16.msra.mxu0 %v6080_v61  ;;  %2859 = vmatprep.subr.bf16.mxu1 %v6085_v18  ;;  %v6155_v61 = vld [vmem:[#allocation8 + $0x2b0] ss:$24 sps:$4 sm:$0xff]  }
 0x31a   :  { %2988 = vmatprep.subr.bf16.mxu0 %v6088_v20  ;;  %v6263_v18 = vld [vmem:[#allocation11 + $0x80] ss:$16 sps:$4 sm:$0xff]   ;;  %v6265_v20 = vld [vmem:[#allocation11 + $0x84] ss:$16 sps:$4 sm:$0xff]  }
 0x31c   :  { %2860 = vmatpush1.bf16.msra.mxu1 %v6083_v23  ;;  %v6160_v23 = vld [vmem:[#allocation8 + $0x2e4] ss:$24 sps:$4 sm:$0xff]  }
 0x31d   :  { %2989 = vmatpush1.bf16.msra.mxu0 %v6086_v21  ;;  %2861 = vmatprep.subr.bf16.mxu1 %v6091_v24  ;;  %v6158_v21 = vld [vmem:[#allocation8 + $0x2e0] ss:$24 sps:$4 sm:$0xff]  }
 0x31e   :  { %2990 = vmatprep.subr.bf16.mxu0 %v6094_v26  ;;  %v6269_v24 = vld [vmem:[#allocation11 + $0xa0] ss:$16 sps:$4 sm:$0xff]   ;;  %v6271_v26 = vld [vmem:[#allocation11 + $0xa4] ss:$16 sps:$4 sm:$0xff]  }
 0x320   :  { %2862 = vmatpush1.bf16.msra.mxu1 %v6089_v27  ;;  %v6163_v27 = vld [vmem:[#allocation8 + $0x314] ss:$24 sps:$4 sm:$0xff]  }
 0x321   :  { %2991 = vmatpush1.bf16.msra.mxu0 %v6092_v28  ;;  %2863 = vmatprep.subr.bf16.mxu1 %v6097_v29  ;;  %v6161_v28 = vld [vmem:[#allocation8 + $0x310] ss:$24 sps:$4 sm:$0xff]  }
 0x322   :  { %2992 = vmatprep.subr.bf16.mxu0 %v6100_v31  ;;  %v6275_v29 = vld [vmem:[#allocation11 + $0xc0] ss:$16 sps:$4 sm:$0xff]   ;;  %v6277_v31 = vld [vmem:[#allocation11 + $0xc4] ss:$16 sps:$4 sm:$0xff]  }
 0x324   :  { %2864 = vmatpush1.bf16.msra.mxu1 %v6095_v32  ;;  %v6166_v32 = vld [vmem:[#allocation8 + $0x344] ss:$24 sps:$4 sm:$0xff]  }
 0x325   :  { %2993 = vmatpush1.bf16.msra.mxu0 %v6098_v33  ;;  %2865 = vmatprep.subr.bf16.mxu1 %v6103_v34  ;;  %v6164_v33 = vld [vmem:[#allocation8 + $0x340] ss:$24 sps:$4 sm:$0xff]  }
 0x326   :  { %2994 = vmatprep.subr.bf16.mxu0 %v6106_v35  ;;  %v6281_v34 = vld [vmem:[#allocation11 + $0xe0] ss:$16 sps:$4 sm:$0xff]   ;;  %v6283_v35 = vld [vmem:[#allocation11 + $0xe4] ss:$16 sps:$4 sm:$0xff]  }
 0x328   :  { %2866 = vmatpush1.bf16.msra.mxu1 %v6101_v36  ;;  %v6169_v36 = vld [vmem:[#allocation8 + $0x374] ss:$24 sps:$4 sm:$0xff]  }
 0x329   :  { %2995 = vmatpush1.bf16.msra.mxu0 %v6104_v40  ;;  %2867 = vmatprep.subr.bf16.mxu1 %v6109_v39  ;;  %v6167_v40 = vld [vmem:[#allocation8 + $0x370] ss:$24 sps:$4 sm:$0xff]  }
 0x32a   :  { %2996 = vmatprep.subr.bf16.mxu0 %v6112_v41  ;;  %v6287_v39 = vld [vmem:[#allocation11 + $0x100] ss:$16 sps:$4 sm:$0xff]   ;;  %v6289_v41 = vld [vmem:[#allocation11 + $0x104] ss:$16 sps:$4 sm:$0xff]  }
 0x32c   :  { %2868 = vmatpush1.bf16.msra.mxu1 %v6107_v42  ;;  %v6172_v42 = vld [vmem:[#allocation8 + $0x3a4] ss:$24 sps:$4 sm:$0xff]  }
 0x32d   :  { %2997 = vmatpush1.bf16.msra.mxu0 %v6110_v2  ;;  %3009 = vmatprep.subr.bf16.mxu1 %v6115_v4  ;;  %v6293_v2 = vld [vmem:[#allocation11 + $0x120] ss:$16 sps:$4 sm:$0xff]   ;;  %v6295_v4 = vld [vmem:[#allocation11 + $0x124] ss:$16 sps:$4 sm:$0xff]  }
 0x32e   :  { %4330 = vmatprep.subr.bf16.mxu0 %v6241_v9  ;;  %v6193_v9 = vld [vmem:[#allocation8 + $0x4f4] ss:$24 sps:$4 sm:$0xff]  }
 0x32f   :  { %2870 = vmatmul.mubr.bf16.vlgmr.msra.gmra.mrb[0].mxu1 %v7304_v37 }
 0x330   :  { %2999 = vmatmul.mubr.bf16.vlgmr.msra.gmra.mrb[12].mxu0 %v7304_v37  ;;  %3010 = vmatpush1.bf16.msra.mxu1 %v6113_v43  ;;  %v6173_v43 = vld [vmem:[#allocation8 + $0x3d0] ss:$24 sps:$4 sm:$0xff]  }
 0x331   :  { %3041 = vmatprep.mubr.bf16.mxu1 %v7284_v16  ;;  %3011 = vmatprep.subr.bf16.mxu1 %v6118_v44  ;;  %v6131_v16 = vld [vmem:[#allocation8 + $0x130] ss:$24 sps:$4 sm:$0xff]  }
 0x332   :  { %4331 = vmatpush1.bf16.msra.mxu0 %v6239_v8  ;;  %v6299_v44 = vld [vmem:[#allocation11 + $0x140] ss:$16 sps:$4 sm:$0xff]   ;;  %v6331_v8 = vld [vmem:[#allocation11 + $0x1e4] ss:$16 sps:$4 sm:$0xff]  }
 0x333   :  { %4332 = vmatprep.subr.bf16.mxu0 %v6247_v5  ;;  %v6337_v5 = vld [vmem:[#allocation11 + $0x204] ss:$16 sps:$4 sm:$0xff]  }
 0x334   :  { %3012 = vmatpush1.bf16.msra.mxu1 %v6116_v45  ;;  %v6301_v45 = vld [vmem:[#allocation11 + $0x144] ss:$16 sps:$4 sm:$0xff]  }
 0x335   :  { %3013 = vmatprep.subr.bf16.mxu1 %v6121_v46  ;;  %v6178_v46 = vld [vmem:[#allocation8 + $0x404] ss:$24 sps:$4 sm:$0xff]  }
 0x336   :  { %4333 = vmatpush1.bf16.msra.mxu0 %v6245_v11  ;;  %v6196_v11 = vld [vmem:[#allocation8 + $0x524] ss:$24 sps:$4 sm:$0xff]  }
 0x337   :  { %4334 = vmatprep.subr.bf16.mxu0 %v6253_v12  ;;  %v6202_v12 = vld [vmem:[#allocation8 + $0x584] ss:$24 sps:$4 sm:$0xff]  }
 0x338   :  { %3014 = vmatpush1.bf16.msra.mxu1 %v6119_v47  ;;  %v6176_v47 = vld [vmem:[#allocation8 + $0x400] ss:$24 sps:$4 sm:$0xff]  }
 0x339   :  { %3015 = vmatprep.subr.bf16.mxu1 %v6124_v48  ;;  %v6305_v48 = vld [vmem:[#allocation11 + $0x160] ss:$16 sps:$4 sm:$0xff]  }
 0x33a   :  { %4335 = vmatpush1.bf16.msra.mxu0 %v6251_v63  ;;  %v6197_v63 = vld [vmem:[#allocation8 + $0x550] ss:$24 sps:$4 sm:$0xff]  }
 0x33b   :  { %4336 = vmatprep.subr.bf16.mxu0 %v6259_v19  ;;  %v6208_v19 = vld [vmem:[#allocation8 + $0x5e4] ss:$24 sps:$4 sm:$0xff]  }
 0x33c   :  { %3016 = vmatpush1.bf16.msra.mxu1 %v6122_v49  ;;  %v6307_v49 = vld [vmem:[#allocation11 + $0x164] ss:$16 sps:$4 sm:$0xff]  }
 0x33d   :  { %3017 = vmatprep.subr.bf16.mxu1 %v6127_v50  ;;  %v6181_v50 = vld [vmem:[#allocation8 + $0x434] ss:$24 sps:$4 sm:$0xff]  }
 0x33e   :  { %4337 = vmatpush1.bf16.msra.mxu0 %v6257_v7  ;;  %v6203_v7 = vld [vmem:[#allocation8 + $0x5b0] ss:$24 sps:$4 sm:$0xff]  }
 0x33f   :  { %4338 = vmatprep.subr.bf16.mxu0 %v6265_v20  ;;  %v6214_v20 = vld [vmem:[#allocation8 + $0x644] ss:$24 sps:$4 sm:$0xff]  }
 0x340   :  { %3018 = vmatpush1.bf16.msra.mxu1 %v6125_v51  ;;  %v6179_v51 = vld [vmem:[#allocation8 + $0x430] ss:$24 sps:$4 sm:$0xff]  }
 0x341   :  { %3019 = vmatprep.subr.bf16.mxu1 %v6130_v52  ;;  %v6184_v52 = vld [vmem:[#allocation8 + $0x464] ss:$24 sps:$4 sm:$0xff]  }
 0x342   :  { %4339 = vmatpush1.bf16.msra.mxu0 %v6263_v18  ;;  %v6209_v18 = vld [vmem:[#allocation8 + $0x610] ss:$24 sps:$4 sm:$0xff]  }
 0x343   :  { %4340 = vmatprep.subr.bf16.mxu0 %v6271_v26  ;;  %v6220_v26 = vld [vmem:[#allocation8 + $0x6a4] ss:$24 sps:$4 sm:$0xff]  }
 0x344   :  { %3020 = vmatpush1.bf16.msra.mxu1 %v6128_v53  ;;  %v6313_v53 = vld [vmem:[#allocation11 + $0x184] ss:$16 sps:$4 sm:$0xff]  }
 0x345   :  { %3021 = vmatprep.subr.bf16.mxu1 %v6133_v56  ;;  %v6182_v56 = vld [vmem:[#allocation8 + $0x460] ss:$24 sps:$4 sm:$0xff]  }
 0x346   :  { %4341 = vmatpush1.bf16.msra.mxu0 %v6269_v24  ;;  %v6215_v24 = vld [vmem:[#allocation8 + $0x670] ss:$24 sps:$4 sm:$0xff]  }
 0x347   :  { %4342 = vmatprep.subr.bf16.mxu0 %v6277_v31  ;;  %v6226_v31 = vld [vmem:[#allocation8 + $0x704] ss:$24 sps:$4 sm:$0xff]  }
 0x348   :  { %3022 = vmatpush1.bf16.msra.mxu1 %v6131_v16  ;;  %v6311_v16 = vld [vmem:[#allocation11 + $0x180] ss:$16 sps:$4 sm:$0xff]  }
 0x349   :  { %3023 = vmatprep.subr.bf16.mxu1 %v6136_v25  ;;  %v6187_v25 = vld [vmem:[#allocation8 + $0x494] ss:$24 sps:$4 sm:$0xff]  }
 0x34a   :  { %4343 = vmatpush1.bf16.msra.mxu0 %v6275_v29  ;;  %v6221_v29 = vld [vmem:[#allocation8 + $0x6d0] ss:$24 sps:$4 sm:$0xff]  }
 0x34b   :  { %4344 = vmatprep.subr.bf16.mxu0 %v6283_v35  ;;  %v6235_v35 = vld [vmem:[#allocation8 + $0x794] ss:$24 sps:$4 sm:$0xff]  }
 0x34c   :  { %3024 = vmatpush1.bf16.msra.mxu1 %v6134_v57  ;;  %v6319_v57 = vld [vmem:[#allocation11 + $0x1a4] ss:$16 sps:$4 sm:$0xff]  }
 0x34d   :  { %3025 = vmatprep.subr.bf16.mxu1 %v6139_v58  ;;  %v6185_v58 = vld [vmem:[#allocation8 + $0x490] ss:$24 sps:$4 sm:$0xff]  }
 0x34e   :  { %4345 = vmatpush1.bf16.msra.mxu0 %v6281_v34  ;;  %v6230_v34 = vld [vmem:[#allocation8 + $0x760] ss:$24 sps:$4 sm:$0xff]  }
 0x34f   :  { %4346 = vmatprep.subr.bf16.mxu0 %v6289_v41  ;;  %v6244_v41 = vld [vmem:[#allocation8 + $0x7f4] ss:$24 sps:$4 sm:$0xff]  }
 0x350   :  { %3026 = vmatpush1.bf16.msra.mxu1 %v6137_v30  ;;  %v6317_v30 = vld [vmem:[#allocation11 + $0x1a0] ss:$16 sps:$4 sm:$0xff]  }
 0x351   :  { %3027 = vmatprep.subr.bf16.mxu1 %v6142_v59  ;;  %v6190_v59 = vld [vmem:[#allocation8 + $0x4c4] ss:$24 sps:$4 sm:$0xff]  }
 0x352   :  { %4347 = vmatpush1.bf16.msra.mxu0 %v6287_v39  ;;  %v6236_v39 = vld [vmem:[#allocation8 + $0x7c0] ss:$24 sps:$4 sm:$0xff]  }
 0x353   :  { %4348 = vmatprep.subr.bf16.mxu0 %v6295_v4  ;;  %v6256_v4 = vld [vmem:[#allocation8 + $0x854] ss:$24 sps:$4 sm:$0xff]  }
 0x354   :  { %3028 = vmatpush1.bf16.msra.mxu1 %v6140_v60  ;;  %v6325_v60 = vld [vmem:[#allocation11 + $0x1c4] ss:$16 sps:$4 sm:$0xff]  }
 0x355   :  { %3029 = vmatprep.subr.bf16.mxu1 %v6145_v62  ;;  %v6323_v62 = vld [vmem:[#allocation11 + $0x1c0] ss:$16 sps:$4 sm:$0xff]  }
 0x356   :  { %4349 = vmatpush1.bf16.msra.mxu0 %v6293_v2  ;;  %v6248_v2 = vld [vmem:[#allocation8 + $0x820] ss:$24 sps:$4 sm:$0xff]  }
 0x357   :  { %4350 = vmatprep.subr.bf16.mxu0 %v6301_v45  ;;  %v6268_v45 = vld [vmem:[#allocation8 + $0x8b4] ss:$24 sps:$4 sm:$0xff]  }
 0x358   :  { %3030 = vmatpush1.bf16.msra.mxu1 %v6143_v0  ;;  %v6188_v0 = vld [vmem:[#allocation8 + $0x4c0] ss:$24 sps:$4 sm:$0xff]  }
 0x359   :  { %3031 = vmatprep.subr.bf16.mxu1 %v6148_v10  ;;  %v6329_v10 = vld [vmem:[#allocation11 + $0x1e0] ss:$16 sps:$4 sm:$0xff]  }
 0x35a   :  { %4351 = vmatpush1.bf16.msra.mxu0 %v6299_v44  ;;  %v6260_v44 = vld [vmem:[#allocation8 + $0x880] ss:$24 sps:$4 sm:$0xff]  }
 0x35b   :  { %4352 = vmatprep.subr.bf16.mxu0 %v6307_v49  ;;  %v6280_v49 = vld [vmem:[#allocation11 + $0xc] ss:$16 sps:$4 sm:$0xff]  }
 0x35c   :  { %3032 = vmatpush1.bf16.msra.mxu1 %v6146_v3  ;;  %v6191_v3 = vld [vmem:[#allocation8 + $0x4f0] ss:$24 sps:$4 sm:$0xff]  }
 0x35d   :  { %3033 = vmatprep.subr.bf16.mxu1 %v6151_v13  ;;  %v6194_v13 = vld [vmem:[#allocation8 + $0x520] ss:$24 sps:$4 sm:$0xff]  }
 0x35e   :  { %4353 = vmatpush1.bf16.msra.mxu0 %v6305_v48  ;;  %v6272_v48 = vld [vmem:[#allocation8 + $0x8e0] ss:$24 sps:$4 sm:$0xff]  }
 0x35f   :  { %4354 = vmatprep.subr.bf16.mxu0 %v6313_v53  ;;  %v6292_v53 = vld [vmem:[#allocation11 + $0x4c] ss:$16 sps:$4 sm:$0xff]  }
 0x360   :  { %3034 = vmatpush1.bf16.msra.mxu1 %v6149_v14  ;;  %v6199_v14 = vld [vmem:[#allocation8 + $0x554] ss:$24 sps:$4 sm:$0xff]  }
 0x361   :  { %3035 = vmatprep.subr.bf16.mxu1 %v6154_v17  ;;  %v6200_v17 = vld [vmem:[#allocation8 + $0x580] ss:$24 sps:$4 sm:$0xff]  }
 0x362   :  { %4355 = vmatpush1.bf16.msra.mxu0 %v6311_v16  ;;  %v6298_v16 = vld [vmem:[#allocation11 + $0x6c] ss:$16 sps:$4 sm:$0xff]  }
 0x363   :  { %4356 = vmatprep.subr.bf16.mxu0 %v6319_v57  ;;  %v6296_v57 = vld [vmem:[#allocation11 + $0x68] ss:$16 sps:$4 sm:$0xff]  }
 0x364   :  { %3036 = vmatpush1.bf16.msra.mxu1 %v6152_v6  ;;  %v6205_v6 = vld [vmem:[#allocation8 + $0x5b4] ss:$24 sps:$4 sm:$0xff]  }
 0x365   :  { %3037 = vmatprep.subr.bf16.mxu1 %v6157_v1  ;;  %v6206_v1 = vld [vmem:[#allocation8 + $0x5e0] ss:$24 sps:$4 sm:$0xff]  }
 0x366   :  { %4357 = vmatpush1.bf16.msra.mxu0 %v6317_v30 }
 0x367   :  { %4358 = vmatprep.subr.bf16.mxu0 %v6325_v60 }
 0x368   :  { %3038 = vmatpush1.bf16.msra.mxu1 %v6155_v61  ;;  %v6211_v61 = vld [vmem:[#allocation8 + $0x614] ss:$24 sps:$4 sm:$0xff]  }
 0x369   :  { %3039 = vmatprep.subr.bf16.mxu1 %v6160_v23  ;;  %v6212_v23 = vld [vmem:[#allocation8 + $0x640] ss:$24 sps:$4 sm:$0xff]  }
 0x36a   :  { %4359 = vmatpush1.bf16.msra.mxu0 %v6323_v62 }
 0x36b   :  { %4360 = vmatprep.subr.bf16.mxu0 %v6331_v8  ;;  %v6310_v8 = vld [vmem:[#allocation11 + $0xac] ss:$16 sps:$4 sm:$0xff]  }
 0x36c   :  { %3040 = vmatpush1.bf16.msra.mxu1 %v6158_v21  ;;  %v6217_v21 = vld [vmem:[#allocation8 + $0x674] ss:$24 sps:$4 sm:$0xff]  }
 0x36d   :  { %3052 = vmatprep.subr.bf16.mxu1 %v6163_v27  ;;  %v6218_v27 = vld [vmem:[#allocation8 + $0x6a0] ss:$24 sps:$4 sm:$0xff]  }
 0x36e   :  { %4361 = vmatpush1.bf16.msra.mxu0 %v6329_v10 }
 0x36f   :  { %3042 = vmatmul.mubr.bf16.vlgmr.msra.gmra.mrb[4].mxu1 %v7282_v15  ;;  %v6170_v15 = vld [vmem:[#allocation8 + $0x3a0] ss:$24 sps:$4 sm:$0xff]   ;;  %4373 = vmatprep.subr.bf16.mxu0 %v6337_v5 }
 0x370   :  { %3053 = vmatpush1.bf16.msra.mxu1 %v6161_v28  ;;  %3084 = vmatprep.mubr.bf16.mxu1 %v7296_v55  ;;  %v6175_v55 = vld [vmem:[#allocation8 + $0x3d4] ss:$24 sps:$4 sm:$0xff]  }
 0x371   :  { %3054 = vmatprep.subr.bf16.mxu1 %v6166_v32  ;;  %v6223_v28 = vld [vmem:[#allocation8 + $0x6d4] ss:$24 sps:$4 sm:$0xff]  }
 0x372   :  { %v6229_v32 = vld [vmem:[#allocation8 + $0x734] ss:$24 sps:$4 sm:$0xff]  }
 0x373   :  { %v6316_v5 = vld [vmem:[#allocation11 + $0xcc] ss:$16 sps:$4 sm:$0xff]  }
 0x374   :  { %3055 = vmatpush1.bf16.msra.mxu1 %v6164_v33  ;;  %v6232_v33 = vld [vmem:[#allocation8 + $0x764] ss:$24 sps:$4 sm:$0xff]  }
 0x375   :  { %3056 = vmatprep.subr.bf16.mxu1 %v6169_v36  ;;  %v6233_v36 = vld [vmem:[#allocation8 + $0x790] ss:$24 sps:$4 sm:$0xff]  }
 0x378   :  { %3057 = vmatpush1.bf16.msra.mxu1 %v6167_v40  ;;  %v6238_v40 = vld [vmem:[#allocation8 + $0x7c4] ss:$24 sps:$4 sm:$0xff]  }
 0x379   :  { %3058 = vmatprep.subr.bf16.mxu1 %v6172_v42  ;;  %v6242_v42 = vld [vmem:[#allocation8 + $0x7f0] ss:$24 sps:$4 sm:$0xff]  }
 0x37c   :  { %3059 = vmatpush1.bf16.msra.mxu1 %v6170_v15  ;;  %v6250_v15 = vld [vmem:[#allocation8 + $0x824] ss:$24 sps:$4 sm:$0xff]  }
 0x37d   :  { %3060 = vmatprep.subr.bf16.mxu1 %v6175_v55  ;;  %v6254_v55 = vld [vmem:[#allocation8 + $0x850] ss:$24 sps:$4 sm:$0xff]  }
 0x380   :  { %3061 = vmatpush1.bf16.msra.mxu1 %v6173_v43  ;;  %v6262_v43 = vld [vmem:[#allocation8 + $0x884] ss:$24 sps:$4 sm:$0xff]  }
 0x381   :  { %3062 = vmatprep.subr.bf16.mxu1 %v6178_v46  ;;  %v6266_v46 = vld [vmem:[#allocation8 + $0x8b0] ss:$24 sps:$4 sm:$0xff]  }
 0x384   :  { %3063 = vmatpush1.bf16.msra.mxu1 %v6176_v47  ;;  %v6274_v47 = vld [vmem:[#allocation8 + $0x8e4] ss:$24 sps:$4 sm:$0xff]  }
 0x385   :  { %3064 = vmatprep.subr.bf16.mxu1 %v6181_v50  ;;  %v6278_v50 = vld [vmem:[#allocation11 + $0x8] ss:$16 sps:$4 sm:$0xff]  }
 0x388   :  { %3065 = vmatpush1.bf16.msra.mxu1 %v6179_v51  ;;  %v6286_v51 = vld [vmem:[#allocation11 + $0x2c] ss:$16 sps:$4 sm:$0xff]  }
 0x389   :  { %3066 = vmatprep.subr.bf16.mxu1 %v6184_v52  ;;  %v6284_v52 = vld [vmem:[#allocation11 + $0x28] ss:$16 sps:$4 sm:$0xff]  }
 0x38c   :  { %3067 = vmatpush1.bf16.msra.mxu1 %v6182_v56  ;;  %v6290_v56 = vld [vmem:[#allocation11 + $0x48] ss:$16 sps:$4 sm:$0xff]  }
 0x38d   :  { %3068 = vmatprep.subr.bf16.mxu1 %v6187_v25  ;;  %v7321_v25 = vshrl.u32 %v156_v22, 7 }
 0x38f   :  { %v1283_v30 = vsub.s32 0, %v7321_v25  ;;  %v1291_v60 = vsub.s32 2, %v7321_v25  ;;  %v1287_v62 = vsub.s32 1, %v7321_v25 }
 0x390   :  { %3069 = vmatpush1.bf16.msra.mxu1 %v6185_v58  ;;  %v6304_v58 = vld [vmem:[#allocation11 + $0x8c] ss:$16 sps:$4 sm:$0xff]  }
 0x391   :  { %3070 = vmatprep.subr.bf16.mxu1 %v6190_v59  ;;  %v6302_v59 = vld [vmem:[#allocation11 + $0x88] ss:$16 sps:$4 sm:$0xff]  }
 0x394   :  { %3071 = vmatpush1.bf16.msra.mxu1 %v6188_v0  ;;  %v1295_v0 = vsub.s32 3, %v7321_v25 }
 0x395   :  { %3072 = vmatprep.subr.bf16.mxu1 %v6193_v9 }
 0x398   :  { %3073 = vmatpush1.bf16.msra.mxu1 %v6191_v3  ;;  %v6308_v3 = vld [vmem:[#allocation11 + $0xa8] ss:$16 sps:$4 sm:$0xff]  }
 0x399   :  { %3074 = vmatprep.subr.bf16.mxu1 %v6196_v11 }
 0x39c   :  { %3075 = vmatpush1.bf16.msra.mxu1 %v6194_v13 }
 0x39d   :  { %3076 = vmatprep.subr.bf16.mxu1 %v6199_v14 }
 0x3a0   :  { %3077 = vmatpush1.bf16.msra.mxu1 %v6197_v63 }
 0x3a1   :  { %3078 = vmatprep.subr.bf16.mxu1 %v6202_v12 }
 0x3a4   :  { %3079 = vmatpush1.bf16.msra.mxu1 %v6200_v17 }
 0x3a5   :  { %3080 = vmatprep.subr.bf16.mxu1 %v6205_v6 }
 0x3a8   :  { %3081 = vmatpush1.bf16.msra.mxu1 %v6203_v7 }
 0x3a9   :  { %3082 = vmatprep.subr.bf16.mxu1 %v6208_v19 }
 0x3ac   :  { %3083 = vmatpush1.bf16.msra.mxu1 %v6206_v1  ;;  %v6314_v1 = vld [vmem:[#allocation11 + $0xc8] ss:$16 sps:$4 sm:$0xff]  }
 0x3ad   :  { %3095 = vmatprep.subr.bf16.mxu1 %v6211_v61 }
 0x3af   :  { %3085 = vmatmul.mubr.bf16.vlgmr.msra.gmra.mrb[4].mxu1 %v7294_v54  ;;  %v6224_v54 = vld [vmem:[#allocation8 + $0x700] ss:$24 sps:$4 sm:$0xff]  }
 0x3b0   :  { %3096 = vmatpush1.bf16.msra.mxu1 %v6209_v18  ;;  %3127 = vmatprep.mubr.bf16.mxu1 %v7306_v38  ;;  %v6227_v38 = vld [vmem:[#allocation8 + $0x730] ss:$24 sps:$4 sm:$0xff]  }
 0x3b1   :  { %3097 = vmatprep.subr.bf16.mxu1 %v6214_v20 }
 0x3b4   :  { %3098 = vmatpush1.bf16.msra.mxu1 %v6212_v23 }
 0x3b5   :  { %3099 = vmatprep.subr.bf16.mxu1 %v6217_v21  ;;  %v6322_v21 = vld [vmem:[#allocation11 + $0xec] ss:$16 sps:$4 sm:$0xff]  }
 0x3b8   :  { %3100 = vmatpush1.bf16.msra.mxu1 %v6215_v24 }
 0x3b9   :  { %3101 = vmatprep.subr.bf16.mxu1 %v6220_v26 }
 0x3bc   :  { %3102 = vmatpush1.bf16.msra.mxu1 %v6218_v27 }
 0x3bd   :  { %3103 = vmatprep.subr.bf16.mxu1 %v6223_v28 }
 0x3c0   :  { %3104 = vmatpush1.bf16.msra.mxu1 %v6221_v29  ;;  %v6320_v29 = vld [vmem:[#allocation11 + $0xe8] ss:$16 sps:$4 sm:$0xff]  }
 0x3c1   :  { %3105 = vmatprep.subr.bf16.mxu1 %v6226_v31  ;;  %v6328_v31 = vld [vmem:[#allocation11 + $0x10c] ss:$16 sps:$4 sm:$0xff]  }
 0x3c4   :  { %3106 = vmatpush1.bf16.msra.mxu1 %v6224_v54  ;;  %v6326_v54 = vld [vmem:[#allocation11 + $0x108] ss:$16 sps:$4 sm:$0xff]  }
 0x3c5   :  { %3107 = vmatprep.subr.bf16.mxu1 %v6229_v32  ;;  %v6334_v32 = vld [vmem:[#allocation11 + $0x12c] ss:$16 sps:$4 sm:$0xff]  }
 0x3c8   :  { %3108 = vmatpush1.bf16.msra.mxu1 %v6227_v38 }
 0x3c9   :  { %3109 = vmatprep.subr.bf16.mxu1 %v6232_v33 }
 0x3cc   :  { %3110 = vmatpush1.bf16.msra.mxu1 %v6230_v34  ;;  %v6332_v34 = vld [vmem:[#allocation11 + $0x128] ss:$16 sps:$4 sm:$0xff]  }
 0x3cd   :  { %3111 = vmatprep.subr.bf16.mxu1 %v6235_v35 }
 0x3d0   :  { %3112 = vmatpush1.bf16.msra.mxu1 %v6233_v36  ;;  %v6340_v36 = vld [vmem:[#allocation11 + $0x14c] ss:$16 sps:$4 sm:$0xff]  }
 0x3d1   :  { %3113 = vmatprep.subr.bf16.mxu1 %v6238_v40 }
 0x3d4   :  { %3114 = vmatpush1.bf16.msra.mxu1 %v6236_v39 }
 0x3d5   :  { %3115 = vmatprep.subr.bf16.mxu1 %v6244_v41 }
 0x3d8   :  { %3116 = vmatpush1.bf16.msra.mxu1 %v6242_v42 }
 0x3d9   :  { %3117 = vmatprep.subr.bf16.mxu1 %v6250_v15 }
 0x3dc   :  { %3118 = vmatpush1.bf16.msra.mxu1 %v6248_v2  ;;  %v6338_v2 = vld [vmem:[#allocation11 + $0x148] ss:$16 sps:$4 sm:$0xff]  }
 0x3dd   :  { %3119 = vmatprep.subr.bf16.mxu1 %v6256_v4 }
 0x3e0   :  { %3120 = vmatpush1.bf16.msra.mxu1 %v6254_v55 }
 0x3e1   :  { %3121 = vmatprep.subr.bf16.mxu1 %v6262_v43 }
 0x3e4   :  { %3122 = vmatpush1.bf16.msra.mxu1 %v6260_v44  ;;  %v6335_v44 = vld [vmem:[#allocation11 + $0x200] ss:$16 sps:$4 sm:$0xff]  }
 0x3e5   :  { %3123 = vmatprep.subr.bf16.mxu1 %v6268_v45 }
 0x3e8   :  { %3124 = vmatpush1.bf16.msra.mxu1 %v6266_v46  ;;  %v6343_v46 = vld [vmem:[#allocation11 + $0x224] ss:$16 sps:$4 sm:$0xff]  }
 0x3e9   :  { %3125 = vmatprep.subr.bf16.mxu1 %v6274_v47  ;;  %v6346_v47 = vld [vmem:[#allocation11 + $0x16c] ss:$16 sps:$4 sm:$0xff]  }
 0x3ec   :  { %3126 = vmatpush1.bf16.msra.mxu1 %v6272_v48  ;;  %v6344_v48 = vld [vmem:[#allocation11 + $0x168] ss:$16 sps:$4 sm:$0xff]  }
 0x3ed   :  { %4459 = vmatprep.subr.bf16.mxu1 %v6280_v49  ;;  %v6341_v49 = vld [vmem:[#allocation11 + $0x220] ss:$16 sps:$4 sm:$0xff]  }
 0x3ef   :  { %3128 = vmatmul.mubr.bf16.vlgmr.msra.gmra.mrb[4].mxu1 %v7304_v37  ;;  %v7324_v37 = vld [vmem:[#allocation10] sm:$0x3f] }
 0x3f0   :  { %4460 = vmatpush1.bf16.msra.mxu1 %v6278_v50  ;;  %v1284_v22 = vrot.slane %v7324_v37, %v1283_v30  ;;  %v1292_v9 = vrot.slane %v7324_v37, %v1291_v60  ;;  %v1288_v10 = vrot.slane %v7324_v37, %v1287_v62  ;;  %v1296_v11 = vrot.slane %v7324_v37, %v1295_v0  ;;  %v6352_v50 = vld [vmem:[#allocation11 + $0x18c] ss:$16 sps:$4 sm:$0xff]  }
 0x3f1   :  { %4461 = vmatprep.subr.bf16.mxu1 %v6286_v51  ;;  %v6349_v51 = vld [vmem:[#allocation11 + $0x244] ss:$16 sps:$4 sm:$0xff]  }
 0x3f4   :  { %4462 = vmatpush1.bf16.msra.mxu1 %v6284_v52  ;;  %v6350_v52 = vld [vmem:[#allocation11 + $0x188] ss:$16 sps:$4 sm:$0xff]  }
 0x3f5   :  { %4463 = vmatprep.subr.bf16.mxu1 %v6292_v53  ;;  %v6347_v53 = vld [vmem:[#allocation11 + $0x240] ss:$16 sps:$4 sm:$0xff]  }
 0x3f8   :  { %4464 = vmatpush1.bf16.msra.mxu1 %v6290_v56  ;;  %v6358_v56 = vld [vmem:[#allocation11 + $0x1ac] ss:$16 sps:$4 sm:$0xff]  }
 0x3f9   :  { %4465 = vmatprep.subr.bf16.mxu1 %v6298_v16  ;;  %v6355_v16 = vld [vmem:[#allocation11 + $0x264] ss:$16 sps:$4 sm:$0xff]  }
 0x3fc   :  { %4466 = vmatpush1.bf16.msra.mxu1 %v6296_v57  ;;  %v6356_v57 = vld [vmem:[#allocation11 + $0x1a8] ss:$16 sps:$4 sm:$0xff]  }
 0x3fd   :  { %4467 = vmatprep.subr.bf16.mxu1 %v6304_v58  ;;  %v6353_v58 = vld [vmem:[#allocation11 + $0x260] ss:$16 sps:$4 sm:$0xff]  }
 0x400   :  { %4468 = vmatpush1.bf16.msra.mxu1 %v6302_v59  ;;  %v6364_v59 = vld [vmem:[#allocation11 + $0x1cc] ss:$16 sps:$4 sm:$0xff]  }
 0x401   :  { %4469 = vmatprep.subr.bf16.mxu1 %v6310_v8  ;;  %v6361_v8 = vld [vmem:[#allocation11 + $0x284] ss:$16 sps:$4 sm:$0xff]  }
 0x402   :  { %v2871_v13 = vpop.f32.mrb[0].mxu1 }
 0x403   :  { %v5625_v14 = vadd.f32 %v2871_v13, %v1284_v22  ;;  %v3000_v63 = vpop.f32.mrb[12].mxu0  ;;  %v2873_v12 = vpop.f32.mrb[1].mxu1  ;;  %v6376_v13 = vld [vmem:[#allocation11 + $0x20c] ss:$16 sps:$4 sm:$0xff]  }
 0x404   :  { %v5629_v17 = vadd.f32 %v3000_v63, %v1292_v9  ;;  %v5626_v6 = vadd.f32 %v2873_v12, %v1288_v10  ;;  %v3002_v7 = vpop.f32.mrb[13].mxu0  ;;  %v2875_v19 = vpop.f32.mrb[2].mxu1  ;;  %4470 = vmatpush1.bf16.msra.mxu1 %v6308_v3  ;;  %v6367_v3 = vld [vmem:[#allocation11 + $0x2a4] ss:$16 sps:$4 sm:$0xff]   ;;  %v6374_v63 = vld [vmem:[#allocation11 + $0x208] ss:$16 sps:$4 sm:$0xff]  }
 0x405   :  { %6581 = vtanh.f32 %v5625_v14  ;;  %v5630_v61 = vadd.f32 %v3002_v7, %v1296_v11  ;;  %v5627_v18 = vadd.f32 %v2875_v19, %v1284_v22  ;;  %v3004_v20 = vpop.f32.mrb[14].mxu0  ;;  %v2877_v23 = vpop.f32.mrb[3].mxu1  ;;  %4471 = vmatprep.subr.bf16.mxu1 %v6316_v5  ;;  %v6362_v22 = vld [vmem:[#allocation11 + $0x1c8] ss:$16 sps:$4 sm:$0xff]   ;;  %v6365_v5 = vld [vmem:[#allocation11 + $0x2a0] ss:$16 sps:$4 sm:$0xff]  }
 0x406   :  { %6583 = vtanh.f32 %v5629_v17  ;;  %v5631_v24 = vadd.f32 %v3004_v20, %v1292_v9  ;;  %v3006_v26 = vpop.f32.mrb[15].mxu0  ;;  %v5628_v27 = vadd.f32 %v2877_v23, %v1288_v10  ;;  %v6359_v9 = vld [vmem:[#allocation11 + $0x280] ss:$16 sps:$4 sm:$0xff]   ;;  %v6370_v10 = vld [vmem:[#allocation11 + $0x1ec] ss:$16 sps:$4 sm:$0xff]  }
 0x407   :  { %6585 = vtanh.f32 %v5626_v6  ;;  %v5632_v28 = vadd.f32 %v3006_v26, %v1296_v11  ;;  %v6368_v11 = vld [vmem:[#allocation11 + $0x1e8] ss:$16 sps:$4 sm:$0xff]   ;;  %v6373_v14 = vld [vmem:[#allocation11 + $0x2c4] ss:$16 sps:$4 sm:$0xff]   ;;  %v6371_v12 = vld [vmem:[#allocation11 + $0x2c0] ss:$16 sps:$4 sm:$0xff]  }
 0x408   :  { %6587 = vtanh.f32 %v5630_v61  ;;  %4472 = vmatpush1.bf16.msra.mxu1 %v6314_v1  ;;  %v6382_v17 = vld [vmem:[#allocation11 + $0x22c] ss:$16 sps:$4 sm:$0xff]   ;;  %v6379_v6 = vld [vmem:[#allocation11 + $0x2e4] ss:$16 sps:$4 sm:$0xff]   ;;  %v6380_v7 = vld [vmem:[#allocation11 + $0x228] ss:$16 sps:$4 sm:$0xff]  }
 0x409   :  { %6589 = vtanh.f32 %v5627_v18  ;;  %4473 = vmatprep.subr.bf16.mxu1 %v6322_v21  ;;  %v6377_v19 = vld [vmem:[#allocation11 + $0x2e0] ss:$16 sps:$4 sm:$0xff]   ;;  %v6388_v1 = vld [vmem:[#allocation11 + $0x24c] ss:$16 sps:$4 sm:$0xff]   ;;  %v6385_v61 = vld [vmem:[#allocation11 + $0x304] ss:$16 sps:$4 sm:$0xff]  }
 0x40a   :  { %6591 = vtanh.f32 %v5631_v24  ;;  %v6386_v18 = vld [vmem:[#allocation11 + $0x248] ss:$16 sps:$4 sm:$0xff]   ;;  %v6383_v20 = vld [vmem:[#allocation11 + $0x300] ss:$16 sps:$4 sm:$0xff]   ;;  %v6394_v23 = vld [vmem:[#allocation11 + $0x26c] ss:$16 sps:$4 sm:$0xff]  }
 0x40b   :  { %6593 = vtanh.f32 %v5628_v27  ;;  %v6391_v21 = vld [vmem:[#allocation11 + $0x324] ss:$16 sps:$4 sm:$0xff]   ;;  %v6392_v24 = vld [vmem:[#allocation11 + $0x268] ss:$16 sps:$4 sm:$0xff]   ;;  %v6389_v26 = vld [vmem:[#allocation11 + $0x320] ss:$16 sps:$4 sm:$0xff]  }
 0x40c   :  { %6595 = vtanh.f32 %v5632_v28  ;;  %4474 = vmatpush1.bf16.msra.mxu1 %v6320_v29  ;;  %v6400_v27 = vld [vmem:[#allocation11 + $0x28c] ss:$16 sps:$4 sm:$0xff]   ;;  %v6397_v28 = vld [vmem:[#allocation11 + $0x344] ss:$16 sps:$4 sm:$0xff]   ;;  %v6398_v29 = vld [vmem:[#allocation11 + $0x288] ss:$16 sps:$4 sm:$0xff]  }
 0x40d   :  { %4475 = vmatprep.subr.bf16.mxu1 %v6328_v31  ;;  %v6395_v31 = vld [vmem:[#allocation11 + $0x340] ss:$16 sps:$4 sm:$0xff]  }
 0x40f   :  { %v6582_v38 = vpop.eup %6581 }
 0x410   :  { %v6584_v33 = vpop.eup %6583  ;;  %4476 = vmatpush1.bf16.msra.mxu1 %v6326_v54  ;;  %v6406_v54 = vld [vmem:[#allocation11 + $0x2ac] ss:$16 sps:$4 sm:$0xff]  }
 0x411   :  { %v6586_v35 = vpop.eup %6585  ;;  %4477 = vmatprep.subr.bf16.mxu1 %v6334_v32  ;;  %v6403_v32 = vld [vmem:[#allocation11 + $0x364] ss:$16 sps:$4 sm:$0xff]  }
 0x412   :  { %v6588_v40 = vpop.eup %6587 }
 0x413   :  { %v6590_v39 = vpop.eup %6589 }
 0x414   :  { %v6592_v41 = vpop.eup %6591  ;;  %4478 = vmatpush1.bf16.msra.mxu1 %v6332_v34  ;;  %v3150_v42 = vpack.c.bf16 %v6590_v39, %v6582_v38  ;;  %v6404_v38 = vld [vmem:[#allocation11 + $0x2a8] ss:$16 sps:$4 sm:$0xff]   ;;  %v6412_v34 = vld [vmem:[#allocation11 + $0x2cc] ss:$16 sps:$4 sm:$0xff]  }
 0x415   :  { %v6594_v15 = vpop.eup %6593  ;;  %4479 = vmatprep.subr.bf16.mxu1 %v6340_v36  ;;  %v7341_v4 = vpack.c.bf16 %v6592_v41, %v6584_v33  ;;  %v6401_v33 = vld [vmem:[#allocation11 + $0x360] ss:$16 sps:$4 sm:$0xff]   ;;  %v6410_v36 = vld [vmem:[#allocation11 + $0x2c8] ss:$16 sps:$4 sm:$0xff]   ;;  %v6418_v39 = vld [vmem:[#allocation11 + $0x2ec] ss:$16 sps:$4 sm:$0xff]  }
 0x416   :  { %v6596_v55 = vpop.eup %6595  ;;  %v3151_v43 = vpack.c.bf16 %v6594_v15, %v6586_v35  ;;  %v6409_v35 = vld [vmem:[#allocation11 + $0x384] ss:$16 sps:$4 sm:$0xff]   ;;  %v6413_v15 = vld [vmem:[#allocation11 + $0x3a0] ss:$16 sps:$4 sm:$0xff]  }
 0x417   :  { %v3153_v45 = vpack.c.bf16 %v6596_v55, %v6588_v40  ;;  %v6407_v40 = vld [vmem:[#allocation11 + $0x380] ss:$16 sps:$4 sm:$0xff]   ;;  %v6415_v41 = vld [vmem:[#allocation11 + $0x3a4] ss:$16 sps:$4 sm:$0xff]  }
 0x418   :  { %4362 = vmatprep.mubr.bf16.mxu0 %v3151_v43  ;;  %4491 = vmatprep.mubr.bf16.mxu1 %v3151_v43  ;;  %v6421_v55 = vld [vmem:[#allocation11 + $0x3c4] ss:$16 sps:$4 sm:$0xff]   ;;  %v6422_v43 = vld [vmem:[#allocation11 + $0x308] ss:$16 sps:$4 sm:$0xff]  }
 0x419   :  { %4363 = vmatmul.mubr.bf16.vlgmr.msra.gmra.mrb[16].mxu0 %v3150_v42  ;;  %4480 = vmatpush1.bf16.msra.mxu1 %v6338_v2  ;;  %v6424_v2 = vld [vmem:[#allocation11 + $0x30c] ss:$16 sps:$4 sm:$0xff]  }
 0x41a   :  { %4374 = vmatpush1.bf16.msra.mxu0 %v6335_v44  ;;  %4405 = vmatprep.mubr.bf16.mxu0 %v3153_v45  ;;  %v6419_v44 = vld [vmem:[#allocation11 + $0x3c0] ss:$16 sps:$4 sm:$0xff]  }
 0x41b   :  { %4375 = vmatprep.subr.bf16.mxu0 %v6343_v46  ;;  %4481 = vmatprep.subr.bf16.mxu1 %v6346_v47  ;;  %v6427_v46 = vld [vmem:[#allocation11 + $0x3e4] ss:$16 sps:$4 sm:$0xff]   ;;  %v6428_v47 = vld [vmem:[#allocation11 + $0x328] ss:$16 sps:$4 sm:$0xff]  }
 0x41d   :  { %4482 = vmatpush1.bf16.msra.mxu1 %v6344_v48  ;;  %v6425_v48 = vld [vmem:[#allocation11 + $0x3e0] ss:$16 sps:$4 sm:$0xff]  }
 0x41e   :  { %4376 = vmatpush1.bf16.msra.mxu0 %v6341_v49  ;;  %4483 = vmatprep.subr.bf16.mxu1 %v6352_v50  ;;  %v6433_v49 = vld [vmem:[#allocation11 + $0x34c] ss:$16 sps:$4 sm:$0xff]   ;;  %v6451_v50 = vld [vmem:[#allocation11 + $0x404] ss:$16 sps:$4 sm:$0xff]  }
 0x41f   :  { %4377 = vmatprep.subr.bf16.mxu0 %v6349_v51  ;;  %v6431_v51 = vld [vmem:[#allocation11 + $0x348] ss:$16 sps:$4 sm:$0xff]  }
 0x421   :  { %4484 = vmatpush1.bf16.msra.mxu1 %v6350_v52  ;;  %v6436_v52 = vld [vmem:[#allocation11 + $0x36c] ss:$16 sps:$4 sm:$0xff]  }
 0x422   :  { %4378 = vmatpush1.bf16.msra.mxu0 %v6347_v53  ;;  %4485 = vmatprep.subr.bf16.mxu1 %v6358_v56  ;;  %v6449_v53 = vld [vmem:[#allocation11 + $0x400] ss:$16 sps:$4 sm:$0xff]   ;;  %v6457_v56 = vld [vmem:[#allocation11 + $0x424] ss:$16 sps:$4 sm:$0xff]  }
 0x423   :  { %4379 = vmatprep.subr.bf16.mxu0 %v6355_v16  ;;  %v6434_v16 = vld [vmem:[#allocation11 + $0x368] ss:$16 sps:$4 sm:$0xff]  }
 0x425   :  { %4486 = vmatpush1.bf16.msra.mxu1 %v6356_v57  ;;  %v6439_v57 = vld [vmem:[#allocation11 + $0x38c] ss:$16 sps:$4 sm:$0xff]  }
 0x426   :  { %4380 = vmatpush1.bf16.msra.mxu0 %v6353_v58  ;;  %4487 = vmatprep.subr.bf16.mxu1 %v6364_v59  ;;  %v6455_v58 = vld [vmem:[#allocation11 + $0x420] ss:$16 sps:$4 sm:$0xff]   ;;  %v6463_v59 = vld [vmem:[#allocation11 + $0x444] ss:$16 sps:$4 sm:$0xff]  }
 0x427   :  { %4381 = vmatprep.subr.bf16.mxu0 %v6361_v8  ;;  %v6437_v8 = vld [vmem:[#allocation11 + $0x388] ss:$16 sps:$4 sm:$0xff]  }
 0x429   :  { %4488 = vmatpush1.bf16.msra.mxu1 %v6362_v22  ;;  %v6442_v22 = vld [vmem:[#allocation11 + $0x3ac] ss:$16 sps:$4 sm:$0xff]  }
 0x42a   :  { %4382 = vmatpush1.bf16.msra.mxu0 %v6359_v9  ;;  %4489 = vmatprep.subr.bf16.mxu1 %v6370_v10  ;;  %v6461_v9 = vld [vmem:[#allocation11 + $0x440] ss:$16 sps:$4 sm:$0xff]   ;;  %v6469_v10 = vld [vmem:[#allocation11 + $0x464] ss:$16 sps:$4 sm:$0xff]  }
 0x42b   :  { %4383 = vmatprep.subr.bf16.mxu0 %v6367_v3  ;;  %v6440_v3 = vld [vmem:[#allocation11 + $0x3a8] ss:$16 sps:$4 sm:$0xff]  }
 0x42d   :  { %4490 = vmatpush1.bf16.msra.mxu1 %v6368_v11  ;;  %v6445_v11 = vld [vmem:[#allocation11 + $0x3cc] ss:$16 sps:$4 sm:$0xff]  }
 0x42e   :  { %4384 = vmatpush1.bf16.msra.mxu0 %v6365_v5  ;;  %4502 = vmatprep.subr.bf16.mxu1 %v6376_v13  ;;  %v6467_v5 = vld [vmem:[#allocation11 + $0x460] ss:$16 sps:$4 sm:$0xff]   ;;  %v6475_v13 = vld [vmem:[#allocation11 + $0x484] ss:$16 sps:$4 sm:$0xff]  }
 0x42f   :  { %4385 = vmatprep.subr.bf16.mxu0 %v6373_v14  ;;  %v6443_v14 = vld [vmem:[#allocation11 + $0x3c8] ss:$16 sps:$4 sm:$0xff]  }
 0x430   :  { %4492 = vmatmul.mubr.bf16.vlgmr.msra.gmra.mrb[8].mxu1 %v3150_v42  ;;  %v6416_v42 = vld [vmem:[#allocation11 + $0x2e8] ss:$16 sps:$4 sm:$0xff]  }
 0x431   :  { %4503 = vmatpush1.bf16.msra.mxu1 %v6374_v63  ;;  %4534 = vmatprep.mubr.bf16.mxu1 %v3153_v45  ;;  %v6430_v45 = vld [vmem:[#allocation11 + $0x32c] ss:$16 sps:$4 sm:$0xff]  }
 0x432   :  { %4386 = vmatpush1.bf16.msra.mxu0 %v6371_v12  ;;  %4504 = vmatprep.subr.bf16.mxu1 %v6382_v17  ;;  %v6448_v63 = vld [vmem:[#allocation11 + $0x3ec] ss:$16 sps:$4 sm:$0xff]   ;;  %v6473_v12 = vld [vmem:[#allocation11 + $0x480] ss:$16 sps:$4 sm:$0xff]   ;;  %v6481_v17 = vld [vmem:[#allocation11 + $0x4a4] ss:$16 sps:$4 sm:$0xff]  }
 0x433   :  { %4387 = vmatprep.subr.bf16.mxu0 %v6379_v6  ;;  %v6446_v6 = vld [vmem:[#allocation11 + $0x3e8] ss:$16 sps:$4 sm:$0xff]  }
 0x435   :  { %4505 = vmatpush1.bf16.msra.mxu1 %v6380_v7  ;;  %v6454_v7 = vld [vmem:[#allocation11 + $0x40c] ss:$16 sps:$4 sm:$0xff]  }
 0x436   :  { %4388 = vmatpush1.bf16.msra.mxu0 %v6377_v19  ;;  %4506 = vmatprep.subr.bf16.mxu1 %v6388_v1  ;;  %v6479_v19 = vld [vmem:[#allocation11 + $0x4a0] ss:$16 sps:$4 sm:$0xff]   ;;  %v6487_v1 = vld [vmem:[#allocation11 + $0x4c4] ss:$16 sps:$4 sm:$0xff]  }
 0x437   :  { %4389 = vmatprep.subr.bf16.mxu0 %v6385_v61  ;;  %v6452_v61 = vld [vmem:[#allocation11 + $0x408] ss:$16 sps:$4 sm:$0xff]  }
 0x439   :  { %4507 = vmatpush1.bf16.msra.mxu1 %v6386_v18  ;;  %v6460_v18 = vld [vmem:[#allocation11 + $0x42c] ss:$16 sps:$4 sm:$0xff]  }
 0x43a   :  { %4390 = vmatpush1.bf16.msra.mxu0 %v6383_v20  ;;  %4508 = vmatprep.subr.bf16.mxu1 %v6394_v23  ;;  %v6485_v20 = vld [vmem:[#allocation11 + $0x4c0] ss:$16 sps:$4 sm:$0xff]   ;;  %v6493_v23 = vld [vmem:[#allocation11 + $0x4e4] ss:$16 sps:$4 sm:$0xff]  }
 0x43b   :  { %4391 = vmatprep.subr.bf16.mxu0 %v6391_v21  ;;  %v6458_v21 = vld [vmem:[#allocation11 + $0x428] ss:$16 sps:$4 sm:$0xff]  }
 0x43d   :  { %4509 = vmatpush1.bf16.msra.mxu1 %v6392_v24  ;;  %v6466_v24 = vld [vmem:[#allocation11 + $0x44c] ss:$16 sps:$4 sm:$0xff]  }
 0x43e   :  { %4392 = vmatpush1.bf16.msra.mxu0 %v6389_v26  ;;  %4510 = vmatprep.subr.bf16.mxu1 %v6400_v27  ;;  %v6491_v26 = vld [vmem:[#allocation11 + $0x4e0] ss:$16 sps:$4 sm:$0xff]   ;;  %v6499_v27 = vld [vmem:[#allocation11 + $0x504] ss:$16 sps:$4 sm:$0xff]  }
 0x43f   :  { %4393 = vmatprep.subr.bf16.mxu0 %v6397_v28  ;;  %v6464_v28 = vld [vmem:[#allocation11 + $0x448] ss:$16 sps:$4 sm:$0xff]  }
 0x441   :  { %4511 = vmatpush1.bf16.msra.mxu1 %v6398_v29  ;;  %v6472_v29 = vld [vmem:[#allocation11 + $0x46c] ss:$16 sps:$4 sm:$0xff]  }
 0x442   :  { %4394 = vmatpush1.bf16.msra.mxu0 %v6395_v31  ;;  %4512 = vmatprep.subr.bf16.mxu1 %v6406_v54  ;;  %v6497_v31 = vld [vmem:[#allocation11 + $0x500] ss:$16 sps:$4 sm:$0xff]   ;;  %v6505_v54 = vld [vmem:[#allocation11 + $0x524] ss:$16 sps:$4 sm:$0xff]  }
 0x443   :  { %4395 = vmatprep.subr.bf16.mxu0 %v6403_v32  ;;  %v6470_v32 = vld [vmem:[#allocation11 + $0x468] ss:$16 sps:$4 sm:$0xff]  }
 0x445   :  { %4513 = vmatpush1.bf16.msra.mxu1 %v6404_v38  ;;  %v6503_v38 = vld [vmem:[#allocation11 + $0x520] ss:$16 sps:$4 sm:$0xff]  }
 0x446   :  { %4396 = vmatpush1.bf16.msra.mxu0 %v6401_v33  ;;  %4514 = vmatprep.subr.bf16.mxu1 %v6412_v34  ;;  %v6511_v33 = vld [vmem:[#allocation11 + $0x544] ss:$16 sps:$4 sm:$0xff]   ;;  %v6476_v34 = vld [vmem:[#allocation11 + $0x488] ss:$16 sps:$4 sm:$0xff]  }
 0x447   :  { %4397 = vmatprep.subr.bf16.mxu0 %v6409_v35  ;;  %v6484_v35 = vld [vmem:[#allocation11 + $0x4ac] ss:$16 sps:$4 sm:$0xff]  }
 0x449   :  { %4515 = vmatpush1.bf16.msra.mxu1 %v6410_v36  ;;  %v6509_v36 = vld [vmem:[#allocation11 + $0x540] ss:$16 sps:$4 sm:$0xff]  }
 0x44a   :  { %4398 = vmatpush1.bf16.msra.mxu0 %v6407_v40  ;;  %4516 = vmatprep.subr.bf16.mxu1 %v6418_v39  ;;  %v6517_v40 = vld [vmem:[#allocation11 + $0x564] ss:$16 sps:$4 sm:$0xff]   ;;  %v6482_v39 = vld [vmem:[#allocation11 + $0x4a8] ss:$16 sps:$4 sm:$0xff]  }
 0x44b   :  { %4399 = vmatprep.subr.bf16.mxu0 %v6415_v41  ;;  %v6490_v41 = vld [vmem:[#allocation11 + $0x4cc] ss:$16 sps:$4 sm:$0xff]  }
 0x44d   :  { %4517 = vmatpush1.bf16.msra.mxu1 %v6416_v42  ;;  %v6515_v42 = vld [vmem:[#allocation11 + $0x560] ss:$16 sps:$4 sm:$0xff]  }
 0x44e   :  { %4400 = vmatpush1.bf16.msra.mxu0 %v6413_v15  ;;  %4518 = vmatprep.subr.bf16.mxu1 %v6424_v2  ;;  %v6523_v15 = vld [vmem:[#allocation11 + $0x584] ss:$16 sps:$4 sm:$0xff]   ;;  %v6488_v2 = vld [vmem:[#allocation11 + $0x4c8] ss:$16 sps:$4 sm:$0xff]  }
 0x44f   :  { %4401 = vmatprep.subr.bf16.mxu0 %v6421_v55  ;;  %v6496_v55 = vld [vmem:[#allocation11 + $0x4ec] ss:$16 sps:$4 sm:$0xff]  }
 0x451   :  { %4519 = vmatpush1.bf16.msra.mxu1 %v6422_v43  ;;  %v6521_v43 = vld [vmem:[#allocation11 + $0x580] ss:$16 sps:$4 sm:$0xff]  }
 0x452   :  { %4402 = vmatpush1.bf16.msra.mxu0 %v6419_v44  ;;  %4520 = vmatprep.subr.bf16.mxu1 %v6430_v45  ;;  %v6529_v44 = vld [vmem:[#allocation11 + $0x5a4] ss:$16 sps:$4 sm:$0xff]   ;;  %v6494_v45 = vld [vmem:[#allocation11 + $0x4e8] ss:$16 sps:$4 sm:$0xff]  }
 0x453   :  { %4403 = vmatprep.subr.bf16.mxu0 %v6427_v46  ;;  %v6502_v46 = vld [vmem:[#allocation11 + $0x50c] ss:$16 sps:$4 sm:$0xff]  }
 0x455   :  { %4521 = vmatpush1.bf16.msra.mxu1 %v6428_v47  ;;  %v6527_v47 = vld [vmem:[#allocation11 + $0x5a0] ss:$16 sps:$4 sm:$0xff]  }
 0x456   :  { %4404 = vmatpush1.bf16.msra.mxu0 %v6425_v48  ;;  %4522 = vmatprep.subr.bf16.mxu1 %v6433_v49  ;;  %v6535_v48 = vld [vmem:[#allocation11 + $0x5c4] ss:$16 sps:$4 sm:$0xff]   ;;  %v6500_v49 = vld [vmem:[#allocation11 + $0x508] ss:$16 sps:$4 sm:$0xff]  }
 0x457   :  { %4416 = vmatprep.subr.bf16.mxu0 %v6451_v50  ;;  %v6508_v50 = vld [vmem:[#allocation11 + $0x52c] ss:$16 sps:$4 sm:$0xff]  }
 0x459   :  { %4406 = vmatmul.mubr.bf16.vlgmr.msra.gmra.mrb[16].mxu0 %v7341_v4  ;;  %4523 = vmatpush1.bf16.msra.mxu1 %v6431_v51  ;;  %v6533_v51 = vld [vmem:[#allocation11 + $0x5c0] ss:$16 sps:$4 sm:$0xff]  }
 0x45a   :  { %4524 = vmatprep.subr.bf16.mxu1 %v6436_v52  ;;  %4417 = vmatpush1.bf16.msra.mxu0 %v6449_v53  ;;  %v6541_v52 = vld [vmem:[#allocation11 + $0x5e4] ss:$16 sps:$4 sm:$0xff]   ;;  %v6506_v53 = vld [vmem:[#allocation11 + $0x528] ss:$16 sps:$4 sm:$0xff]  }
 0x45b   :  { %4418 = vmatprep.subr.bf16.mxu0 %v6457_v56  ;;  %v6514_v56 = vld [vmem:[#allocation11 + $0x54c] ss:$16 sps:$4 sm:$0xff]  }
 0x45d   :  { %4525 = vmatpush1.bf16.msra.mxu1 %v6434_v16  ;;  %v6539_v16 = vld [vmem:[#allocation11 + $0x5e0] ss:$16 sps:$4 sm:$0xff]  }
 0x45e   :  { %4526 = vmatprep.subr.bf16.mxu1 %v6439_v57  ;;  %4419 = vmatpush1.bf16.msra.mxu0 %v6455_v58  ;;  %v6545_v57 = vld [vmem:[#allocation14 + $0x40] sm:$0xff]  }
 0x45f   :  { %4420 = vmatprep.subr.bf16.mxu0 %v6463_v59  ;;  %v6512_v58 = vld [vmem:[#allocation11 + $0x548] ss:$16 sps:$4 sm:$0xff]   ;;  %v6520_v59 = vld [vmem:[#allocation11 + $0x56c] ss:$16 sps:$4 sm:$0xff]  }
 0x461   :  { %4527 = vmatpush1.bf16.msra.mxu1 %v6437_v8  ;;  %v6518_v8 = vld [vmem:[#allocation11 + $0x568] ss:$16 sps:$4 sm:$0xff]  }
 0x462   :  { %4528 = vmatprep.subr.bf16.mxu1 %v6442_v22  ;;  %4421 = vmatpush1.bf16.msra.mxu0 %v6461_v9  ;;  %v6526_v22 = vld [vmem:[#allocation11 + $0x58c] ss:$16 sps:$4 sm:$0xff]   ;;  %v6524_v9 = vld [vmem:[#allocation11 + $0x588] ss:$16 sps:$4 sm:$0xff]  }
 0x463   :  { %4422 = vmatprep.subr.bf16.mxu0 %v6469_v10  ;;  %v6532_v10 = vld [vmem:[#allocation11 + $0x5ac] ss:$16 sps:$4 sm:$0xff]  }
 0x465   :  { %4529 = vmatpush1.bf16.msra.mxu1 %v6440_v3  ;;  %v6530_v3 = vld [vmem:[#allocation11 + $0x5a8] ss:$16 sps:$4 sm:$0xff]  }
 0x466   :  { %4530 = vmatprep.subr.bf16.mxu1 %v6445_v11  ;;  %4423 = vmatpush1.bf16.msra.mxu0 %v6467_v5  ;;  %v6538_v11 = vld [vmem:[#allocation11 + $0x5cc] ss:$16 sps:$4 sm:$0xff]   ;;  %v6536_v5 = vld [vmem:[#allocation11 + $0x5c8] ss:$16 sps:$4 sm:$0xff]  }
 0x467   :  { %4424 = vmatprep.subr.bf16.mxu0 %v6475_v13  ;;  %v6544_v13 = vld [vmem:[#allocation11 + $0x5ec] ss:$16 sps:$4 sm:$0xff]  }
 0x469   :  { %4531 = vmatpush1.bf16.msra.mxu1 %v6443_v14  ;;  %v6542_v14 = vld [vmem:[#allocation11 + $0x5e8] ss:$16 sps:$4 sm:$0xff]  }
 0x46a   :  { %4532 = vmatprep.subr.bf16.mxu1 %v6448_v63  ;;  %4425 = vmatpush1.bf16.msra.mxu0 %v6473_v12  ;;  %v1299_v63 = vsub.s32 4, %v7321_v25  ;;  %v1303_v12 = vsub.s32 5, %v7321_v25 }
 0x46b   :  { %4426 = vmatprep.subr.bf16.mxu0 %v6481_v17 }
 0x46c   :  { %v1300_v17 = vrot.slane %v7324_v37, %v1299_v63 }
 0x46d   :  { %4533 = vmatpush1.bf16.msra.mxu1 %v6446_v6  ;;  %v1304_v6 = vrot.slane %v7324_v37, %v1303_v12  ;;  %v6547_v37 = vld [vmem:[#allocation14 + $0x48] sm:$0xff]  }
 0x46e   :  { %4545 = vmatprep.subr.bf16.mxu1 %v6454_v7  ;;  %4427 = vmatpush1.bf16.msra.mxu0 %v6479_v19 }
 0x46f   :  { %4428 = vmatprep.subr.bf16.mxu0 %v6487_v1 }
 0x470   :  { %4535 = vmatmul.mubr.bf16.vlgmr.msra.gmra.mrb[8].mxu1 %v7341_v4  ;;  %v6478_v4 = vld [vmem:[#allocation11 + $0x48c] ss:$16 sps:$4 sm:$0xff]  }
 0x471   :  { %4546 = vmatpush1.bf16.msra.mxu1 %v6452_v61 }
 0x472   :  { %4547 = vmatprep.subr.bf16.mxu1 %v6460_v18  ;;  %4429 = vmatpush1.bf16.msra.mxu0 %v6485_v20 }
 0x473   :  { %4430 = vmatprep.subr.bf16.mxu0 %v6493_v23 }
 0x475   :  { %4548 = vmatpush1.bf16.msra.mxu1 %v6458_v21 }
 0x476   :  { %4549 = vmatprep.subr.bf16.mxu1 %v6466_v24  ;;  %4431 = vmatpush1.bf16.msra.mxu0 %v6491_v26 }
 0x477   :  { %4432 = vmatprep.subr.bf16.mxu0 %v6499_v27 }
 0x479   :  { %4550 = vmatpush1.bf16.msra.mxu1 %v6464_v28 }
 0x47a   :  { %4551 = vmatprep.subr.bf16.mxu1 %v6472_v29  ;;  %4433 = vmatpush1.bf16.msra.mxu0 %v6497_v31 }
 0x47b   :  { %4434 = vmatprep.subr.bf16.mxu0 %v6505_v54  ;;  %v6546_v54 = vld [vmem:[#allocation14] sm:$0xff]  }
 0x47d   :  { %4552 = vmatpush1.bf16.msra.mxu1 %v6470_v32  ;;  %v6548_v32 = vld [vmem:[#allocation14 + $0x8] sm:$0xff]  }
 0x47e   :  { %4553 = vmatprep.subr.bf16.mxu1 %v6478_v4  ;;  %4435 = vmatpush1.bf16.msra.mxu0 %v6503_v38  ;;  %v6549_v4 = vld [vmem:[#allocation14 + $0x50] sm:$0xff]  }
 0x47f   :  { %4436 = vmatprep.subr.bf16.mxu0 %v6511_v33  ;;  %v6550_v38 = vld [vmem:[#allocation14 + $0x10] sm:$0xff]   ;;  %v6551_v33 = vld [vmem:[#allocation14 + $0x58] sm:$0xff]  }
 0x481   :  { %4554 = vmatpush1.bf16.msra.mxu1 %v6476_v34  ;;  %v6552_v34 = vld [vmem:[#allocation14 + $0x18] sm:$0xff]  }
 0x482   :  { %4555 = vmatprep.subr.bf16.mxu1 %v6484_v35  ;;  %4437 = vmatpush1.bf16.msra.mxu0 %v6509_v36  ;;  %v6553_v35 = vld [vmem:[#allocation14 + $0x60] sm:$0xff]  }
 0x483   :  { %4438 = vmatprep.subr.bf16.mxu0 %v6517_v40  ;;  %v6554_v36 = vld [vmem:[#allocation14 + $0x20] sm:$0xff]   ;;  %v6555_v40 = vld [vmem:[#allocation14 + $0x68] sm:$0xff]  }
 0x485   :  { %4556 = vmatpush1.bf16.msra.mxu1 %v6482_v39  ;;  %v6556_v39 = vld [vmem:[#allocation14 + $0x28] sm:$0xff]  }
 0x486   :  { %4557 = vmatprep.subr.bf16.mxu1 %v6490_v41  ;;  %4439 = vmatpush1.bf16.msra.mxu0 %v6515_v42  ;;  %v6557_v41 = vld [vmem:[#allocation14 + $0x70] sm:$0xff]  }
 0x487   :  { %4440 = vmatprep.subr.bf16.mxu0 %v6523_v15  ;;  %v6558_v42 = vld [vmem:[#allocation14 + $0x30] sm:$0xff]   ;;  %v6559_v15 = vld [vmem:[#allocation14 + $0x78] sm:$0xff]  }
 0x489   :  { %4558 = vmatpush1.bf16.msra.mxu1 %v6488_v2  ;;  %v6560_v2 = vld [vmem:[#allocation14 + $0x38] sm:$0xff]  }
 0x48a   :  { %4559 = vmatprep.subr.bf16.mxu1 %v6496_v55  ;;  %4441 = vmatpush1.bf16.msra.mxu0 %v6521_v43  ;;  %v6561_v55 = vld [vmem:[#allocation14 + $0xc0] sm:$0xff]   ;;  %v3348_v43 = vld [vmem:[#allocation13] sm:$0xf] }
 0x48b   :  { %4442 = vmatprep.subr.bf16.mxu0 %v6529_v44  ;;  %v3353_v44 = vrot.slane %v3348_v43, %v1283_v30 }
 0x48d   :  { %4560 = vmatpush1.bf16.msra.mxu1 %v6494_v45  ;;  %v3361_v45 = vrot.slane %v3348_v43, %v1291_v60 }
 0x48e   :  { %4561 = vmatprep.subr.bf16.mxu1 %v6502_v46  ;;  %4443 = vmatpush1.bf16.msra.mxu0 %v6527_v47  ;;  %v3357_v46 = vrot.slane %v3348_v43, %v1287_v62  ;;  %v3365_v47 = vrot.slane %v3348_v43, %v1295_v0 }
 0x48f   :  { %4444 = vmatprep.subr.bf16.mxu0 %v6535_v48 }
 0x491   :  { %4562 = vmatpush1.bf16.msra.mxu1 %v6500_v49 }
 0x492   :  { %4563 = vmatprep.subr.bf16.mxu1 %v6508_v50  ;;  %4445 = vmatpush1.bf16.msra.mxu0 %v6533_v51 }
 0x493   :  { %4446 = vmatprep.subr.bf16.mxu0 %v6541_v52 }
 0x495   :  { %4564 = vmatpush1.bf16.msra.mxu1 %v6506_v53 }
 0x496   :  { %4565 = vmatprep.subr.bf16.mxu1 %v6514_v56  ;;  %4447 = vmatpush1.bf16.msra.mxu0 %v6539_v16 }
 0x497   :  { %5581 = vmatprep.subr.bf16.mxu0 %v6545_v57 }
 0x499   :  { %4566 = vmatpush1.bf16.msra.mxu1 %v6512_v58 }
 0x49a   :  { %4567 = vmatprep.subr.bf16.mxu1 %v6520_v59 }
 0x49d   :  { %4568 = vmatpush1.bf16.msra.mxu1 %v6518_v8 }
 0x49e   :  { %4569 = vmatprep.subr.bf16.mxu1 %v6526_v22 }
 0x4a1   :  { %4570 = vmatpush1.bf16.msra.mxu1 %v6524_v9 }
 0x4a2   :  { %4571 = vmatprep.subr.bf16.mxu1 %v6532_v10 }
 0x4a5   :  { %4572 = vmatpush1.bf16.msra.mxu1 %v6530_v3 }
 0x4a6   :  { %4573 = vmatprep.subr.bf16.mxu1 %v6538_v11 }
 0x4a9   :  { %4574 = vmatpush1.bf16.msra.mxu1 %v6536_v5 }
 0x4aa   :  { %4575 = vmatprep.subr.bf16.mxu1 %v6544_v13 }
 0x4ad   :  { %4576 = vmatpush1.bf16.msra.mxu1 %v6542_v14 }
 0x4c2   :  { %v3129_v7 = vpop.f32.mrb[4].mxu1 }
 0x4c3   :  { %v5633_v19 = vadd.f32 %v3129_v7, %v1300_v17  ;;  %v3131_v1 = vpop.f32.mrb[5].mxu1  ;;  %v6563_v7 = vld [vmem:[#allocation14 + $0xc8] sm:$0xff]  }
 0x4c4   :  { %v5634_v61 = vadd.f32 %v3131_v1, %v1304_v6  ;;  %v3133_v18 = vpop.f32.mrb[6].mxu1  ;;  %v6565_v1 = vld [vmem:[#allocation14 + $0xd0] sm:$0xff]  }
 0x4c5   :  { %6597 = vtanh.f32 %v5633_v19  ;;  %v5635_v20 = vadd.f32 %v3133_v18, %v1300_v17  ;;  %v3135_v23 = vpop.f32.mrb[7].mxu1  ;;  %v6564_v19 = vld [vmem:[#allocation14 + $0x88] sm:$0xff]   ;;  %v6567_v18 = vld [vmem:[#allocation14 + $0xd8] sm:$0xff]  }
 0x4c6   :  { %6599 = vtanh.f32 %v5634_v61  ;;  %v5636_v21 = vadd.f32 %v3135_v23, %v1304_v6  ;;  %v6562_v6 = vld [vmem:[#allocation14 + $0x80] sm:$0xff]   ;;  %v6566_v61 = vld [vmem:[#allocation14 + $0x90] sm:$0xff]  }
 0x4c7   :  { %6601 = vtanh.f32 %v5635_v20  ;;  %v6568_v20 = vld [vmem:[#allocation14 + $0x98] sm:$0xff]   ;;  %v6569_v23 = vld [vmem:[#allocation14 + $0xe0] sm:$0xff]  }
 0x4c8   :  { %6603 = vtanh.f32 %v5636_v21  ;;  %v6570_v21 = vld [vmem:[#allocation14 + $0xa0] sm:$0xff]  }
 0x4cf   :  { %v6598_v24 = vpop.eup %6597 }
 0x4d0   :  { %v6600_v26 = vpop.eup %6599 }
 0x4d1   :  { %v6602_v27 = vpop.eup %6601 }
 0x4d2   :  { %v6604_v28 = vpop.eup %6603  ;;  %v3154_v29 = vpack.c.bf16 %v6602_v27, %v6598_v24  ;;  %v6571_v24 = vld [vmem:[#allocation14 + $0xe8] sm:$0xff]   ;;  %v6573_v27 = vld [vmem:[#allocation14 + $0xf0] sm:$0xff]  }
 0x4d3   :  { %v3155_v31 = vpack.c.bf16 %v6604_v28, %v6600_v26  ;;  %v6572_v26 = vld [vmem:[#allocation14 + $0xa8] sm:$0xff]   ;;  %v6574_v28 = vld [vmem:[#allocation14 + $0xb0] sm:$0xff]  }
 0x4d5   :  { %4448 = vmatprep.mubr.bf16.mxu0 %v3155_v31  ;;  %4577 = vmatprep.mubr.bf16.mxu1 %v3155_v31  ;;  %v6576_v31 = vld [vmem:[#allocation14 + $0xb8] sm:$0xff]  }
 0x4d6   :  { %4449 = vmatmul.mubr.bf16.vlgmr.msra.gmra.mrb[16].mxu0 %v3154_v29  ;;  %4578 = vmatmul.mubr.bf16.vlgmr.msra.gmra.mrb[8].mxu1 %v3154_v29  ;;  %v6575_v29 = vld [vmem:[#allocation14 + $0xf8] sm:$0xff]  }
 0x4d7   :  { %5582 = vmatpush3.bf16.msra.mxu0 %v6546_v54 }
 0x4d8   :  { %5583 = vmatprep.subr.bf16.mxu0 %v6547_v37 }
 0x4db   :  { %5584 = vmatpush3.bf16.msra.mxu0 %v6548_v32 }
 0x4dc   :  { %5585 = vmatprep.subr.bf16.mxu0 %v6549_v4 }
 0x4df   :  { %5586 = vmatpush3.bf16.msra.mxu0 %v6550_v38 }
 0x4e0   :  { %5587 = vmatprep.subr.bf16.mxu0 %v6551_v33 }
 0x4e3   :  { %5588 = vmatpush3.bf16.msra.mxu0 %v6552_v34  ;;  %v5548_v34 = vld [vmem:[#allocation16] ss:$0 sm:$0xff] }
 0x4e4   :  { %5589 = vmatprep.subr.bf16.mxu0 %v6553_v35 }
 0x4e7   :  { %5590 = vmatpush3.bf16.msra.mxu0 %v6554_v36 }
 0x4e8   :  { %5591 = vmatprep.subr.bf16.mxu0 %v6555_v40 }
 0x4eb   :  { %5592 = vmatpush3.bf16.msra.mxu0 %v6556_v39 }
 0x4ec   :  { %5593 = vmatprep.subr.bf16.mxu0 %v6557_v41 }
 0x4ef   :  { %5594 = vmatpush3.bf16.msra.mxu0 %v6558_v42 }
 0x4f0   :  { %5595 = vmatprep.subr.bf16.mxu0 %v6559_v15 }
 0x4f3   :  { %5596 = vmatpush3.bf16.msra.mxu0 %v6560_v2 }
 0x4f4   :  { %5603 = vmatprep.subr.bf16.mxu0 %v6561_v55 }
 0x5a9   :  { %v4450_v48 = vpop.f32.mrb[16].mxu0  ;;  %v4579_v49 = vpop.f32.mrb[8].mxu1 }
 0x5aa   :  { %v5637_v50 = vadd.f32 %v4450_v48, %v3353_v44  ;;  %v5641_v51 = vadd.f32 %v4579_v49, %v3361_v45  ;;  %v4452_v52 = vpop.f32.mrb[17].mxu0  ;;  %v4581_v53 = vpop.f32.mrb[9].mxu1 }
 0x5ab   :  { %v5638_v56 = vadd.f32 %v4452_v52, %v3357_v46  ;;  %v5642_v16 = vadd.f32 %v4581_v53, %v3365_v47  ;;  %v4454_v57 = vpop.f32.mrb[18].mxu0  ;;  %v4583_v58 = vpop.f32.mrb[10].mxu1 }
 0x5ac   :  { %v5639_v30 = vadd.f32 %v4454_v57, %v3353_v44  ;;  %v5643_v59 = vadd.f32 %v4583_v58, %v3361_v45  ;;  %v4456_v8 = vpop.f32.mrb[19].mxu0  ;;  %v4585_v60 = vpop.f32.mrb[11].mxu1  ;;  %v4588_v62 = vmax.f32 %v5637_v50, 0.0  ;;  %v4590_v10 = vmax.f32 %v5641_v51, 0.0 }
 0x5ad   :  { %v5640_v22 = vadd.f32 %v4456_v8, %v3357_v46  ;;  %v5644_v9 = vadd.f32 %v4585_v60, %v3365_v47  ;;  %v4589_v3 = vmax.f32 %v5638_v56, 0.0  ;;  %v4591_v11 = vmax.f32 %v5642_v16, 0.0 }
 0x5ae   :  { %v4592_v25 = vmax.f32 %v5639_v30, 0.0  ;;  %v4594_v0 = vmax.f32 %v5643_v59, 0.0 }
 0x5af   :  { %v4593_v5 = vmax.f32 %v5640_v22, 0.0  ;;  %v4595_v13 = vmax.f32 %v5644_v9, 0.0 }
 0x5b0   :  { %v4596_v14 = vpack.c.bf16 %v4592_v25, %v4588_v62  ;;  %v4598_v63 = vpack.c.bf16 %v4594_v0, %v4590_v10 }
 0x5b1   :  { %v4597_v12 = vpack.c.bf16 %v4593_v5, %v4589_v3  ;;  %v4599_v17 = vpack.c.bf16 %v4595_v13, %v4591_v11 }
 0x5b3   :  { %4895 = vmatprep.mubr.bf16.mxu0 %v4597_v12 }
 0x5b4   :  { %4896 = vmatmul.mubr.bf16.vlgmr.msra.gmra.mrb[20].mxu0 %v4596_v14 }
 0x5b5   :  { %5604 = vmatpush3.bf16.msra.mxu0 %v6562_v6  ;;  %4936 = vmatprep.mubr.bf16.mxu0 %v4599_v17 }
 0x5b6   :  { %5605 = vmatprep.subr.bf16.mxu0 %v6563_v7 }
 0x5b9   :  { %5606 = vmatpush3.bf16.msra.mxu0 %v6564_v19 }
 0x5ba   :  { %5607 = vmatprep.subr.bf16.mxu0 %v6565_v1 }
 0x5bd   :  { %5608 = vmatpush3.bf16.msra.mxu0 %v6566_v61 }
 0x5be   :  { %5609 = vmatprep.subr.bf16.mxu0 %v6567_v18 }
 0x5c1   :  { %5610 = vmatpush3.bf16.msra.mxu0 %v6568_v20 }
 0x5c2   :  { %5611 = vmatprep.subr.bf16.mxu0 %v6569_v23 }
 0x5c5   :  { %5612 = vmatpush3.bf16.msra.mxu0 %v6570_v21 }
 0x5c6   :  { %5613 = vmatprep.subr.bf16.mxu0 %v6571_v24 }
 0x5c9   :  { %5614 = vmatpush3.bf16.msra.mxu0 %v6572_v26 }
 0x5ca   :  { %5615 = vmatprep.subr.bf16.mxu0 %v6573_v27 }
 0x5cd   :  { %5616 = vmatpush3.bf16.msra.mxu0 %v6574_v28 }
 0x5ce   :  { %5617 = vmatprep.subr.bf16.mxu0 %v6575_v29 }
 0x5d1   :  { %5618 = vmatpush3.bf16.msra.mxu0 %v6576_v31 }
 0x5d4   :  { %4937 = vmatmul.mubr.bf16.vlgmr.msra.gmra.mrb[24].mxu0 %v4598_v63 }
 0x687   :  { %v5597_v54 = vpop.f32.mrb[20].mxu0 }
 0x688   :  { %v5598_v37 = vpop.f32.mrb[21].mxu0 }
 0x689   :  { %v5599_v32 = vadd.f32 %v5598_v37, %v5597_v54  ;;  %v5600_v4 = vpop.f32.mrb[22].mxu0 }
 0x68a   :  { %v5601_v38 = vpop.f32.mrb[23].mxu0 }
 0x68b   :  { %v5602_v33 = vadd.f32 %v5601_v38, %v5600_v4  ;;  %v4898_v40 = vadd.f32 %v5599_v32, %v5548_v34 }
 0x68d   :  { %v4901_v15 = vadd.f32 %v5602_v33, %v5548_v34 }
 0x6a7   :  { %v5619_v35 = vpop.f32.mrb[24].mxu0 }
 0x6a8   :  { %v5620_v36 = vpop.f32.mrb[25].mxu0 }
 0x6a9   :  { %v5621_v39 = vadd.f32 %v5620_v36, %v5619_v35  ;;  %v5622_v41 = vpop.f32.mrb[26].mxu0 }
 0x6aa   :  { %v5623_v42 = vpop.f32.mrb[27].mxu0 }
 0x6ab   :  { %v5624_v2 = vadd.f32 %v5623_v42, %v5622_v41  ;;  %v4939_v55 = vadd.f32 %v5621_v39, %v4898_v40 }
 0x6ad   :  { %4945 = vmax.xlane.f32.xlu0 %v4939_v55  ;;  %v4942_v43 = vadd.f32 %v5624_v2, %v4901_v15 }
 0x6af   :  { %4947 = vmax.xlane.f32.xlu1 %v4942_v43 }
 0x73a   :  { %v4946_v44 = vpop.xlane.xlu0 %4945 }
 0x73b   :  { %v4949_v45 = vsub.f32 %v4939_v55, %v4946_v44 }
 0x73c   :  { %v4948_v46 = vpop.xlane.xlu1 %4947 }
 0x73d   :  { %v4951_v47 = vmul.f32 1.442695, %v4949_v45  ;;  %v4950_v48 = vsub.f32 %v4942_v43, %v4948_v46 }
 0x73f   :  { %6605 = vpow2.f32 %v4951_v47  ;;  %v4953_v49 = vmul.f32 1.442695, %v4950_v48 }
 0x741   :  { %6607 = vpow2.f32 %v4953_v49 }
 0x749   :  { %v6606_v50 = vpop.eup %6605 }
 0x74a   :  { %4955 = vadd.xlane.f32.xlu0 %v6606_v50 }
 0x74b   :  { %v6608_v51 = vpop.eup %6607 }
 0x74c   :  { %4957 = vadd.xlane.f32.xlu1 %v6608_v51 }
 0x7d7   :  { %v4956_v52 = vpop.xlane.xlu0 %4955 }
 0x7d8   :  { %6609 = vlog2.f32 %v4956_v52 }
 0x7d9   :  { %v4958_v53 = vpop.xlane.xlu1 %4957 }
 0x7da   :  { %6611 = vlog2.f32 %v4958_v53 }
 0x7e2   :  { %v6610_v56 = vpop.eup %6609 }
 0x7e3   :  { %v4960_v16 = vmul.f32 0.6931472, %v6610_v56 }
 0x7e4   :  { %v6612_v57 = vpop.eup %6611 }
 0x7e5   :  { %v4963_v58 = vsub.f32 %v4949_v45, %v4960_v16  ;;  %v4962_v30 = vmul.f32 0.6931472, %v6612_v57 }
 0x7e7   :  { %4965 = vst [vmem:[#allocation17] sm:$0xff] %v4963_v58  ;;  %v4964_v59 = vsub.f32 %v4950_v48, %v4962_v30 }
 0x7e9   :  { %4966 = vst [vmem:[#allocation17 + $0x8] sm:$0xff] %v4964_v59 }
 0x7ea   :  { %6824 = shalt.err (!%p6821_p6)
}
 0x7eb   :  { %s6825_s24 = scalar_lea.hbm %s7381_s9, 256 }
 0x7ec   :  { %p6826_p7 = scmp.ne.s32.totalorder %s7381_s9, %s6825_s24  ;;  %p6829_p8 = scmp.lt.u32.totalorder %s6825_s24, %s7381_s9 }
 0x7ee   :  { %p6831_p9 = pnand %p6829_p8, %p6826_p7 }
 0x7f0   :  { %6834 = shalt.err (!%p6831_p9)
}
 0x7f1   :  { %4978 = dma.vmem_to_hbm [thread:$0]  %s4973_s17, 256, %s7381_s9, [#allocation4], %s6848_s19, %s6848_s19, %s6849_s20  }
 0x7f2   :  { %6845 = dma.done.wait [#allocation4], 256  }
 0x7f3   :  { %6846 = vsyncadd [#allocation4], 4294967040 }
 0x7f4   :  { %4982 = vsyncpa [#allocation3], 1 }
 0x7f5   :  { %4983 = vsyncpa [#allocation6], 1 }
 0x7f6   :  { %4984 = vsyncpa [#allocation9], 1 }
 0x7f7   :  { %4985 = vsyncpa [#allocation12], 1 }
 0x7f8   :  { %4986 = vsyncpa [#allocation15], 1 }
 0x7f9   :  { %4987 = vsyncpa [#allocation4], 1 }

</bundles_post_ra>
